<compile_context>
chip_gen: v6e
topology: v6e:2x2x1
jax: 0.10.0
libtpu: 0.0.40
codegen_flags: <defaults>
</compile_context>

<pallas_src>
import functools

import jax
import jax.numpy as jnp
import numpy as np
from jax.experimental import pallas as pl
from jax.experimental.pallas import tpu as pltpu

EPS = 1e-5
LANE = 128
SUBLANE_BF16 = 16


def _round_up(x, m):
    return ((x + m - 1) // m) * m


# ----------------------------- Pallas kernel --------------------------------
def _bn_rows(z, gamma, beta, eps, relu, m_rows):
    """Training-mode BatchNorm over rows (= N*Ho*Wo) of a (M, C) f32 tile.

    Single pass: var = E[z^2] - E[z]^2 (clamped at 0).
    Padded channel columns are all-zero -> mean=var=0 -> rsqrt(eps) is huge,
    but gamma/beta are zero-padded there so the padded outputs stay exactly 0.
    KEEP this invariant if the padding scheme ever changes.
    """
    inv_m = 1.0 / m_rows
    s = jnp.sum(z, axis=0, keepdims=True)
    ss = jnp.sum(z * z, axis=0, keepdims=True)
    mean = s * inv_m
    var = jnp.maximum(ss * inv_m - mean * mean, 0.0)
    y = gamma * (z - mean) * jax.lax.rsqrt(var + eps) + beta
    if relu:
        y = jnp.maximum(y, 0.0)
    return y


def _bottleneck_kernel(*refs, n, ho, wo, c1, c3, eps, use_1x1conv):
    if use_1x1conv:
        (x_ref, w14_ref, b4_ref, g1_ref, be1_ref,
         w2_ref, g2_ref, be2_ref, w3_ref, g3_ref, be3_ref,
         o_ref, y1p_ref, xcol_ref) = refs
    else:
        (x_ref, w1_ref, g1_ref, be1_ref,
         w2_ref, g2_ref, be2_ref, w3_ref, g3_ref, be3_ref,
         o_ref, y1p_ref, xcol_ref) = refs

    m = n * ho * wo

    # ---- conv1 (1x1, stride folded into the input) [+ fused shortcut conv4] ----
    if use_1x1conv:
        # Input arrives in bf16 (it only feeds MXU operands in this path).
        x_bf = x_ref[...]
        z14 = jnp.dot(x_bf, w14_ref[...], preferred_element_type=jnp.float32)
        z1 = z14[:, :c1]
        shortcut = z14[:, c1:] + b4_ref[...]
    else:
        # Identity shortcut: keep the input in f32 for the residual add.
        x_f32 = x_ref[...]
        z1 = jnp.dot(x_f32.astype(jnp.bfloat16), w1_ref[...],
                     preferred_element_type=jnp.float32)
        shortcut = x_f32                     # Cin_pad == C3_pad (asserted outside)

    # bn1 + relu (conv bias dropped: cancels under training-mode BN)
    y1 = _bn_rows(z1, g1_ref[...], be1_ref[...], eps, relu=True, m_rows=m)

    # ---- stage y1 (bf16, cast once) into the zero-halo VMEM scratch ----------
    # Only the halo border is zeroed; interior is overwritten right away.
    wp = y1p_ref.shape[2]
    zrow = jnp.zeros((n, 1, wp, c1), dtype=jnp.bfloat16)
    zcol = jnp.zeros((n, ho, 1, c1), dtype=jnp.bfloat16)
    y1p_ref[:, 0:1, :, :] = zrow
    y1p_ref[:, ho + 1:ho + 2, :, :] = zrow
    y1p_ref[:, 1:ho + 1, 0:1, :] = zcol
    y1p_ref[:, 1:ho + 1, wo + 1:wo + 2, :] = zcol
    y1p_ref[:, 1:ho + 1, 1:wo + 1, :] = (
        y1.astype(jnp.bfloat16).reshape(n, ho, wo, c1))

    # ---- conv2 (3x3, pad 1): in-VMEM im2col -> ONE wide-K (9*C1) matmul ------
    for di in range(3):
        for dj in range(3):
            k = di * 3 + dj
            patch = y1p_ref[:, di:di + ho, dj:dj + wo, :]     # (N,Ho,Wo,C1) bf16
            xcol_ref[:, k * c1:(k + 1) * c1] = patch.reshape(m, c1)
    z2 = jnp.dot(xcol_ref[...], w2_ref[...], preferred_element_type=jnp.float32)
    y2 = _bn_rows(z2, g2_ref[...], be2_ref[...], eps, relu=True, m_rows=m)

    # ---- conv3 (1x1) + bn3 + residual add + final ReLU ----
    z3 = jnp.dot(y2.astype(jnp.bfloat16), w3_ref[...],
                 preferred_element_type=jnp.float32)
    y3 = _bn_rows(z3, g3_ref[...], be3_ref[...], eps, relu=False, m_rows=m)
    o_ref[...] = jnp.maximum(y3 + shortcut, 0.0)


def _full_spec(arr):
    nd = arr.ndim
    return pl.BlockSpec(arr.shape, lambda i, _nd=nd: (0,) * _nd)


# ------------------------- one-time parameter prep --------------------------
def prepare_params(params, use_1x1conv):
    """Pad channels to multiples of 128, pack conv2 for im2col, cast to bf16."""
    w1 = params['w1']                       # torch OIHW: (nc, cin, 1, 1)
    nc, cin = int(w1.shape[0]), int(w1.shape[1])
    c_in_p = _round_up(cin, LANE)
    c1 = _round_up(nc, LANE)
    c3 = _round_up(4 * nc, LANE)

    def pad2(w, rows, cols):
        return jnp.pad(w, ((0, rows - w.shape[0]), (0, cols - w.shape[1])))

    def pad_vec(v, c):
        return jnp.pad(v, (0, c - v.shape[0])).reshape(1, c).astype(jnp.float32)

    w1p = pad2(w1[:, :, 0, 0].T, c_in_p, c1).astype(jnp.bfloat16)     # (Cin_p, C1)

    # conv2 weight packed for one wide-K im2col matmul: (9*C1, C1).
    # Row order (di, dj, in_channel) matches the kernel's tap-packing order.
    w2_hwio = jnp.transpose(params['w2'], (2, 3, 1, 0))               # (3,3,I,O)
    w2p = jnp.pad(w2_hwio, ((0, 0), (0, 0), (0, c1 - nc), (0, c1 - nc)))
    w2p = w2p.reshape(9 * c1, c1).astype(jnp.bfloat16)

    w3p = pad2(params['w3'][:, :, 0, 0].T, c1, c3).astype(jnp.bfloat16)  # (C1, C3)

    prepped = {
        'nc': nc, 'cin': cin, 'c_in_p': c_in_p, 'c1': c1, 'c3': c3,
        'w2': w2p, 'w3': w3p,
        'g1': pad_vec(params['g1'], c1), 'be1': pad_vec(params['be1'], c1),
        'g2': pad_vec(params['g2'], c1), 'be2': pad_vec(params['be2'], c1),
        'g3': pad_vec(params['g3'], c3), 'be3': pad_vec(params['be3'], c3),
    }
    if use_1x1conv:
        w4p = pad2(params['w4'][:, :, 0, 0].T, c_in_p, c3).astype(jnp.bfloat16)
        prepped['w14'] = jnp.concatenate([w1p, w4p], axis=1)   # (Cin_p, C1+C3)
        prepped['b4'] = pad_vec(params['b4'], c3)
    else:
        prepped['w1'] = w1p
    return prepped


# ------------------------------- forward ------------------------------------
def residual_forward(x_nchw, prepped, strides, use_1x1conv):
    # NCHW -> NHWC at the module boundary for interface parity with PyTorch.
    # TODO(synk): in a full model keep activations NHWC end-to-end and also fold
    # the stride subsample / channel pad into the input BlockSpec once tiled.
    x = jnp.transpose(x_nchw, (0, 2, 3, 1))
    N, H, W, Cin = x.shape
    xs = x[:, ::strides, ::strides, :]            # 1x1 conv w/ stride == subsample
    Ho, Wo = xs.shape[1], xs.shape[2]
    M = N * Ho * Wo

    nc = prepped['nc']
    c_in_p, c1, c3 = prepped['c_in_p'], prepped['c1'], prepped['c3']
    if not use_1x1conv:
        assert Cin == 4 * nc and c_in_p == c3, "identity shortcut requires Cin == 4*nc"

    xs2d = jnp.pad(xs, ((0, 0), (0, 0), (0, 0), (0, c_in_p - Cin))).reshape(M, c_in_p)
    if use_1x1conv:
        # Input only feeds MXU operands in this path: ship bf16 (half the DMA).
        xs2d = xs2d.astype(jnp.bfloat16)

    kernel = functools.partial(_bottleneck_kernel, n=N, ho=Ho, wo=Wo,
                               c1=c1, c3=c3, eps=EPS, use_1x1conv=use_1x1conv)
    if use_1x1conv:
        inputs = [xs2d, prepped['w14'], prepped['b4'],
                  prepped['g1'], prepped['be1'],
                  prepped['w2'], prepped['g2'], prepped['be2'],
                  prepped['w3'], prepped['g3'], prepped['be3']]
    else:
        inputs = [xs2d, prepped['w1'],
                  prepped['g1'], prepped['be1'],
                  prepped['w2'], prepped['g2'], prepped['be2'],
                  prepped['w3'], prepped['g3'], prepped['be3']]

    wp = _round_up(Wo + 2, SUBLANE_BF16)          # sublane-aligned bf16 scratch W
    out = pl.pallas_call(
        kernel,
        out_shape=jax.ShapeDtypeStruct((M, c3), jnp.float32),
        grid=(1,),
        in_specs=[_full_spec(a) for a in inputs],
        out_specs=pl.BlockSpec((M, c3), lambda i: (0, 0)),
        scratch_shapes=[
            pltpu.VMEM((N, Ho + 2, wp, c1), jnp.bfloat16),   # zero-halo y1 stage
            pltpu.VMEM((M, 9 * c1), jnp.bfloat16),           # im2col operand
        ],
        compiler_params=pltpu.CompilerParams(
            dimension_semantics=("arbitrary",),
            vmem_limit_bytes=32 * 1024 * 1024),
    )(*inputs)

    if c3 != 4 * nc:                              # real ResNet-50 stages skip this
        out = out[:, :4 * nc]
    out = out.reshape(N, Ho, Wo, 4 * nc)
    return jnp.transpose(out, (0, 3, 1, 2))       # NHWC -> NCHW


# ---------------------------- pure-JAX reference ----------------------------
def _bn_train(z, gamma, beta, eps=EPS):
    mean = jnp.mean(z, axis=(0, 1, 2), keepdims=True)
    var = jnp.mean(jnp.square(z - mean), axis=(0, 1, 2), keepdims=True)
    return gamma * (z - mean) * jax.lax.rsqrt(var + eps) + beta


def _conv(x_nhwc, w_torch, b, stride, pad):
    w = jnp.transpose(w_torch, (2, 3, 1, 0))          # OIHW -> HWIO
    out = jax.lax.conv_general_dilated(
        x_nhwc, w, window_strides=(stride, stride),
        padding=[(pad, pad), (pad, pad)],
        dimension_numbers=('NHWC', 'HWIO', 'NHWC'))
    return out + b


def residual_ref(x_nchw, params, strides, use_1x1conv):
    x = jnp.transpose(x_nchw, (0, 2, 3, 1))
    y = jax.nn.relu(_bn_train(_conv(x, params['w1'], params['b1'], strides, 0),
                              params['g1'], params['be1']))
    y = jax.nn.relu(_bn_train(_conv(y, params['w2'], params['b2'], 1, 1),
                              params['g2'], params['be2']))
    y = _bn_train(_conv(y, params['w3'], params['b3'], 1, 0),
                  params['g3'], params['be3'])
    if use_1x1conv:
        sc = _conv(x, params['w4'], params['b4'], strides, 0)
    else:
        sc = x[:, ::strides, ::strides, :]
    out = jax.nn.relu(y + sc)
    return jnp.transpose(out, (0, 3, 1, 2))


# ------------------------------ params / main -------------------------------
def init_params(key, input_channels, num_channels, use_1x1conv):
    ks = jax.random.split(key, 14)
    nc = num_channels

    def rnd(k, shape, scale=0.1):
        return scale * jax.random.normal(k, shape, dtype=jnp.float32)

    p = {
        'w1': rnd(ks[0], (nc, input_channels, 1, 1)), 'b1': rnd(ks[1], (nc,)),
        'w2': rnd(ks[2], (nc, nc, 3, 3)),             'b2': rnd(ks[3], (nc,)),
        'w3': rnd(ks[4], (4 * nc, nc, 1, 1)),         'b3': rnd(ks[5], (4 * nc,)),
        'g1': 1.0 + rnd(ks[6], (nc,)),      'be1': rnd(ks[7], (nc,)),
        'g2': 1.0 + rnd(ks[8], (nc,)),      'be2': rnd(ks[9], (nc,)),
        'g3': 1.0 + rnd(ks[10], (4 * nc,)), 'be3': rnd(ks[11], (4 * nc,)),
    }
    if use_1x1conv:
        p['w4'] = rnd(ks[12], (4 * nc, input_channels, 1, 1))
        p['b4'] = rnd(ks[13], (4 * nc,))
    return p


if __name__ == "__main__":
    key = jax.random.PRNGKey(0)
    kp1, kp2, kx1, kx2 = jax.random.split(key, 4)

    # Case 1: downsample bottleneck (use_1x1conv=True, strides=2)
    x1 = jax.random.normal(kx1, (2, 4, 16, 16), dtype=jnp.float32)
    p1 = init_params(kp1, input_channels=4, num_channels=8, use_1x1conv=True)
    prep1 = prepare_params(p1, use_1x1conv=True)
    fwd1 = jax.jit(lambda x: residual_forward(x, prep1, strides=2, use_1x1conv=True))
    out1 = jax.block_until_ready(fwd1(x1))
    ref1 = residual_ref(x1, p1, strides=2, use_1x1conv=True)
    assert out1.shape == (2, 32, 8, 8)
    np.testing.assert_allclose(np.asarray(out1), np.asarray(ref1), atol=5e-2, rtol=5e-2)

    # Case 2: identity shortcut (use_1x1conv=False, strides=1, Cin == 4*num_channels)
    x2 = jax.random.normal(kx2, (2, 32, 16, 16), dtype=jnp.float32)
    p2 = init_params(kp2, input_channels=32, num_channels=8, use_1x1conv=False)
    prep2 = prepare_params(p2, use_1x1conv=False)
    fwd2 = jax.jit(lambda x: residual_forward(x, prep2, strides=1, use_1x1conv=False))
    out2 = jax.block_until_ready(fwd2(x2))
    ref2 = residual_ref(x2, p2, strides=1, use_1x1conv=False)
    assert out2.shape == (2, 32, 16, 16)
    np.testing.assert_allclose(np.asarray(out2), np.asarray(ref2), atol=5e-2, rtol=5e-2)

    print("KERNEL_OK")
</pallas_src>

<mosaic_0001>
module attributes {stable_mosaic.version = 11 : i64} {
  func.func @_bottleneck_kernel(%arg0: i32, %arg1: memref<128x128xbf16, #tpu.memory_space<vmem>>, %arg2: memref<128x256xbf16, #tpu.memory_space<vmem>>, %arg3: memref<1x128xf32, #tpu.memory_space<vmem>>, %arg4: memref<1x128xf32, #tpu.memory_space<vmem>>, %arg5: memref<1x128xf32, #tpu.memory_space<vmem>>, %arg6: memref<1152x128xbf16, #tpu.memory_space<vmem>>, %arg7: memref<1x128xf32, #tpu.memory_space<vmem>>, %arg8: memref<1x128xf32, #tpu.memory_space<vmem>>, %arg9: memref<128x128xbf16, #tpu.memory_space<vmem>>, %arg10: memref<1x128xf32, #tpu.memory_space<vmem>>, %arg11: memref<1x128xf32, #tpu.memory_space<vmem>>, %arg12: memref<128x128xf32, #tpu.memory_space<vmem>>, %arg13: memref<2x10x16x128xbf16, #tpu.memory_space<vmem>>, %arg14: memref<128x1152xbf16, #tpu.memory_space<vmem>>) attributes {dimension_semantics = [#tpu.dimension_semantics<arbitrary>], iteration_bounds = array<i64: 1>, scalar_prefetch = 0 : i64, scratch_operands = 2 : i64, tpu.core_type = #tpu.core_type<tc>, window_params = [{pipeline_mode = #tpu.pipeline_mode<synchronous>, transform_indices = @transform_0, window_bounds = array<i64: 128, 128>}, {pipeline_mode = #tpu.pipeline_mode<synchronous>, transform_indices = @transform_1, window_bounds = array<i64: 128, 256>}, {pipeline_mode = #tpu.pipeline_mode<synchronous>, transform_indices = @transform_2, window_bounds = array<i64: 1, 128>}, {pipeline_mode = #tpu.pipeline_mode<synchronous>, transform_indices = @transform_3, window_bounds = array<i64: 1, 128>}, {pipeline_mode = #tpu.pipeline_mode<synchronous>, transform_indices = @transform_4, window_bounds = array<i64: 1, 128>}, {pipeline_mode = #tpu.pipeline_mode<synchronous>, transform_indices = @transform_5, window_bounds = array<i64: 1152, 128>}, {pipeline_mode = #tpu.pipeline_mode<synchronous>, transform_indices = @transform_6, window_bounds = array<i64: 1, 128>}, {pipeline_mode = #tpu.pipeline_mode<synchronous>, transform_indices = @transform_7, window_bounds = array<i64: 1, 128>}, {pipeline_mode = #tpu.pipeline_mode<synchronous>, transform_indices = @transform_8, window_bounds = array<i64: 128, 128>}, {pipeline_mode = #tpu.pipeline_mode<synchronous>, transform_indices = @transform_9, window_bounds = array<i64: 1, 128>}, {pipeline_mode = #tpu.pipeline_mode<synchronous>, transform_indices = @transform_10, window_bounds = array<i64: 1, 128>}, {pipeline_mode = #tpu.pipeline_mode<synchronous>, transform_indices = @transform_11, window_bounds = array<i64: 128, 128>}]} {
    %c0 = arith.constant 0 : index
    %c0_0 = arith.constant 0 : index
    %0 = vector.load %arg1[%c0, %c0_0] : memref<128x128xbf16, #tpu.memory_space<vmem>>, vector<128x128xbf16>
    %c0_1 = arith.constant 0 : index
    %c0_2 = arith.constant 0 : index
    %1 = vector.load %arg2[%c0_1, %c0_2] : memref<128x256xbf16, #tpu.memory_space<vmem>>, vector<128x256xbf16>
    %cst = arith.constant dense<0.000000e+00> : vector<128x256xf32>
    %2 = tpu.matmul %0, %1, %cst {dimension_numbers = #tpu.dot_dimension_numbers<[1], [0], [0], [1], [0, 0, 1, 1], [], []>} : vector<128x128xbf16>, vector<128x256xbf16>, vector<128x256xf32> -> vector<128x256xf32>
    %3 = vector.extract_strided_slice %2 {offsets = [0, 0], sizes = [128, 128], strides = [1, 1]} : vector<128x256xf32> to vector<128x128xf32>
    %4 = vector.extract_strided_slice %2 {offsets = [0, 128], sizes = [128, 128], strides = [1, 1]} : vector<128x256xf32> to vector<128x128xf32>
    %c0_3 = arith.constant 0 : index
    %c0_4 = arith.constant 0 : index
    %5 = vector.load %arg3[%c0_3, %c0_4] : memref<1x128xf32, #tpu.memory_space<vmem>>, vector<1x128xf32>
    %6 = vector.broadcast %5 : vector<1x128xf32> to vector<128x128xf32>
    %7 = arith.addf %4, %6 : vector<128x128xf32>
    %c0_5 = arith.constant 0 : index
    %c0_6 = arith.constant 0 : index
    %8 = vector.load %arg4[%c0_5, %c0_6] : memref<1x128xf32, #tpu.memory_space<vmem>>, vector<1x128xf32>
    %c0_7 = arith.constant 0 : index
    %c0_8 = arith.constant 0 : index
    %9 = vector.load %arg5[%c0_7, %c0_8] : memref<1x128xf32, #tpu.memory_space<vmem>>, vector<1x128xf32>
    %cst_9 = arith.constant dense<0.000000e+00> : vector<128xf32>
    %10 = vector.multi_reduction <add>, %3, %cst_9 [0] : vector<128x128xf32> to vector<128xf32>
    %11 = vector.shape_cast %10 : vector<128xf32> to vector<1x128xf32>
    %12 = arith.mulf %3, %3 : vector<128x128xf32>
    %cst_10 = arith.constant dense<0.000000e+00> : vector<128xf32>
    %13 = vector.multi_reduction <add>, %12, %cst_10 [0] : vector<128x128xf32> to vector<128xf32>
    %14 = vector.shape_cast %13 : vector<128xf32> to vector<1x128xf32>
    %cst_11 = arith.constant 7.812500e-03 : f32
    %15 = vector.broadcast %cst_11 : f32 to vector<1x128xf32>
    %16 = arith.mulf %11, %15 : vector<1x128xf32>
    %cst_12 = arith.constant 7.812500e-03 : f32
    %17 = vector.broadcast %cst_12 : f32 to vector<1x128xf32>
    %18 = arith.mulf %14, %17 : vector<1x128xf32>
    %19 = arith.mulf %16, %16 : vector<1x128xf32>
    %20 = arith.subf %18, %19 : vector<1x128xf32>
    %cst_13 = arith.constant 0.000000e+00 : f32
    %21 = vector.broadcast %cst_13 : f32 to vector<1x128xf32>
    %22 = arith.maximumf %20, %21 : vector<1x128xf32>
    %23 = vector.broadcast %16 : vector<1x128xf32> to vector<128x128xf32>
    %24 = arith.subf %3, %23 : vector<128x128xf32>
    %25 = vector.broadcast %8 : vector<1x128xf32> to vector<128x128xf32>
    %26 = arith.mulf %25, %24 : vector<128x128xf32>
    %cst_14 = arith.constant 9.99999974E-6 : f32
    %27 = vector.broadcast %cst_14 : f32 to vector<1x128xf32>
    %28 = arith.addf %22, %27 : vector<1x128xf32>
    %29 = math.rsqrt %28 : vector<1x128xf32>
    %30 = vector.broadcast %29 : vector<1x128xf32> to vector<128x128xf32>
    %31 = arith.mulf %26, %30 : vector<128x128xf32>
    %32 = vector.broadcast %9 : vector<1x128xf32> to vector<128x128xf32>
    %33 = arith.addf %31, %32 : vector<128x128xf32>
    %cst_15 = arith.constant 0.000000e+00 : f32
    %34 = vector.broadcast %cst_15 : f32 to vector<128x128xf32>
    %35 = arith.maximumf %33, %34 : vector<128x128xf32>
    %cst_16 = arith.constant 0.000000e+00 : bf16
    %36 = vector.broadcast %cst_16 : bf16 to vector<2x1x16x128xbf16>
    %cst_17 = arith.constant 0.000000e+00 : bf16
    %37 = vector.broadcast %cst_17 : bf16 to vector<2x8x1x128xbf16>
    %c0_18 = arith.constant 0 : index
    %c0_19 = arith.constant 0 : index
    %c0_20 = arith.constant 0 : index
    %c0_21 = arith.constant 0 : index
    %38 = vector.load %arg13[%c0_18, %c0_19, %c0_20, %c0_21] : memref<2x10x16x128xbf16, #tpu.memory_space<vmem>>, vector<2x1x16x128xbf16>
    tpu.vector_store %arg13[%c0_18, %c0_19, %c0_20, %c0_21], %36 {strides = array<i32>} : memref<2x10x16x128xbf16, #tpu.memory_space<vmem>>, vector<2x1x16x128xbf16>,
    %c0_22 = arith.constant 0 : index
    %c9 = arith.constant 9 : index
    %c0_23 = arith.constant 0 : index
    %c0_24 = arith.constant 0 : index
    %39 = vector.load %arg13[%c0_22, %c9, %c0_23, %c0_24] : memref<2x10x16x128xbf16, #tpu.memory_space<vmem>>, vector<2x1x16x128xbf16>
    tpu.vector_store %arg13[%c0_22, %c9, %c0_23, %c0_24], %36 {strides = array<i32>} : memref<2x10x16x128xbf16, #tpu.memory_space<vmem>>, vector<2x1x16x128xbf16>,
    %c0_25 = arith.constant 0 : index
    %c1 = arith.constant 1 : index
    %c0_26 = arith.constant 0 : index
    %c0_27 = arith.constant 0 : index
    %40 = vector.load %arg13[%c0_25, %c1, %c0_26, %c0_27] : memref<2x10x16x128xbf16, #tpu.memory_space<vmem>>, vector<2x8x1x128xbf16>
    tpu.vector_store %arg13[%c0_25, %c1, %c0_26, %c0_27], %37 {strides = array<i32>} : memref<2x10x16x128xbf16, #tpu.memory_space<vmem>>, vector<2x8x1x128xbf16>,
    %c0_28 = arith.constant 0 : index
    %c1_29 = arith.constant 1 : index
    %c9_30 = arith.constant 9 : index
    %c0_31 = arith.constant 0 : index
    %41 = vector.load %arg13[%c0_28, %c1_29, %c9_30, %c0_31] : memref<2x10x16x128xbf16, #tpu.memory_space<vmem>>, vector<2x8x1x128xbf16>
    tpu.vector_store %arg13[%c0_28, %c1_29, %c9_30, %c0_31], %37 {strides = array<i32>} : memref<2x10x16x128xbf16, #tpu.memory_space<vmem>>, vector<2x8x1x128xbf16>,
    %42 = arith.truncf %35 : vector<128x128xf32> to vector<128x128xbf16>
    %43 = vector.shape_cast %42 : vector<128x128xbf16> to vector<2x8x8x128xbf16>
    %c0_32 = arith.constant 0 : index
    %c1_33 = arith.constant 1 : index
    %c1_34 = arith.constant 1 : index
    %c0_35 = arith.constant 0 : index
    %44 = vector.load %arg13[%c0_32, %c1_33, %c1_34, %c0_35] : memref<2x10x16x128xbf16, #tpu.memory_space<vmem>>, vector<2x8x8x128xbf16>
    tpu.vector_store %arg13[%c0_32, %c1_33, %c1_34, %c0_35], %43 {strides = array<i32>} : memref<2x10x16x128xbf16, #tpu.memory_space<vmem>>, vector<2x8x8x128xbf16>,
    %c0_36 = arith.constant 0 : index
    %c0_37 = arith.constant 0 : index
    %c0_38 = arith.constant 0 : index
    %c0_39 = arith.constant 0 : index
    %45 = vector.load %arg13[%c0_36, %c0_37, %c0_38, %c0_39] : memref<2x10x16x128xbf16, #tpu.memory_space<vmem>>, vector<2x8x8x128xbf16>
    %46 = vector.shape_cast %45 : vector<2x8x8x128xbf16> to vector<128x128xbf16>
    %c0_40 = arith.constant 0 : index
    %c0_41 = arith.constant 0 : index
    %47 = vector.load %arg14[%c0_40, %c0_41] : memref<128x1152xbf16, #tpu.memory_space<vmem>>, vector<128x128xbf16>
    tpu.vector_store %arg14[%c0_40, %c0_41], %46 {strides = array<i32>} : memref<128x1152xbf16, #tpu.memory_space<vmem>>, vector<128x128xbf16>,
    %c0_42 = arith.constant 0 : index
    %c0_43 = arith.constant 0 : index
    %c1_44 = arith.constant 1 : index
    %c0_45 = arith.constant 0 : index
    %48 = vector.load %arg13[%c0_42, %c0_43, %c1_44, %c0_45] : memref<2x10x16x128xbf16, #tpu.memory_space<vmem>>, vector<2x8x8x128xbf16>
    %49 = vector.shape_cast %48 : vector<2x8x8x128xbf16> to vector<128x128xbf16>
    %c0_46 = arith.constant 0 : index
    %c128 = arith.constant 128 : index
    %50 = vector.load %arg14[%c0_46, %c128] : memref<128x1152xbf16, #tpu.memory_space<vmem>>, vector<128x128xbf16>
    tpu.vector_store %arg14[%c0_46, %c128], %49 {strides = array<i32>} : memref<128x1152xbf16, #tpu.memory_space<vmem>>, vector<128x128xbf16>,
    %c0_47 = arith.constant 0 : index
    %c0_48 = arith.constant 0 : index
    %c2 = arith.constant 2 : index
    %c0_49 = arith.constant 0 : index
    %51 = vector.load %arg13[%c0_47, %c0_48, %c2, %c0_49] : memref<2x10x16x128xbf16, #tpu.memory_space<vmem>>, vector<2x8x8x128xbf16>
    %52 = vector.shape_cast %51 : vector<2x8x8x128xbf16> to vector<128x128xbf16>
    %c0_50 = arith.constant 0 : index
    %c256 = arith.constant 256 : index
    %53 = vector.load %arg14[%c0_50, %c256] : memref<128x1152xbf16, #tpu.memory_space<vmem>>, vector<128x128xbf16>
    tpu.vector_store %arg14[%c0_50, %c256], %52 {strides = array<i32>} : memref<128x1152xbf16, #tpu.memory_space<vmem>>, vector<128x128xbf16>,
    %c0_51 = arith.constant 0 : index
    %c1_52 = arith.constant 1 : index
    %c0_53 = arith.constant 0 : index
    %c0_54 = arith.constant 0 : index
    %54 = vector.load %arg13[%c0_51, %c1_52, %c0_53, %c0_54] : memref<2x10x16x128xbf16, #tpu.memory_space<vmem>>, vector<2x8x8x128xbf16>
    %55 = vector.shape_cast %54 : vector<2x8x8x128xbf16> to vector<128x128xbf16>
    %c0_55 = arith.constant 0 : index
    %c384 = arith.constant 384 : index
    %56 = vector.load %arg14[%c0_55, %c384] : memref<128x1152xbf16, #tpu.memory_space<vmem>>, vector<128x128xbf16>
    tpu.vector_store %arg14[%c0_55, %c384], %55 {strides = array<i32>} : memref<128x1152xbf16, #tpu.memory_space<vmem>>, vector<128x128xbf16>,
    %c0_56 = arith.constant 0 : index
    %c1_57 = arith.constant 1 : index
    %c1_58 = arith.constant 1 : index
    %c0_59 = arith.constant 0 : index
    %57 = vector.load %arg13[%c0_56, %c1_57, %c1_58, %c0_59] : memref<2x10x16x128xbf16, #tpu.memory_space<vmem>>, vector<2x8x8x128xbf16>
    %58 = vector.shape_cast %57 : vector<2x8x8x128xbf16> to vector<128x128xbf16>
    %c0_60 = arith.constant 0 : index
    %c512 = arith.constant 512 : index
    %59 = vector.load %arg14[%c0_60, %c512] : memref<128x1152xbf16, #tpu.memory_space<vmem>>, vector<128x128xbf16>
    tpu.vector_store %arg14[%c0_60, %c512], %58 {strides = array<i32>} : memref<128x1152xbf16, #tpu.memory_space<vmem>>, vector<128x128xbf16>,
    %c0_61 = arith.constant 0 : index
    %c1_62 = arith.constant 1 : index
    %c2_63 = arith.constant 2 : index
    %c0_64 = arith.constant 0 : index
    %60 = vector.load %arg13[%c0_61, %c1_62, %c2_63, %c0_64] : memref<2x10x16x128xbf16, #tpu.memory_space<vmem>>, vector<2x8x8x128xbf16>
    %61 = vector.shape_cast %60 : vector<2x8x8x128xbf16> to vector<128x128xbf16>
    %c0_65 = arith.constant 0 : index
    %c640 = arith.constant 640 : index
    %62 = vector.load %arg14[%c0_65, %c640] : memref<128x1152xbf16, #tpu.memory_space<vmem>>, vector<128x128xbf16>
    tpu.vector_store %arg14[%c0_65, %c640], %61 {strides = array<i32>} : memref<128x1152xbf16, #tpu.memory_space<vmem>>, vector<128x128xbf16>,
    %c0_66 = arith.constant 0 : index
    %c2_67 = arith.constant 2 : index
    %c0_68 = arith.constant 0 : index
    %c0_69 = arith.constant 0 : index
    %63 = vector.load %arg13[%c0_66, %c2_67, %c0_68, %c0_69] : memref<2x10x16x128xbf16, #tpu.memory_space<vmem>>, vector<2x8x8x128xbf16>
    %64 = vector.shape_cast %63 : vector<2x8x8x128xbf16> to vector<128x128xbf16>
    %c0_70 = arith.constant 0 : index
    %c768 = arith.constant 768 : index
    %65 = vector.load %arg14[%c0_70, %c768] : memref<128x1152xbf16, #tpu.memory_space<vmem>>, vector<128x128xbf16>
    tpu.vector_store %arg14[%c0_70, %c768], %64 {strides = array<i32>} : memref<128x1152xbf16, #tpu.memory_space<vmem>>, vector<128x128xbf16>,
    %c0_71 = arith.constant 0 : index
    %c2_72 = arith.constant 2 : index
    %c1_73 = arith.constant 1 : index
    %c0_74 = arith.constant 0 : index
    %66 = vector.load %arg13[%c0_71, %c2_72, %c1_73, %c0_74] : memref<2x10x16x128xbf16, #tpu.memory_space<vmem>>, vector<2x8x8x128xbf16>
    %67 = vector.shape_cast %66 : vector<2x8x8x128xbf16> to vector<128x128xbf16>
    %c0_75 = arith.constant 0 : index
    %c896 = arith.constant 896 : index
    %68 = vector.load %arg14[%c0_75, %c896] : memref<128x1152xbf16, #tpu.memory_space<vmem>>, vector<128x128xbf16>
    tpu.vector_store %arg14[%c0_75, %c896], %67 {strides = array<i32>} : memref<128x1152xbf16, #tpu.memory_space<vmem>>, vector<128x128xbf16>,
    %c0_76 = arith.constant 0 : index
    %c2_77 = arith.constant 2 : index
    %c2_78 = arith.constant 2 : index
    %c0_79 = arith.constant 0 : index
    %69 = vector.load %arg13[%c0_76, %c2_77, %c2_78, %c0_79] : memref<2x10x16x128xbf16, #tpu.memory_space<vmem>>, vector<2x8x8x128xbf16>
    %70 = vector.shape_cast %69 : vector<2x8x8x128xbf16> to vector<128x128xbf16>
    %c0_80 = arith.constant 0 : index
    %c1024 = arith.constant 1024 : index
    %71 = vector.load %arg14[%c0_80, %c1024] : memref<128x1152xbf16, #tpu.memory_space<vmem>>, vector<128x128xbf16>
    tpu.vector_store %arg14[%c0_80, %c1024], %70 {strides = array<i32>} : memref<128x1152xbf16, #tpu.memory_space<vmem>>, vector<128x128xbf16>,
    %c0_81 = arith.constant 0 : index
    %c0_82 = arith.constant 0 : index
    %72 = vector.load %arg14[%c0_81, %c0_82] : memref<128x1152xbf16, #tpu.memory_space<vmem>>, vector<128x1152xbf16>
    %c0_83 = arith.constant 0 : index
    %c0_84 = arith.constant 0 : index
    %73 = vector.load %arg6[%c0_83, %c0_84] : memref<1152x128xbf16, #tpu.memory_space<vmem>>, vector<1152x128xbf16>
    %cst_85 = arith.constant dense<0.000000e+00> : vector<128x128xf32>
    %74 = tpu.matmul %72, %73, %cst_85 {dimension_numbers = #tpu.dot_dimension_numbers<[1], [0], [0], [1], [0, 0, 1, 1], [], []>} : vector<128x1152xbf16>, vector<1152x128xbf16>, vector<128x128xf32> -> vector<128x128xf32>
    %c0_86 = arith.constant 0 : index
    %c0_87 = arith.constant 0 : index
    %75 = vector.load %arg7[%c0_86, %c0_87] : memref<1x128xf32, #tpu.memory_space<vmem>>, vector<1x128xf32>
    %c0_88 = arith.constant 0 : index
    %c0_89 = arith.constant 0 : index
    %76 = vector.load %arg8[%c0_88, %c0_89] : memref<1x128xf32, #tpu.memory_space<vmem>>, vector<1x128xf32>
    %cst_90 = arith.constant dense<0.000000e+00> : vector<128xf32>
    %77 = vector.multi_reduction <add>, %74, %cst_90 [0] : vector<128x128xf32> to vector<128xf32>
    %78 = vector.shape_cast %77 : vector<128xf32> to vector<1x128xf32>
    %79 = arith.mulf %74, %74 : vector<128x128xf32>
    %cst_91 = arith.constant dense<0.000000e+00> : vector<128xf32>
    %80 = vector.multi_reduction <add>, %79, %cst_91 [0] : vector<128x128xf32> to vector<128xf32>
    %81 = vector.shape_cast %80 : vector<128xf32> to vector<1x128xf32>
    %cst_92 = arith.constant 7.812500e-03 : f32
    %82 = vector.broadcast %cst_92 : f32 to vector<1x128xf32>
    %83 = arith.mulf %78, %82 : vector<1x128xf32>
    %cst_93 = arith.constant 7.812500e-03 : f32
    %84 = vector.broadcast %cst_93 : f32 to vector<1x128xf32>
    %85 = arith.mulf %81, %84 : vector<1x128xf32>
    %86 = arith.mulf %83, %83 : vector<1x128xf32>
    %87 = arith.subf %85, %86 : vector<1x128xf32>
    %cst_94 = arith.constant 0.000000e+00 : f32
    %88 = vector.broadcast %cst_94 : f32 to vector<1x128xf32>
    %89 = arith.maximumf %87, %88 : vector<1x128xf32>
    %90 = vector.broadcast %83 : vector<1x128xf32> to vector<128x128xf32>
    %91 = arith.subf %74, %90 : vector<128x128xf32>
    %92 = vector.broadcast %75 : vector<1x128xf32> to vector<128x128xf32>
    %93 = arith.mulf %92, %91 : vector<128x128xf32>
    %cst_95 = arith.constant 9.99999974E-6 : f32
    %94 = vector.broadcast %cst_95 : f32 to vector<1x128xf32>
    %95 = arith.addf %89, %94 : vector<1x128xf32>
    %96 = math.rsqrt %95 : vector<1x128xf32>
    %97 = vector.broadcast %96 : vector<1x128xf32> to vector<128x128xf32>
    %98 = arith.mulf %93, %97 : vector<128x128xf32>
    %99 = vector.broadcast %76 : vector<1x128xf32> to vector<128x128xf32>
    %100 = arith.addf %98, %99 : vector<128x128xf32>
    %cst_96 = arith.constant 0.000000e+00 : f32
    %101 = vector.broadcast %cst_96 : f32 to vector<128x128xf32>
    %102 = arith.maximumf %100, %101 : vector<128x128xf32>
    %103 = arith.truncf %102 : vector<128x128xf32> to vector<128x128xbf16>
    %c0_97 = arith.constant 0 : index
    %c0_98 = arith.constant 0 : index
    %104 = vector.load %arg9[%c0_97, %c0_98] : memref<128x128xbf16, #tpu.memory_space<vmem>>, vector<128x128xbf16>
    %cst_99 = arith.constant dense<0.000000e+00> : vector<128x128xf32>
    %105 = tpu.matmul %103, %104, %cst_99 {dimension_numbers = #tpu.dot_dimension_numbers<[1], [0], [0], [1], [0, 0, 1, 1], [], []>} : vector<128x128xbf16>, vector<128x128xbf16>, vector<128x128xf32> -> vector<128x128xf32>
    %c0_100 = arith.constant 0 : index
    %c0_101 = arith.constant 0 : index
    %106 = vector.load %arg10[%c0_100, %c0_101] : memref<1x128xf32, #tpu.memory_space<vmem>>, vector<1x128xf32>
    %c0_102 = arith.constant 0 : index
    %c0_103 = arith.constant 0 : index
    %107 = vector.load %arg11[%c0_102, %c0_103] : memref<1x128xf32, #tpu.memory_space<vmem>>, vector<1x128xf32>
    %cst_104 = arith.constant dense<0.000000e+00> : vector<128xf32>
    %108 = vector.multi_reduction <add>, %105, %cst_104 [0] : vector<128x128xf32> to vector<128xf32>
    %109 = vector.shape_cast %108 : vector<128xf32> to vector<1x128xf32>
    %110 = arith.mulf %105, %105 : vector<128x128xf32>
    %cst_105 = arith.constant dense<0.000000e+00> : vector<128xf32>
    %111 = vector.multi_reduction <add>, %110, %cst_105 [0] : vector<128x128xf32> to vector<128xf32>
    %112 = vector.shape_cast %111 : vector<128xf32> to vector<1x128xf32>
    %cst_106 = arith.constant 7.812500e-03 : f32
    %113 = vector.broadcast %cst_106 : f32 to vector<1x128xf32>
    %114 = arith.mulf %109, %113 : vector<1x128xf32>
    %cst_107 = arith.constant 7.812500e-03 : f32
    %115 = vector.broadcast %cst_107 : f32 to vector<1x128xf32>
    %116 = arith.mulf %112, %115 : vector<1x128xf32>
    %117 = arith.mulf %114, %114 : vector<1x128xf32>
    %118 = arith.subf %116, %117 : vector<1x128xf32>
    %cst_108 = arith.constant 0.000000e+00 : f32
    %119 = vector.broadcast %cst_108 : f32 to vector<1x128xf32>
    %120 = arith.maximumf %118, %119 : vector<1x128xf32>
    %121 = vector.broadcast %114 : vector<1x128xf32> to vector<128x128xf32>
    %122 = arith.subf %105, %121 : vector<128x128xf32>
    %123 = vector.broadcast %106 : vector<1x128xf32> to vector<128x128xf32>
    %124 = arith.mulf %123, %122 : vector<128x128xf32>
    %cst_109 = arith.constant 9.99999974E-6 : f32
    %125 = vector.broadcast %cst_109 : f32 to vector<1x128xf32>
    %126 = arith.addf %120, %125 : vector<1x128xf32>
    %127 = math.rsqrt %126 : vector<1x128xf32>
    %128 = vector.broadcast %127 : vector<1x128xf32> to vector<128x128xf32>
    %129 = arith.mulf %124, %128 : vector<128x128xf32>
    %130 = vector.broadcast %107 : vector<1x128xf32> to vector<128x128xf32>
    %131 = arith.addf %129, %130 : vector<128x128xf32>
    %132 = arith.addf %131, %7 : vector<128x128xf32>
    %cst_110 = arith.constant 0.000000e+00 : f32
    %133 = vector.broadcast %cst_110 : f32 to vector<128x128xf32>
    %134 = arith.maximumf %132, %133 : vector<128x128xf32>
    %c0_111 = arith.constant 0 : index
    %c0_112 = arith.constant 0 : index
    %135 = vector.load %arg12[%c0_111, %c0_112] : memref<128x128xf32, #tpu.memory_space<vmem>>, vector<128x128xf32>
    tpu.vector_store %arg12[%c0_111, %c0_112], %134 {strides = array<i32>} : memref<128x128xf32, #tpu.memory_space<vmem>>, vector<128x128xf32>,
    return
  }
  func.func @transform_0(%arg0: i32) -> (i32, i32) {
    %c0_i32 = arith.constant 0 : i32
    %c0_i32_0 = arith.constant 0 : i32
    %c0_i32_1 = arith.constant 0 : i32
    return %c0_i32, %c0_i32_0 : i32, i32
  }
  func.func @transform_1(%arg0: i32) -> (i32, i32) {
    %c0_i32 = arith.constant 0 : i32
    %c0_i32_0 = arith.constant 0 : i32
    %c0_i32_1 = arith.constant 0 : i32
    return %c0_i32, %c0_i32_0 : i32, i32
  }
  func.func @transform_2(%arg0: i32) -> (i32, i32) {
    %c0_i32 = arith.constant 0 : i32
    %c0_i32_0 = arith.constant 0 : i32
    %c0_i32_1 = arith.constant 0 : i32
    return %c0_i32, %c0_i32_0 : i32, i32
  }
  func.func @transform_3(%arg0: i32) -> (i32, i32) {
    %c0_i32 = arith.constant 0 : i32
    %c0_i32_0 = arith.constant 0 : i32
    %c0_i32_1 = arith.constant 0 : i32
    return %c0_i32, %c0_i32_0 : i32, i32
  }
  func.func @transform_4(%arg0: i32) -> (i32, i32) {
    %c0_i32 = arith.constant 0 : i32
    %c0_i32_0 = arith.constant 0 : i32
    %c0_i32_1 = arith.constant 0 : i32
    return %c0_i32, %c0_i32_0 : i32, i32
  }
  func.func @transform_5(%arg0: i32) -> (i32, i32) {
    %c0_i32 = arith.constant 0 : i32
    %c0_i32_0 = arith.constant 0 : i32
    %c0_i32_1 = arith.constant 0 : i32
    return %c0_i32, %c0_i32_0 : i32, i32
  }
  func.func @transform_6(%arg0: i32) -> (i32, i32) {
    %c0_i32 = arith.constant 0 : i32
    %c0_i32_0 = arith.constant 0 : i32
    %c0_i32_1 = arith.constant 0 : i32
    return %c0_i32, %c0_i32_0 : i32, i32
  }
  func.func @transform_7(%arg0: i32) -> (i32, i32) {
    %c0_i32 = arith.constant 0 : i32
    %c0_i32_0 = arith.constant 0 : i32
    %c0_i32_1 = arith.constant 0 : i32
    return %c0_i32, %c0_i32_0 : i32, i32
  }
  func.func @transform_8(%arg0: i32) -> (i32, i32) {
    %c0_i32 = arith.constant 0 : i32
    %c0_i32_0 = arith.constant 0 : i32
    %c0_i32_1 = arith.constant 0 : i32
    return %c0_i32, %c0_i32_0 : i32, i32
  }
  func.func @transform_9(%arg0: i32) -> (i32, i32) {
    %c0_i32 = arith.constant 0 : i32
    %c0_i32_0 = arith.constant 0 : i32
    %c0_i32_1 = arith.constant 0 : i32
    return %c0_i32, %c0_i32_0 : i32, i32
  }
  func.func @transform_10(%arg0: i32) -> (i32, i32) {
    %c0_i32 = arith.constant 0 : i32
    %c0_i32_0 = arith.constant 0 : i32
    %c0_i32_1 = arith.constant 0 : i32
    return %c0_i32, %c0_i32_0 : i32, i32
  }
  func.func @transform_11(%arg0: i32) -> (i32, i32) {
    %c0_i32 = arith.constant 0 : i32
    %c0_i32_0 = arith.constant 0 : i32
    %c0_i32_1 = arith.constant 0 : i32
    return %c0_i32, %c0_i32_0 : i32, i32
  }
}

</mosaic_0001>

<bundles_post_ra>
// kernel: _lambda_.1
= control target key start
LH: loop header
LB: loop body
LE: loop exit
PB: predicated region body
PF: predicated region fallthrough
CT: control target
= control target key end

     0   :  { %16 = vsyncpa [#allocation5], 0  ;;  %s6613_s0 = inlined_call_operand.vmem [shape: bf16[128,128], index: 0, kind: input, shape index: {}]   ;;  %s6614_s1 = inlined_call_operand.vmem [shape: bf16[128,256], index: 1, kind: input, shape index: {}]   ;;  %s6615_s2 = inlined_call_operand.vmem [shape: f32[1,128], index: 2, kind: input, shape index: {}]   ;;  %s6616_s3 = inlined_call_operand.vmem [shape: f32[1,128], index: 3, kind: input, shape index: {}]   ;;  %s6617_s4 = inlined_call_operand.vmem [shape: f32[1,128], index: 4, kind: input, shape index: {}]   ;;  %s6618_s5 = inlined_call_operand.hbm [shape: bf16[1152,128], index: 5, kind: input, shape index: {}]   ;;  %s6619_s6 = inlined_call_operand.vmem [shape: f32[1,128], index: 6, kind: input, shape index: {}]   ;;  %s6620_s7 = inlined_call_operand.vmem [shape: f32[1,128], index: 7, kind: input, shape index: {}]   ;;  %s6621_s8 = inlined_call_operand.vmem [shape: bf16[128,128], index: 8, kind: input, shape index: {}]   ;;  %s6622_s9 = inlined_call_operand.vmem [shape: f32[1,128], index: 9, kind: input, shape index: {}]   ;;  %s6623_s10 = inlined_call_operand.vmem [shape: f32[1,128], index: 10, kind: input, shape index: {}]   ;;  %s6624_s11 = inlined_call_operand.hbm [shape: f32[128,128], index: 11, kind: output, shape index: {}]  }
   0x1   :  { %17 = vsyncpa [#allocation6], 0  ;;  %s5292_s17 = smov [#allocation4]  }
   0x2   :  { %s33_s18 = sshll.u32 %s5292_s17, 4  ;;  %s34_s18 = int_to_ptr.vmem [resolvable:$true] %s33_s18 }
   0x3   :  { %s5256_s19 = scalar_lea.vmem %s34_s18, 9216  ;;  %p5261_p1 = scmp.lt.s32.totalorder %s34_s18, %s34_s18 }
   0x4   :  { %p5257_p0 = scmp.ne.s32.totalorder %s34_s18, %s5256_s19  ;;  %p5262_p2 = scmp.lt.s32.totalorder %s5256_s19, %s5256_s19 }
   0x6   :  { %p5263_p3 = por %p5262_p2, %p5261_p1 }
   0x8   :  { %p5264_p4 = pnand %p5263_p3, %p5257_p0 }
   0xa   :  { %5267 = shalt.err (!%p5264_p4)
}
   0xb   :  { %s5293_s20 = smov 64   ;;  %s5294_s21 = smov 4  }
   0xc   :  { %39 = dma.hbm_to_vmem [thread:$0]  %s6618_s5, 9216, %s34_s18, [#allocation5], %s5293_s20, %s5293_s20, %s5294_s21  }
   0xd   :  { %5288 = dma.done.wait [#allocation5], 9216  }
   0xe   :  { %5289 = vsyncadd [#allocation5], 4294958080  ;;  %v5295_v0 = vmov 0   ;;  %v5040_v1 = vld [vmem:[%s6614_s1 + $0x74] ss:$8 sps:$4 sm:$0xff]   ;;  %v5064_v17 = vld [vmem:[%s6613_s0] sm:$0xff]  }
   0xf   :  { %246 = vmatprep.mubr.bf16.mxu0 %v5295_v0  ;;  %509 = vst [vmem:[#allocation2] sm:$0xf] %v5295_v0  ;;  %510 = vst [vmem:[#allocation2 + $0x4] sm:$0xf] %v5295_v0  ;;  %v5042_v2 = vld [vmem:[%s6614_s1 + $0x70] ss:$8 sps:$4 sm:$0xff]   ;;  %214 = vmatprep.subr.bf16.mxu0 %v5040_v1 }
  0x10   :  { %511 = vst [vmem:[#allocation2 + $0x50] sm:$0xf] %v5295_v0  ;;  %512 = vst [vmem:[#allocation2 + $0x54] sm:$0xf] %v5295_v0  ;;  %v5043_v3 = vld [vmem:[%s6614_s1 + $0x64] ss:$8 sps:$4 sm:$0xff]   ;;  %215 = vmatpush1.bf16.msra.mxu0 %v5042_v2 }
  0x11   :  { %514 = vst [vmem:[#allocation2 + $0x48] sm:$0xf] %v5295_v0  ;;  %515 = vst [vmem:[#allocation2 + $0x4c] sm:$0xf] %v5295_v0  ;;  %v5045_v4 = vld [vmem:[%s6614_s1 + $0x60] ss:$8 sps:$4 sm:$0xff]   ;;  %216 = vmatprep.subr.bf16.mxu0 %v5043_v3 }
  0x12   :  { %516 = vst [vmem:[#allocation2 + $0x98] sm:$0xf] %v5295_v0  ;;  %517 = vst [vmem:[#allocation2 + $0x9c] sm:$0xf] %v5295_v0  ;;  %v5046_v5 = vld [vmem:[%s6614_s1 + $0x54] ss:$8 sps:$4 sm:$0xff]  }
  0x13   :  { %v5048_v6 = vld [vmem:[%s6614_s1 + $0x50] ss:$8 sps:$4 sm:$0xff]   ;;  %v5049_v7 = vld [vmem:[%s6614_s1 + $0x44] ss:$8 sps:$4 sm:$0xff]   ;;  %v5051_v8 = vld [vmem:[%s6614_s1 + $0x40] ss:$8 sps:$4 sm:$0xff]  }
  0x14   :  { %217 = vmatpush1.bf16.msra.mxu0 %v5045_v4  ;;  %v5052_v9 = vld [vmem:[%s6614_s1 + $0x34] ss:$8 sps:$4 sm:$0xff]   ;;  %v5054_v10 = vld [vmem:[%s6614_s1 + $0x30] ss:$8 sps:$4 sm:$0xff]   ;;  %v5055_v11 = vld [vmem:[%s6614_s1 + $0x24] ss:$8 sps:$4 sm:$0xff]  }
  0x15   :  { %218 = vmatprep.subr.bf16.mxu0 %v5046_v5  ;;  %v5057_v12 = vld [vmem:[%s6614_s1 + $0x20] ss:$8 sps:$4 sm:$0xff]   ;;  %v5058_v13 = vld [vmem:[%s6614_s1 + $0x14] ss:$8 sps:$4 sm:$0xff]   ;;  %v5060_v14 = vld [vmem:[%s6614_s1 + $0x10] ss:$8 sps:$4 sm:$0xff]  }
  0x16   :  { %v5061_v15 = vld [vmem:[%s6614_s1 + $0x4] ss:$8 sps:$4 sm:$0xff]   ;;  %v5063_v16 = vld [vmem:[%s6614_s1] ss:$8 sps:$4 sm:$0xff]   ;;  %v5066_v19 = vld [vmem:[%s6613_s0 + $0x10] sm:$0xff]   ;;  %vm519_vm0 = vcmask 1040384  }
  0x17   :  { %v5065_v18 = vld [vmem:[%s6613_s0 + $0x8] sm:$0xff]   ;;  %v5067_v20 = vld [vmem:[%s6613_s0 + $0x18] sm:$0xff]   ;;  %v5068_v21 = vld [vmem:[%s6613_s0 + $0x20] sm:$0xff]   ;;  %vm520_vm1 = vsmask.f32 256  ;;  %vm1313_vm5 = vcmask 1042432  }
  0x18   :  { %219 = vmatpush1.bf16.msra.mxu0 %v5048_v6  ;;  %v5069_v22 = vld [vmem:[%s6613_s0 + $0x28] sm:$0xff]   ;;  %v5070_v23 = vld [vmem:[%s6613_s0 + $0x30] sm:$0xff]   ;;  %v5071_v24 = vld [vmem:[%s6613_s0 + $0x38] sm:$0xff]   ;;  %vm570_vm2 = vsmask.f32 7938  ;;  %vm1314_vm6 = vcmask 1046532  }
  0x19   :  { %220 = vmatprep.subr.bf16.mxu0 %v5049_v7  ;;  %v5072_v25 = vld [vmem:[#allocation4 + $0xf8] sm:$0xff]   ;;  %vm5434_vm3 = vmand %vm519_vm0, %vm520_vm1  ;;  %v567_v28 = vld [vmem:[#allocation2 + $0x90] sm:$0x1]  ;;  %vm990_vm8 = vsmask.f32 3328  ;;  %vm828_vm11 = vcmask 1043456  }
  0x1a   :  { %v5073_v26 = vld [vmem:[#allocation4 + $0xb8] sm:$0xff]   ;;  %v617_v29 = vld [vmem:[#allocation2 + $0x94] sm:$0x1]  ;;  %v568_v30 = vsel %vm5434_vm3, 0, %v567_v28  ;;  %vm5441_vm4 = vmand %vm519_vm0, %vm570_vm2  ;;  %vm991_vm9 = vsmask.f32 7440 }
  0x1b   :  { %v522_v32 = vld [vmem:[#allocation2 + $0x8] sm:$0x1]  ;;  %v525_v33 = vld [vmem:[#allocation2 + $0x10] sm:$0x1]  ;;  %569 = vst [vmem:[#allocation2 + $0x90] sm:$0x1] %v568_v30  ;;  %vm5461_vm7 = vmor %vm1313_vm5, %vm1314_vm6 }
  0x1c   :  { %221 = vmatpush1.bf16.msra.mxu0 %v5051_v8  ;;  %v618_v34 = vsel %vm5441_vm4, 0, %v617_v29  ;;  %v5074_v35 = vld [vmem:[#allocation4 + $0xf0] sm:$0xff]   ;;  %v523_v36 = vsel %vm5434_vm3, 0, %v522_v32  ;;  %v526_v37 = vsel %vm5434_vm3, 0, %v525_v33  ;;  %v572_v38 = vld [vmem:[#allocation2 + $0xc] sm:$0x1]  ;;  %vm5491_vm10 = vmor %vm990_vm8, %vm991_vm9 }
  0x1d   :  { %222 = vmatprep.subr.bf16.mxu0 %v5052_v9  ;;  %619 = vst [vmem:[#allocation2 + $0x94] sm:$0x1] %v618_v34  ;;  %v5076_v39 = vld [vmem:[#allocation4 + $0xb0] sm:$0xff]   ;;  %524 = vst [vmem:[#allocation2 + $0x8] sm:$0x1] %v523_v36  ;;  %v573_v40 = vsel %vm5441_vm4, 0, %v572_v38 }
  0x1e   :  { %527 = vst [vmem:[#allocation2 + $0x10] sm:$0x1] %v526_v37  ;;  %v528_v41 = vld [vmem:[#allocation2 + $0x18] sm:$0x1]  ;;  %v531_v42 = vld [vmem:[#allocation2 + $0x20] sm:$0x1]  ;;  %vm5715_vm12 = vmand %vm828_vm11, %vm570_vm2 }
  0x1f   :  { %v5075_v43 = vld [vmem:[#allocation4 + $0x78] sm:$0xff]   ;;  %574 = vst [vmem:[#allocation2 + $0xc] sm:$0x1] %v573_v40  ;;  %v529_v44 = vsel %vm5434_vm3, 0, %v528_v41  ;;  %v532_v45 = vsel %vm5434_vm3, 0, %v531_v42  ;;  %v5078_v50 = vld [vmem:[#allocation4 + $0xe8] sm:$0xff]  }
  0x20   :  { %223 = vmatpush1.bf16.msra.mxu0 %v5054_v10  ;;  %v575_v46 = vld [vmem:[#allocation2 + $0x14] sm:$0x1]  ;;  %v5077_v47 = vld [vmem:[#allocation4 + $0x38] sm:$0xff]   ;;  %530 = vst [vmem:[#allocation2 + $0x18] sm:$0x1] %v529_v44  ;;  %4681 = vmatprep.subr.bf16.mxu1 %v5075_v43  ;;  %v5080_v52 = vld [vmem:[#allocation4 + $0xa8] sm:$0xff]  }
  0x21   :  { %224 = vmatprep.subr.bf16.mxu0 %v5055_v11  ;;  %533 = vst [vmem:[#allocation2 + $0x20] sm:$0x1] %v532_v45  ;;  %v576_v48 = vsel %vm5441_vm4, 0, %v575_v46  ;;  %v578_v49 = vld [vmem:[#allocation2 + $0x1c] sm:$0x1]  ;;  %4682 = vmatpush3.bf16.msra.mxu1 %v5077_v47  ;;  %v5079_v53 = vld [vmem:[#allocation4 + $0x70] sm:$0xff]  }
  0x22   :  { %577 = vst [vmem:[#allocation2 + $0x14] sm:$0x1] %v576_v48  ;;  %v579_v51 = vsel %vm5441_vm4, 0, %v578_v49  ;;  %v5081_v54 = vld [vmem:[#allocation4 + $0x30] sm:$0xff]   ;;  %4683 = vmatprep.subr.bf16.mxu1 %v5079_v53  ;;  %v5082_v55 = vld [vmem:[#allocation4 + $0xe0] sm:$0xff]   ;;  %v5083_v56 = vld [vmem:[#allocation4 + $0x68] sm:$0xff]  }
  0x23   :  { %580 = vst [vmem:[#allocation2 + $0x1c] sm:$0x1] %v579_v51  ;;  %v5084_v57 = vld [vmem:[#allocation4 + $0xa0] sm:$0xff]   ;;  %v5085_v58 = vld [vmem:[#allocation4 + $0x28] sm:$0xff]   ;;  %v5086_v59 = vld [vmem:[#allocation4 + $0xd8] sm:$0xff]  }
  0x24   :  { %225 = vmatpush1.bf16.msra.mxu0 %v5057_v12  ;;  %v5087_v60 = vld [vmem:[#allocation4 + $0x60] sm:$0xff]   ;;  %v5088_v61 = vld [vmem:[#allocation4 + $0x98] sm:$0xff]   ;;  %v5090_v62 = vld [vmem:[#allocation4 + $0xd0] sm:$0xff]  }
  0x25   :  { %226 = vmatprep.subr.bf16.mxu0 %v5058_v13  ;;  %4684 = vmatpush3.bf16.msra.mxu1 %v5081_v54  ;;  %v5089_v63 = vld [vmem:[#allocation4 + $0x20] sm:$0xff]   ;;  %v5092_v1 = vld [vmem:[#allocation4 + $0x90] sm:$0xff]   ;;  %v5094_v2 = vld [vmem:[#allocation4 + $0xc8] sm:$0xff]  }
  0x26   :  { %4685 = vmatprep.subr.bf16.mxu1 %v5083_v56  ;;  %v1249_v3 = vld [vmem:[#allocation2] sm:$0xe]  ;;  %v1250_v4 = vld [vmem:[#allocation2 + $0x4] sm:$0x1]  ;;  %v5093_v5 = vld [vmem:[#allocation4 + $0x18] sm:$0xff]  }
  0x27   :  { %v4461_v7 = vrot.slane %v1249_v3, 9  ;;  %v1318_v8 = vrot.slane %v1250_v4, 5  ;;  %v5095_v9 = vld [vmem:[#allocation4 + $0x50] sm:$0xff]   ;;  %v5096_v10 = vld [vmem:[#allocation4 + $0x88] sm:$0xff]   ;;  %v5098_v13 = vld [vmem:[#allocation4 + $0xc0] sm:$0xff]  }
  0x28   :  { %227 = vmatpush1.bf16.msra.mxu0 %v5060_v14  ;;  %v534_v11 = vld [vmem:[#allocation2 + $0x28] sm:$0x1]  ;;  %v5097_v12 = vld [vmem:[#allocation4 + $0x10] sm:$0xff]   ;;  %v5100_v34 = vld [vmem:[#allocation4 + $0x80] sm:$0xff]  }
  0x29   :  { %228 = vmatprep.subr.bf16.mxu0 %v5061_v15  ;;  %4686 = vmatpush3.bf16.msra.mxu1 %v5085_v58  ;;  %v1319_v14 = vsel %vm5461_vm7, %v4461_v7, %v1318_v8  ;;  %v535_v15 = vsel %vm5434_vm3, 0, %v534_v11  ;;  %v587_v32 = vld [vmem:[#allocation2 + $0x34] sm:$0x1]  ;;  %v590_v36 = vld [vmem:[#allocation2 + $0x3c] sm:$0x1]  ;;  %v5101_v41 = vld [vmem:[#allocation4 + $0x8] sm:$0xff]  }
  0x2a   :  { %4687 = vmatprep.subr.bf16.mxu1 %v5087_v60  ;;  %1396 = vst [vmem:[#allocation3 + $0x8] sm:$0xf] %v1319_v14  ;;  %536 = vst [vmem:[#allocation2 + $0x28] sm:$0x1] %v535_v15  ;;  %v959_v42 = vld [vmem:[#allocation2 + $0x4] sm:$0x1] }
  0x2b   :  { %v1003_v44 = vshll.u32 %v959_v42, 16  ;;  %v926_v51 = vld [vmem:[#allocation2] sm:$0xf]  ;;  %v552_v7 = vld [vmem:[#allocation2 + $0x68] sm:$0x1] }
  0x2c   :  { %229 = vmatpush1.bf16.msra.mxu0 %v5063_v16  ;;  %v537_v16 = vld [vmem:[#allocation2 + $0x30] sm:$0x1]  ;;  %942 = vst [vmem:[#allocation3] sm:$0xf] %v926_v51  ;;  %v5108_v54 = vld [vmem:[#allocation4] sm:$0xff]  }
  0x2d   :  { %4745 = vmatprep.subr.bf16.mxu0 %v5072_v25  ;;  %4688 = vmatpush3.bf16.msra.mxu1 %v5089_v63  ;;  %v543_v25 = vld [vmem:[#allocation2 + $0x40] sm:$0x1]  ;;  %v1005_v49 = vrot.slane %v1003_v44, 5  ;;  %v546_v63 = vld [vmem:[#allocation2 + $0x58] sm:$0x1] }
  0x2e   :  { %v544_v30 = vsel %vm5434_vm3, 0, %v543_v25  ;;  %v547_v3 = vsel %vm5434_vm3, 0, %v546_v63  ;;  %v555_v8 = vld [vmem:[#allocation2 + $0x70] sm:$0x1] }
  0x2f   :  { %247 = vmatmul.mubr.bf16.vlgmr.msra.gmra.mxu0 %v5064_v17  ;;  %v581_v17 = vld [vmem:[#allocation2 + $0x24] sm:$0x1]  ;;  %545 = vst [vmem:[#allocation2 + $0x40] sm:$0x1] %v544_v30  ;;  %548 = vst [vmem:[#allocation2 + $0x58] sm:$0x1] %v547_v3 }
  0x30   :  { %256 = vmatprep.mubr.bf16.mxu0 %v5295_v0  ;;  %4746 = vmatpush3.bf16.msra.mxu0 %v5073_v26  ;;  %v5099_v26 = vld [vmem:[#allocation4 + $0x48] sm:$0xff]   ;;  %v556_v11 = vsel %vm5434_vm3, 0, %v555_v8 }
  0x31   :  { %4747 = vmatprep.subr.bf16.mxu0 %v5074_v35  ;;  %v588_v35 = vsel %vm5441_vm4, 0, %v587_v32  ;;  %557 = vst [vmem:[#allocation2 + $0x70] sm:$0x1] %v556_v11  ;;  %v605_v32 = vld [vmem:[#allocation2 + $0x74] sm:$0x1] }
  0x32   :  { %589 = vst [vmem:[#allocation2 + $0x34] sm:$0x1] %v588_v35  ;;  %v564_v11 = vld [vmem:[#allocation2 + $0x88] sm:$0x1] }
  0x34   :  { %4748 = vmatpush3.bf16.msra.mxu0 %v5076_v39  ;;  %v591_v39 = vsel %vm5441_vm4, 0, %v590_v36  ;;  %v606_v36 = vsel %vm5441_vm4, 0, %v605_v32 }
  0x35   :  { %4749 = vmatprep.subr.bf16.mxu0 %v5078_v50  ;;  %592 = vst [vmem:[#allocation2 + $0x3c] sm:$0x1] %v591_v39  ;;  %v5105_v50 = vld [vmem:[#allocation4 + $0x40] sm:$0xff]   ;;  %607 = vst [vmem:[#allocation2 + $0x74] sm:$0x1] %v606_v36 }
  0x37   :  { %257 = vmatmul.mubr.bf16.gmra.mxu0 %v5065_v18  ;;  %v538_v18 = vsel %vm5434_vm3, 0, %v537_v16 }
  0x38   :  { %266 = vmatprep.mubr.bf16.mxu0 %v5295_v0  ;;  %4750 = vmatpush3.bf16.msra.mxu0 %v5080_v52  ;;  %539 = vst [vmem:[#allocation2 + $0x30] sm:$0x1] %v538_v18 }
  0x39   :  { %4751 = vmatprep.subr.bf16.mxu0 %v5082_v55 }
  0x3c   :  { %4752 = vmatpush3.bf16.msra.mxu0 %v5084_v57 }
  0x3d   :  { %4753 = vmatprep.subr.bf16.mxu0 %v5086_v59  ;;  %v5112_v59 = vld [vmem:[#allocation4 + $0x178] sm:$0xff]  }
  0x3f   :  { %267 = vmatmul.mubr.bf16.gmra.mxu0 %v5066_v19  ;;  %v582_v19 = vsel %vm5441_vm4, 0, %v581_v17 }
  0x40   :  { %276 = vmatprep.mubr.bf16.mxu0 %v5295_v0  ;;  %4754 = vmatpush3.bf16.msra.mxu0 %v5088_v61  ;;  %583 = vst [vmem:[#allocation2 + $0x24] sm:$0x1] %v582_v19 }
  0x41   :  { %4755 = vmatprep.subr.bf16.mxu0 %v5090_v62 }
  0x44   :  { %4756 = vmatpush3.bf16.msra.mxu0 %v5092_v1  ;;  %v596_v1 = vld [vmem:[#allocation2 + $0x5c] sm:$0x1] }
  0x45   :  { %4757 = vmatprep.subr.bf16.mxu0 %v5094_v2 }
  0x47   :  { %277 = vmatmul.mubr.bf16.gmra.mxu0 %v5067_v20  ;;  %v584_v20 = vld [vmem:[#allocation2 + $0x2c] sm:$0x1] }
  0x48   :  { %286 = vmatprep.mubr.bf16.mxu0 %v5295_v0  ;;  %4758 = vmatpush3.bf16.msra.mxu0 %v5096_v10  ;;  %v553_v10 = vsel %vm5434_vm3, 0, %v552_v7 }
  0x49   :  { %4759 = vmatprep.subr.bf16.mxu0 %v5098_v13  ;;  %v602_v13 = vld [vmem:[#allocation2 + $0x6c] sm:$0x1]  ;;  %554 = vst [vmem:[#allocation2 + $0x68] sm:$0x1] %v553_v10 }
  0x4a   :  { %v603_v15 = vsel %vm5441_vm4, 0, %v602_v13 }
  0x4b   :  { %604 = vst [vmem:[#allocation2 + $0x6c] sm:$0x1] %v603_v15  ;;  %v565_v15 = vsel %vm5434_vm3, 0, %v564_v11 }
  0x4c   :  { %4760 = vmatpush3.bf16.msra.mxu0 %v5100_v34  ;;  %v608_v34 = vld [vmem:[#allocation2 + $0x7c] sm:$0x1]  ;;  %566 = vst [vmem:[#allocation2 + $0x88] sm:$0x1] %v565_v15 }
  0x4f   :  { %287 = vmatmul.mubr.bf16.gmra.mxu0 %v5068_v21  ;;  %v540_v21 = vld [vmem:[#allocation2 + $0x38] sm:$0x1] }
  0x50   :  { %296 = vmatprep.mubr.bf16.mxu0 %v5295_v0 }
  0x57   :  { %297 = vmatmul.mubr.bf16.gmra.mxu0 %v5069_v22  ;;  %v958_v22 = vld [vmem:[#allocation2] sm:$0xf] }
  0x58   :  { %306 = vmatprep.mubr.bf16.mxu0 %v5295_v0  ;;  %v994_v28 = vshrl.u32 %v958_v22, 16  ;;  %v997_v29 = vshll.u32 %v958_v22, 16 }
  0x5a   :  { %v996_v37 = vrot.slane %v994_v28, 4  ;;  %v999_v38 = vrot.slane %v997_v29, 5 }
  0x5c   :  { %v1000_v43 = vor.u32 %v999_v38, %v996_v37  ;;  %v609_v37 = vsel %vm5441_vm4, 0, %v608_v34 }
  0x5d   :  { %610 = vst [vmem:[#allocation2 + $0x7c] sm:$0x1] %v609_v37 }
  0x5e   :  { %v1001_v48 = vrot.slane %v1000_v43, 4 }
  0x5f   :  { %307 = vmatmul.mubr.bf16.gmra.mxu0 %v5070_v23  ;;  %v585_v23 = vsel %vm5441_vm4, 0, %v584_v20 }
  0x60   :  { %316 = vmatprep.mubr.bf16.mxu0 %v5295_v0  ;;  %v5091_v0 = vld [vmem:[#allocation4 + $0x58] sm:$0xff]   ;;  %586 = vst [vmem:[#allocation2 + $0x2c] sm:$0x1] %v585_v23  ;;  %v1006_v53 = vsel %vm5491_vm10, %v1001_v48, %v1005_v49  ;;  %v1265_v48 = vld [vmem:[#allocation2 + $0x50] sm:$0xe] }
  0x61   :  { %4689 = vmatprep.subr.bf16.mxu1 %v5091_v0  ;;  %1233 = vst [vmem:[#allocation3 + $0x4] sm:$0xf] %v1006_v53  ;;  %v549_v0 = vld [vmem:[#allocation2 + $0x60] sm:$0x1]  ;;  %v558_v23 = vld [vmem:[#allocation2 + $0x78] sm:$0x1] }
  0x62   :  { %4690 = vmatpush3.bf16.msra.mxu1 %v5093_v5  ;;  %v550_v4 = vsel %vm5434_vm3, 0, %v549_v0  ;;  %v597_v5 = vsel %vm5441_vm4, 0, %v596_v1  ;;  %v559_v29 = vsel %vm5434_vm3, 0, %v558_v23  ;;  %v1266_v49 = vld [vmem:[#allocation2 + $0x54] sm:$0x1]  ;;  %v4469_v53 = vrot.slane %v1265_v48, 9 }
  0x63   :  { %4691 = vmatprep.subr.bf16.mxu1 %v5095_v9  ;;  %551 = vst [vmem:[#allocation2 + $0x60] sm:$0x1] %v550_v4  ;;  %598 = vst [vmem:[#allocation2 + $0x5c] sm:$0x1] %v597_v5  ;;  %v974_v5 = vld [vmem:[#allocation2 + $0x50] sm:$0xf] }
  0x64   :  { %560 = vst [vmem:[#allocation2 + $0x78] sm:$0x1] %v559_v29  ;;  %v1106_v13 = vshrl.u32 %v974_v5, 16 }
  0x66   :  { %4692 = vmatpush3.bf16.msra.mxu1 %v5097_v12  ;;  %v599_v12 = vld [vmem:[#allocation2 + $0x64] sm:$0x1]  ;;  %v1108_v29 = vrot.slane %v1106_v13, 4 }
  0x67   :  { %317 = vmatmul.mubr.bf16.gmra.mxu0 %v5071_v24  ;;  %v541_v24 = vsel %vm5434_vm3, 0, %v540_v21  ;;  %4693 = vmatprep.subr.bf16.mxu1 %v5099_v26  ;;  %v600_v14 = vsel %vm5441_vm4, 0, %v599_v12 }
  0x68   :  { %542 = vst [vmem:[#allocation2 + $0x38] sm:$0x1] %v541_v24  ;;  %601 = vst [vmem:[#allocation2 + $0x64] sm:$0x1] %v600_v14  ;;  %v561_v24 = vld [vmem:[#allocation2 + $0x80] sm:$0x1] }
  0x69   :  { %v562_v30 = vsel %vm5434_vm3, 0, %v561_v24  ;;  %v1109_v14 = vshll.u32 %v974_v5, 16  ;;  %v614_v24 = vld [vmem:[#allocation2 + $0x8c] sm:$0x1] }
  0x6a   :  { %4694 = vmatpush3.bf16.msra.mxu1 %v5101_v41  ;;  %563 = vst [vmem:[#allocation2 + $0x80] sm:$0x1] %v562_v30  ;;  %v615_v32 = vsel %vm5441_vm4, 0, %v614_v24 }
  0x6b   :  { %4695 = vmatprep.subr.bf16.mxu1 %v5105_v50  ;;  %v1111_v30 = vrot.slane %v1109_v14, 5  ;;  %616 = vst [vmem:[#allocation2 + $0x8c] sm:$0x1] %v615_v32 }
  0x6e   :  { %4696 = vmatpush3.bf16.msra.mxu1 %v5108_v54  ;;  %v1350_v54 = vrot.slane %v1266_v49, 5 }
  0x6f   :  { %4809 = vmatprep.subr.bf16.mxu1 %v5112_v59 }
  0x70   :  { %v1351_v3 = vsel %vm5461_vm7, %v4469_v53, %v1350_v54 }
  0x71   :  { %1404 = vst [vmem:[#allocation3 + $0x128] sm:$0xf] %v1351_v3 }
  0xef   :  { %v5479_v33 = vpop.f32.mrf.mxu0 }
  0xf0   :  { %v373_v19 = vmul.f32 %v5479_v33, %v5479_v33 }
  0xf1   :  { %v5485_v40 = vpop.f32.mrf.mxu0 }
  0xf2   :  { %6631 = vst [vmem:[#allocation10_spill] sm:$0xff] %v5485_v40 }
  0xf3   :  { %v5487_v45 = vpop.f32.mrf.mxu0 }
  0xf4   :  { %v374_v17 = vmul.f32 %v5487_v45, %v5487_v45  ;;  %v352_v22 = vadd.f32 %v5487_v45, %v5479_v33 }
  0xf5   :  { %v5489_v46 = vpop.f32.mrf.mxu0 }
  0xf6   :  { %6632 = vst [vmem:[#allocation11_spill] sm:$0xff] %v5489_v46  ;;  %v389_v25 = vadd.f32 %v374_v17, %v373_v19  ;;  %v611_v17 = vld [vmem:[#allocation2 + $0x84] sm:$0x1] }
  0xf7   :  { %v5495_v52 = vpop.f32.mrf.mxu0  ;;  %v612_v23 = vsel %vm5441_vm4, 0, %v611_v17 }
  0xf8   :  { %v375_v20 = vmul.f32 %v5495_v52, %v5495_v52  ;;  %v353_v35 = vadd.f32 %v352_v22, %v5495_v52  ;;  %613 = vst [vmem:[#allocation2 + $0x84] sm:$0x1] %v612_v23 }
  0xf9   :  { %v5499_v55 = vpop.f32.mrf.mxu0 }
  0xfa   :  { %6635 = vst [vmem:[#allocation12_spill] sm:$0xff] %v5499_v55  ;;  %v390_v38 = vadd.f32 %v389_v25, %v375_v20 }
  0xfb   :  { %v5501_v56 = vpop.f32.mrf.mxu0 }
  0xfc   :  { %v376_v26 = vmul.f32 %v5501_v56, %v5501_v56  ;;  %v354_v41 = vadd.f32 %v353_v35, %v5501_v56 }
  0xfd   :  { %v5503_v57 = vpop.f32.mrf.mxu0 }
  0xfe   :  { %6636 = vst [vmem:[#allocation13_spill] sm:$0xff] %v5503_v57  ;;  %v391_v43 = vadd.f32 %v390_v38, %v376_v26  ;;  %v975_v26 = vld [vmem:[#allocation2 + $0x54] sm:$0x1]  ;;  %v1112_v38 = vor.u32 %v1111_v30, %v1108_v29 }
  0xff   :  { %v5505_v58 = vpop.f32.mrf.mxu0 }
 0x100   :  { %v377_v42 = vmul.f32 %v5505_v58, %v5505_v58  ;;  %v355_v50 = vadd.f32 %v354_v41, %v5505_v58  ;;  %v1115_v41 = vshll.u32 %v975_v26, 16 }
 0x101   :  { %v5507_v60 = vpop.f32.mrf.mxu0 }
 0x102   :  { %6637 = vst [vmem:[#allocation14_spill] sm:$0xff] %v5507_v60  ;;  %v392_v63 = vadd.f32 %v391_v43, %v377_v42 }
 0x103   :  { %v5509_v61 = vpop.f32.mrf.mxu0 }
 0x104   :  { %v378_v51 = vmul.f32 %v5509_v61, %v5509_v61  ;;  %v356_v0 = vadd.f32 %v355_v50, %v5509_v61  ;;  %v1113_v50 = vrot.slane %v1112_v38, 4 }
 0x105   :  { %v5511_v62 = vpop.f32.mrf.mxu0 }
 0x106   :  { %6638 = vst [vmem:[#allocation15_spill] sm:$0xff] %v5511_v62  ;;  %v393_v7 = vadd.f32 %v392_v63, %v378_v51  ;;  %v1117_v51 = vrot.slane %v1115_v41, 5 }
 0x107   :  { %v5513_v2 = vpop.f32.mrf.mxu0 }
 0x108   :  { %v379_v1 = vmul.f32 %v5513_v2, %v5513_v2  ;;  %v357_v8 = vadd.f32 %v356_v0, %v5513_v2  ;;  %v934_v0 = vld [vmem:[#allocation2 + $0x50] sm:$0xf]  ;;  %v1118_v3 = vsel %vm5491_vm10, %v1113_v50, %v1117_v51 }
 0x109   :  { %v5521_v9 = vpop.f32.mrf.mxu0  ;;  %950 = vst [vmem:[#allocation3 + $0x120] sm:$0xf] %v934_v0  ;;  %1241 = vst [vmem:[#allocation3 + $0x124] sm:$0xf] %v1118_v3 }
 0x10a   :  { %6639 = vst [vmem:[#allocation16_spill] sm:$0xff] %v5521_v9  ;;  %v394_v19 = vadd.f32 %v393_v7, %v379_v1 }
 0x10b   :  { %v5531_v16 = vpop.f32.mrf.mxu0 }
 0x10c   :  { %v380_v10 = vmul.f32 %v5531_v16, %v5531_v16  ;;  %v358_v20 = vadd.f32 %v357_v8, %v5531_v16 }
 0x10d   :  { %v5535_v18 = vpop.f32.mrf.mxu0 }
 0x10e   :  { %6640 = vst [vmem:[#allocation17_spill] sm:$0xff] %v5535_v18  ;;  %v395_v34 = vadd.f32 %v394_v19, %v380_v10 }
 0x10f   :  { %v5541_v21 = vpop.f32.mrf.mxu0 }
 0x110   :  { %v381_v22 = vmul.f32 %v5541_v21, %v5541_v21  ;;  %v359_v35 = vadd.f32 %v358_v20, %v5541_v21 }
 0x111   :  { %v5547_v28 = vpop.f32.mrf.mxu0 }
 0x112   :  { %6641 = vst [vmem:[#allocation18_spill] sm:$0xff] %v5547_v28  ;;  %v396_v42 = vadd.f32 %v395_v34, %v381_v22  ;;  %v5137_v34 = vld [vmem:[#allocation4 + $0x1f8] sm:$0xff]  }
 0x113   :  { %v5558_v39 = vpop.f32.mrf.mxu0  ;;  %4873 = vmatprep.subr.bf16.mxu0 %v5137_v34 }
 0x114   :  { %v382_v36 = vmul.f32 %v5558_v39, %v5558_v39  ;;  %v360_v43 = vadd.f32 %v359_v35, %v5558_v39 }
 0x115   :  { %v5563_v44 = vpop.f32.mrf.mxu0 }
 0x116   :  { %6642 = vst [vmem:[#allocation19_spill] sm:$0xff] %v5563_v44  ;;  %v397_v53 = vadd.f32 %v396_v42, %v382_v36 }
 0x117   :  { %v5568_v59 = vpop.f32.mrf.mxu0 }
 0x118   :  { %v383_v48 = vmul.f32 %v5568_v59, %v5568_v59  ;;  %v361_v54 = vadd.f32 %v360_v43, %v5568_v59 }
 0x119   :  { %v5575_v4 = vpop.f32.mrf.mxu0 }
 0x11a   :  { %6643 = vst [vmem:[#allocation20_spill] sm:$0xff] %v5575_v4  ;;  %v398_v5 = vadd.f32 %v397_v53, %v383_v48 }
 0x11b   :  { %v5580_v12 = vpop.f32.mrf.mxu0 }
 0x11c   :  { %v384_v63 = vmul.f32 %v5580_v12, %v5580_v12  ;;  %v362_v7 = vadd.f32 %v361_v54, %v5580_v12 }
 0x11d   :  { %v5589_v25 = vpop.f32.mrf.mxu0 }
 0x11e   :  { %6644 = vst [vmem:[#allocation21_spill] sm:$0xff] %v5589_v25  ;;  %v399_v11 = vadd.f32 %v398_v5, %v384_v63 }
 0x11f   :  { %v5596_v37 = vpop.f32.mrf.mxu0 }
 0x120   :  { %v385_v8 = vmul.f32 %v5596_v37, %v5596_v37  ;;  %v363_v13 = vadd.f32 %v362_v7, %v5596_v37 }
 0x121   :  { %v5601_v49 = vpop.f32.mrf.mxu0 }
 0x122   :  { %6645 = vst [vmem:[#allocation22_spill] sm:$0xff] %v5601_v49  ;;  %v400_v17 = vadd.f32 %v399_v11, %v385_v8  ;;  %v5241_v49 = vld [vmem:[%s6621_s8] sm:$0xff]  }
 0x123   :  { %v5606_v1 = vpop.f32.mrf.mxu0 }
 0x124   :  { %v386_v14 = vmul.f32 %v5606_v1, %v5606_v1  ;;  %v364_v19 = vadd.f32 %v363_v13, %v5606_v1 }
 0x125   :  { %v5613_v10 = vpop.f32.mrf.mxu0 }
 0x126   :  { %6646 = vst [vmem:[#allocation23_spill] sm:$0xff] %v5613_v10  ;;  %v401_v23 = vadd.f32 %v400_v17, %v386_v14 }
 0x127   :  { %v318_v15 = vpop.f32.mrf.mxu0 }
 0x128   :  { %v387_v20 = vmul.f32 %v318_v15, %v318_v15  ;;  %v365_v24 = vadd.f32 %v364_v19, %v318_v15 }
 0x129   :  { %v5619_v22 = vpop.f32.mrf.mxu0 }
 0x12a   :  { %6647 = vst [vmem:[#allocation24_spill] sm:$0xff] %v5619_v22  ;;  %v402_v29 = vadd.f32 %v401_v23, %v387_v20  ;;  %v845_v23 = vld [vmem:[#allocation2 + $0x1c] sm:$0x1]  ;;  %v1900_v22 = vld [vmem:[#allocation2 + $0x48] sm:$0xf] }
 0x12b   :  { %v322_v26 = vpop.f32.mrf.mxu0  ;;  %1916 = vst [vmem:[#allocation3 + $0x114] sm:$0xf] %v1900_v22 }
 0x12c   :  { %v366_v30 = vadd.f32 %v365_v24, %v322_v26  ;;  %v388_v32 = vmul.f32 %v322_v26, %v322_v26  ;;  %v5638_v24 = vld [vmem:[%s6616_s3] ss:$0 sm:$0xff] }
 0x12e   :  { %v367_v35 = vrot.slane %v366_v30, 4  ;;  %v403_v36 = vadd.f32 %v402_v29, %v388_v32  ;;  %v593_v32 = vld [vmem:[#allocation2 + $0x44] sm:$0x1] }
 0x130   :  { %v368_v38 = vadd.f32 %v367_v35, %v366_v30  ;;  %v404_v41 = vrot.slane %v403_v36, 4 }
 0x132   :  { %v369_v42 = vrot.slane %v368_v38, 2  ;;  %v405_v43 = vadd.f32 %v404_v41, %v403_v36 }
 0x134   :  { %v370_v48 = vadd.f32 %v369_v42, %v368_v38  ;;  %v406_v50 = vrot.slane %v405_v43, 2 }
 0x136   :  { %v371_v51 = vrot.slane %v370_v48, 1  ;;  %v407_v53 = vadd.f32 %v406_v50, %v405_v43 }
 0x138   :  { %v372_v54 = vadd.f32 %v371_v51, %v370_v48  ;;  %v408_v63 = vrot.slane %v407_v53, 1 }
 0x13a   :  { %v409_v0 = vadd.f32 %v408_v63, %v407_v53  ;;  %v5621_v3 = vmul.f32 0.0078125, %v372_v54 }
 0x13c   :  { %v411_v5 = vmul.f32 0.0078125, %v409_v0  ;;  %v412_v7 = vmul.f32 %v5621_v3, %v5621_v3  ;;  %v425_v17 = vsub.f32 %v5568_v59, %v5621_v3  ;;  %v426_v19 = vsub.f32 %v5580_v12, %v5621_v3 }
 0x13d   :  { %v429_v30 = vsub.f32 %v318_v15, %v5621_v3  ;;  %v594_v12 = vsel %vm5441_vm4, 0, %v593_v32  ;;  %v430_v34 = vsub.f32 %v322_v26, %v5621_v3  ;;  %v415_v35 = vsub.f32 %v5479_v33, %v5621_v3 }
 0x13e   :  { %v413_v8 = vsub.f32 %v411_v5, %v412_v7  ;;  %595 = vst [vmem:[#allocation2 + $0x44] sm:$0x1] %v594_v12  ;;  %v416_v36 = vsub.f32 %v5487_v45, %v5621_v3  ;;  %v417_v38 = vsub.f32 %v5495_v52, %v5621_v3  ;;  %v418_v15 = vsub.f32 %v5501_v56, %v5621_v3 }
 0x13f   :  { %v5644_v59 = vmul.f32 %v5638_v24, %v429_v30  ;;  %v419_v41 = vsub.f32 %v5505_v58, %v5621_v3  ;;  %v420_v31 = vsub.f32 %v5509_v61, %v5621_v3  ;;  %v421_v26 = vsub.f32 %v5513_v2, %v5621_v3  ;;  %v5676_v61 = vld [vmem:[%s6617_s4] ss:$0 sm:$0xff] }
 0x140   :  { %v414_v11 = vmax.f32 %v413_v8, 0.0  ;;  %v422_v33 = vsub.f32 %v5531_v16, %v5621_v3  ;;  %v452_v45 = vmul.f32 %v5638_v24, %v430_v34  ;;  %v437_v42 = vmul.f32 %v5638_v24, %v415_v35 }
 0x141   :  { %v438_v52 = vmul.f32 %v5638_v24, %v416_v36  ;;  %v439_v56 = vmul.f32 %v5638_v24, %v417_v38  ;;  %v440_v43 = vmul.f32 %v5638_v24, %v418_v15  ;;  %v441_v58 = vmul.f32 %v5638_v24, %v419_v41 }
 0x142   :  { %v453_v20 = vadd.f32 1e-05, %v414_v11  ;;  %v442_v2 = vmul.f32 %v5638_v24, %v420_v31  ;;  %v443_v16 = vmul.f32 %v5638_v24, %v421_v26  ;;  %v444_v50 = vmul.f32 %v5638_v24, %v422_v33 }
 0x143   :  { %v5682_v51 = vmul.f32 %v5638_v24, %v425_v17 }
 0x144   :  { %5242 = vrsqrt.f32 %v453_v20 }
 0x151   :  { %v5671_v48 = vpop.eup %5242 }
 0x152   :  { %v470_v53 = vmul.f32 %v5671_v48, %v452_v45  ;;  %v455_v54 = vmul.f32 %v5671_v48, %v437_v42  ;;  %v456_v63 = vmul.f32 %v5671_v48, %v438_v52  ;;  %v457_v0 = vmul.f32 %v5671_v48, %v439_v56 }
 0x153   :  { %v458_v5 = vmul.f32 %v5671_v48, %v440_v43  ;;  %v459_v7 = vmul.f32 %v5671_v48, %v441_v58  ;;  %v460_v8 = vmul.f32 %v5671_v48, %v442_v2  ;;  %v461_v11 = vmul.f32 %v5671_v48, %v443_v16 }
 0x154   :  { %v492_v17 = vadd.f32 %v5676_v61, %v470_v53  ;;  %v477_v20 = vadd.f32 %v5676_v61, %v455_v54  ;;  %v478_v30 = vadd.f32 %v5676_v61, %v456_v63  ;;  %v479_v32 = vadd.f32 %v5676_v61, %v457_v0 }
 0x155   :  { %v480_v12 = vadd.f32 %v5676_v61, %v458_v5  ;;  %v481_v34 = vadd.f32 %v5676_v61, %v459_v7  ;;  %v482_v35 = vadd.f32 %v5676_v61, %v460_v8  ;;  %v462_v36 = vmul.f32 %v5671_v48, %v444_v50  ;;  %v923_v7 = vld [vmem:[#allocation2 + $0x94] sm:$0x1] }
 0x156   :  { %v508_v38 = vmax.f32 %v492_v17, 0.0  ;;  %v493_v15 = vmax.f32 %v477_v20, 0.0  ;;  %v494_v41 = vmax.f32 %v478_v30, 0.0  ;;  %v495_v31 = vmax.f32 %v479_v32, 0.0  ;;  %v830_v30 = vld [vmem:[#allocation2 + $0x8] sm:$0xf] }
 0x157   :  { %v496_v26 = vmax.f32 %v480_v12, 0.0  ;;  %v497_v33 = vmax.f32 %v481_v34, 0.0  ;;  %v498_v45 = vmax.f32 %v482_v35, 0.0  ;;  %v5701_v42 = vmul.f32 %v5638_v24, %v426_v19  ;;  %v920_v19 = vld [vmem:[#allocation2 + $0x90] sm:$0xf] }
 0x158   :  { %v4680_v52 = vpack.c.bf16 %v508_v38, %v508_v38  ;;  %v4665_v56 = vpack.c.bf16 %v493_v15, %v493_v15  ;;  %v4666_v43 = vpack.c.bf16 %v494_v41, %v494_v41  ;;  %v4667_v58 = vpack.c.bf16 %v495_v31, %v495_v31  ;;  %v833_v35 = vld [vmem:[#allocation2 + $0xc] sm:$0x1]  ;;  %v836_v41 = vld [vmem:[#allocation2 + $0x10] sm:$0xf] }
 0x159   :  { %v4668_v2 = vpack.c.bf16 %v496_v26, %v496_v26  ;;  %v5703_v16 = vpack.c.bf16 %v497_v33, %v497_v33  ;;  %v5705_v53 = vpack.c.bf16 %v498_v45, %v498_v45  ;;  %v5708_v50 = vadd.f32 %v5676_v61, %v461_v11 }
 0x15a   :  { %v789_v54 = vshrl.u32 %v4680_v52, 16  ;;  %v792_v63 = vshll.u32 %v4680_v52, 16  ;;  %v669_v0 = vshrl.u32 %v4665_v56, 16  ;;  %v5711_v5 = vadd.f32 %v5676_v61, %v462_v36 }
 0x15b   :  { %v672_v8 = vshll.u32 %v4665_v56, 16  ;;  %v677_v17 = vshrl.u32 %v4666_v43, 16  ;;  %v680_v20 = vshll.u32 %v4666_v43, 16  ;;  %v685_v32 = vshrl.u32 %v4667_v58, 16 }
 0x15c   :  { %v791_v12 = vrot.slane %v789_v54, 7  ;;  %v671_v34 = vrot.slane %v669_v0, 7  ;;  %v688_v38 = vshll.u32 %v4667_v58, 16  ;;  %v693_v15 = vshrl.u32 %v4668_v2, 16  ;;  %v839_v54 = vld [vmem:[#allocation2 + $0x14] sm:$0x1] }
 0x15d   :  { %v679_v36 = vrot.slane %v677_v17, 7  ;;  %v687_v31 = vrot.slane %v685_v32, 7  ;;  %v696_v26 = vshll.u32 %v4668_v2, 16  ;;  %v701_v33 = vshrl.u32 %v5703_v16, 16  ;;  %v842_v0 = vld [vmem:[#allocation2 + $0x18] sm:$0xf] }
 0x15e   :  { %v794_v45 = vor.u32 %v792_v63, %v791_v12  ;;  %v795_v52 = vrot.slane %v791_v12, 4  ;;  %v674_v56 = vor.u32 %v672_v8, %v671_v34  ;;  %v675_v43 = vrot.slane %v671_v34, 4  ;;  %v848_v12 = vld [vmem:[#allocation2 + $0x20] sm:$0xf] }
 0x15f   :  { %v682_v58 = vor.u32 %v680_v20, %v679_v36  ;;  %v683_v14 = vrot.slane %v679_v36, 4  ;;  %v690_v13 = vor.u32 %v688_v38, %v687_v31  ;;  %v691_v29 = vrot.slane %v687_v31, 4 }
 0x160   :  { %v921_v17 = vsel %vm5715_vm12, %v794_v45, %v920_v19  ;;  %v924_v2 = vsel %vm5434_vm3, %v795_v52, %v923_v7  ;;  %v831_v63 = vsel %vm5715_vm12, %v674_v56, %v830_v30  ;;  %v834_v8 = vsel %vm5434_vm3, %v675_v43, %v833_v35  ;;  %v854_v30 = vld [vmem:[#allocation2 + $0x28] sm:$0xf] }
 0x161   :  { %922 = vst [vmem:[#allocation2 + $0x90] sm:$0xf] %v921_v17  ;;  %925 = vst [vmem:[#allocation2 + $0x94] sm:$0x1] %v924_v2  ;;  %v837_v20 = vsel %vm5715_vm12, %v682_v58, %v836_v41  ;;  %v695_v32 = vrot.slane %v693_v15, 7  ;;  %v840_v19 = vsel %vm5434_vm3, %v683_v14, %v839_v54  ;;  %v843_v7 = vsel %vm5715_vm12, %v690_v13, %v842_v0 }
 0x162   :  { %832 = vst [vmem:[#allocation2 + $0x8] sm:$0xf] %v831_v63  ;;  %835 = vst [vmem:[#allocation2 + $0xc] sm:$0x1] %v834_v8  ;;  %v846_v22 = vsel %vm5434_vm3, %v691_v29, %v845_v23  ;;  %v703_v34 = vrot.slane %v701_v33, 7  ;;  %v704_v35 = vshll.u32 %v5703_v16, 16 }
 0x163   :  { %838 = vst [vmem:[#allocation2 + $0x10] sm:$0xf] %v837_v20  ;;  %841 = vst [vmem:[#allocation2 + $0x14] sm:$0x1] %v840_v19  ;;  %v709_v38 = vshrl.u32 %v5705_v53, 16  ;;  %v698_v36 = vor.u32 %v696_v26, %v695_v32  ;;  %v699_v41 = vrot.slane %v695_v32, 4 }
 0x164   :  { %844 = vst [vmem:[#allocation2 + $0x18] sm:$0xf] %v843_v7  ;;  %v851_v15 = vld [vmem:[#allocation2 + $0x24] sm:$0x1]  ;;  %847 = vst [vmem:[#allocation2 + $0x1c] sm:$0x1] %v846_v22  ;;  %v706_v45 = vor.u32 %v704_v35, %v703_v34  ;;  %v6651_v22 = vsub.f32 %v5606_v1, %v5621_v3 }
 0x165   :  { %v857_v14 = vld [vmem:[#allocation2 + $0x2c] sm:$0x1]  ;;  %v499_v13 = vmax.f32 %v5708_v50, 0.0  ;;  %v500_v31 = vmax.f32 %v5711_v5, 0.0  ;;  %v707_v52 = vrot.slane %v703_v34, 4  ;;  %v711_v56 = vrot.slane %v709_v38, 7 }
 0x166   :  { %v712_v43 = vshll.u32 %v5705_v53, 16  ;;  %v849_v23 = vsel %vm5715_vm12, %v698_v36, %v848_v12  ;;  %v852_v29 = vsel %vm5434_vm3, %v699_v41, %v851_v15  ;;  %v860_v16 = vld [vmem:[#allocation2 + $0x30] sm:$0xf]  ;;  %v863_v54 = vld [vmem:[#allocation2 + $0x34] sm:$0x1]  ;;  %v855_v0 = vsel %vm5715_vm12, %v706_v45, %v854_v30 }
 0x167   :  { %v5745_v26 = vpack.c.bf16 %v499_v13, %v499_v13  ;;  %v5747_v33 = vpack.c.bf16 %v500_v31, %v500_v31  ;;  %850 = vst [vmem:[#allocation2 + $0x20] sm:$0xf] %v849_v23  ;;  %v715_v5 = vrot.slane %v711_v56, 4  ;;  %853 = vst [vmem:[#allocation2 + $0x24] sm:$0x1] %v852_v29  ;;  %v858_v53 = vsel %vm5434_vm3, %v707_v52, %v857_v14 }
 0x168   :  { %v714_v50 = vor.u32 %v712_v43, %v711_v56  ;;  %856 = vst [vmem:[#allocation2 + $0x28] sm:$0xf] %v855_v0  ;;  %859 = vst [vmem:[#allocation2 + $0x2c] sm:$0x1] %v858_v53  ;;  %v6650_v12 = vsub.f32 %v5596_v37, %v5621_v3  ;;  %v450_v34 = vmul.f32 %v5638_v24, %v6651_v22  ;;  %v866_v29 = vld [vmem:[#allocation2 + $0x38] sm:$0xf] }
 0x169   :  { %v717_v58 = vshrl.u32 %v5745_v26, 16  ;;  %v720_v17 = vshll.u32 %v5745_v26, 16  ;;  %v725_v2 = vshrl.u32 %v5747_v33, 16  ;;  %v728_v63 = vshll.u32 %v5747_v33, 16  ;;  %v1251_v8 = vld [vmem:[#allocation2 + $0x8] sm:$0xe] }
 0x16a   :  { %v1252_v20 = vld [vmem:[#allocation2 + $0xc] sm:$0x1]  ;;  %v1412_v32 = vld [vmem:[#allocation2 + $0x8] sm:$0xf]  ;;  %v861_v19 = vsel %vm5715_vm12, %v714_v50, %v860_v16  ;;  %v864_v7 = vsel %vm5434_vm3, %v715_v5, %v863_v54  ;;  %v449_v30 = vmul.f32 %v5638_v24, %v6650_v12  ;;  %v4462_v35 = vrot.slane %v1251_v8, 9 }
 0x16b   :  { %v1322_v38 = vrot.slane %v1252_v20, 5  ;;  %v1413_v15 = vld [vmem:[#allocation2 + $0x10] sm:$0xf]  ;;  %1428 = vst [vmem:[#allocation3 + $0xc] sm:$0xf] %v1412_v32  ;;  %v5771_v41 = vmul.f32 %v5671_v48, %v5682_v51  ;;  %v5775_v37 = vmul.f32 %v5671_v48, %v5701_v42  ;;  %v5781_v45 = vmul.f32 %v5671_v48, %v450_v34 }
 0x16c   :  { %v1253_v36 = vld [vmem:[#allocation2 + $0x10] sm:$0xe]  ;;  %862 = vst [vmem:[#allocation2 + $0x30] sm:$0xf] %v861_v19  ;;  %865 = vst [vmem:[#allocation2 + $0x34] sm:$0x1] %v864_v7  ;;  %v5778_v31 = vmul.f32 %v5671_v48, %v449_v30  ;;  %v469_v52 = vmul.f32 %v5671_v48, %v5644_v59 }
 0x16d   :  { %1429 = vst [vmem:[#allocation3 + $0x30] sm:$0xf] %v1413_v15  ;;  %v1254_v14 = vld [vmem:[#allocation2 + $0x14] sm:$0x1]  ;;  %v1255_v1 = vld [vmem:[#allocation2 + $0x18] sm:$0xe]  ;;  %v1323_v51 = vsel %vm5461_vm7, %v4462_v35, %v1322_v38 }
 0x16e   :  { %v1256_v13 = vld [vmem:[#allocation2 + $0x1c] sm:$0x1]  ;;  %v4463_v56 = vrot.slane %v1253_v36, 9  ;;  %v1326_v43 = vrot.slane %v1254_v14, 5  ;;  %v4464_v42 = vrot.slane %v1255_v1, 9  ;;  %v719_v5 = vrot.slane %v717_v58, 7 }
 0x16f   :  { %v1414_v23 = vld [vmem:[#allocation2 + $0x18] sm:$0xf]  ;;  %v869_v16 = vld [vmem:[#allocation2 + $0x3c] sm:$0x1]  ;;  %1397 = vst [vmem:[#allocation3 + $0x2c] sm:$0xf] %v1323_v51  ;;  %v5792_v15 = vadd.f32 %v5676_v61, %v469_v52 }
 0x170   :  { %v1330_v26 = vrot.slane %v1256_v13, 5  ;;  %1430 = vst [vmem:[#allocation3 + $0x54] sm:$0xf] %v1414_v23  ;;  %v927_v54 = vld [vmem:[#allocation2 + $0x8] sm:$0xf]  ;;  %v1327_v0 = vsel %vm5461_vm7, %v4463_v56, %v1326_v43  ;;  %v722_v30 = vor.u32 %v720_v17, %v719_v5  ;;  %v723_v22 = vrot.slane %v719_v5, 4 }
 0x171   :  { %v960_v50 = vld [vmem:[#allocation2 + $0x8] sm:$0xf]  ;;  %v1415_v53 = vld [vmem:[#allocation2 + $0x20] sm:$0xf]  ;;  %943 = vst [vmem:[#allocation3 + $0x24] sm:$0xf] %v927_v54 }
 0x172   :  { %v961_v59 = vld [vmem:[#allocation2 + $0xc] sm:$0x1]  ;;  %v1008_v8 = vshrl.u32 %v960_v50, 16  ;;  %v1011_v20 = vshll.u32 %v960_v50, 16  ;;  %v1331_v32 = vsel %vm5461_vm7, %v4464_v42, %v1330_v26  ;;  %1398 = vst [vmem:[#allocation3 + $0x50] sm:$0xf] %v1327_v0  ;;  %v867_v13 = vsel %vm5715_vm12, %v722_v30, %v866_v29 }
 0x173   :  { %1431 = vst [vmem:[#allocation3 + $0x78] sm:$0xf] %v1415_v53  ;;  %v1017_v19 = vshll.u32 %v961_v59, 16  ;;  %v928_v7 = vld [vmem:[#allocation2 + $0x10] sm:$0xf]  ;;  %v870_v17 = vsel %vm5434_vm3, %v723_v22, %v869_v16  ;;  %v5140_v26 = vld [vmem:[#allocation4 + $0x1b8] sm:$0xff]  }
 0x174   :  { %v929_v12 = vld [vmem:[#allocation2 + $0x18] sm:$0xf]  ;;  %1399 = vst [vmem:[#allocation3 + $0x74] sm:$0xf] %v1331_v32  ;;  %v1010_v58 = vrot.slane %v1008_v8, 4  ;;  %v1013_v34 = vrot.slane %v1011_v20, 5 }
 0x175   :  { %944 = vst [vmem:[#allocation3 + $0x48] sm:$0xf] %v928_v7  ;;  %945 = vst [vmem:[#allocation3 + $0x6c] sm:$0xf] %v929_v12  ;;  %v962_v35 = vld [vmem:[#allocation2 + $0x10] sm:$0xf] }
 0x176   :  { %v963_v38 = vld [vmem:[#allocation2 + $0x14] sm:$0x1]  ;;  %v1019_v36 = vrot.slane %v1017_v19, 5  ;;  %v964_v14 = vld [vmem:[#allocation2 + $0x18] sm:$0xf]  ;;  %v1014_v51 = vor.u32 %v1013_v34, %v1010_v58  ;;  %v1022_v56 = vshrl.u32 %v962_v35, 16 }
 0x177   :  { %v965_v1 = vld [vmem:[#allocation2 + $0x1c] sm:$0x1]  ;;  %v1025_v43 = vshll.u32 %v962_v35, 16  ;;  %v1031_v42 = vshll.u32 %v963_v38, 16  ;;  %v1257_v23 = vld [vmem:[#allocation2 + $0x20] sm:$0xe] }
 0x178   :  { %868 = vst [vmem:[#allocation2 + $0x38] sm:$0xf] %v867_v13  ;;  %871 = vst [vmem:[#allocation2 + $0x3c] sm:$0x1] %v870_v17  ;;  %v1036_v54 = vshrl.u32 %v964_v14, 16  ;;  %v1039_v52 = vshll.u32 %v964_v14, 16 }
 0x179   :  { %v1045_v50 = vshll.u32 %v965_v1, 16  ;;  %v1258_v5 = vld [vmem:[#allocation2 + $0x24] sm:$0x1]  ;;  %v4465_v0 = vrot.slane %v1257_v23, 9  ;;  %v5141_v53 = vld [vmem:[#allocation4 + $0x1f0] sm:$0xff]   ;;  %v1015_v29 = vrot.slane %v1014_v51, 4 }
 0x17a   :  { %v5102_v59 = vld [vmem:[#allocation3 + $0x8] ss:$36 sps:$4 sm:$0xff]   ;;  %v1024_v20 = vrot.slane %v1022_v56, 4  ;;  %v1027_v32 = vrot.slane %v1025_v43, 5  ;;  %v1033_v16 = vrot.slane %v1031_v42, 5  ;;  %v1038_v19 = vrot.slane %v1036_v54, 4 }
 0x17b   :  { %v5104_v8 = vld [vmem:[#allocation3 + $0xc] ss:$36 sps:$4 sm:$0xff]   ;;  %v1259_v7 = vld [vmem:[#allocation2 + $0x28] sm:$0xe]  ;;  %v1020_v30 = vsel %vm5491_vm10, %v1015_v29, %v1019_v36  ;;  %v1041_v22 = vrot.slane %v1039_v52, 5  ;;  %v1047_v58 = vrot.slane %v1045_v50, 5 }
 0x17c   :  { %3526 = vmatprep.mubr.bf16.mxu0 %v5104_v8  ;;  %v5798_v12 = vld [vmem:[#allocation3 + $0x50] sm:$0xff]  ;;  %v1260_v34 = vld [vmem:[#allocation2 + $0x2c] sm:$0x1]  ;;  %v1334_v35 = vrot.slane %v1258_v5, 5  ;;  %1234 = vst [vmem:[#allocation3 + $0x28] sm:$0xf] %v1020_v30  ;;  %v1028_v13 = vor.u32 %v1027_v32, %v1024_v20  ;;  %v6652_v5 = vsub.f32 %v5541_v21, %v5621_v3 }
 0x17d   :  { %v5143_v38 = vld [vmem:[#allocation4 + $0x1b0] sm:$0xff]   ;;  %3527 = vmatmul.mubr.bf16.vlgmr.msra.gmra.mxu0 %v5102_v59  ;;  %v4466_v17 = vrot.slane %v1259_v7, 9  ;;  %v1338_v51 = vrot.slane %v1260_v34, 5  ;;  %v727_v56 = vrot.slane %v725_v2, 7  ;;  %v5148_v43 = vld [vmem:[#allocation4 + $0x1e8] sm:$0xff]   ;;  %v1042_v42 = vor.u32 %v1041_v22, %v1038_v19 }
 0x17e   :  { %v5802_v14 = vld [vmem:[#allocation3 + $0x74] sm:$0xff]  ;;  %v1335_v36 = vsel %vm5461_vm7, %v4465_v0, %v1334_v35  ;;  %v1416_v23 = vld [vmem:[#allocation2 + $0x28] sm:$0xf]  ;;  %v1417_v54 = vld [vmem:[#allocation2 + $0x30] sm:$0xf]  ;;  %v445_v59 = vmul.f32 %v5638_v24, %v6652_v5  ;;  %4874 = vmatpush3.bf16.msra.mxu0 %v5140_v26  ;;  %v1029_v8 = vrot.slane %v1028_v13, 4  ;;  %v6653_v34 = vsub.f32 %v5558_v39, %v5621_v3 }
 0x17f   :  { %v5106_v1 = vld [vmem:[#allocation3 + $0x54] ss:$36 sps:$4 sm:$0xff]   ;;  %v930_v52 = vld [vmem:[#allocation2 + $0x20] sm:$0xf]  ;;  %v1339_v2 = vsel %vm5461_vm7, %v4466_v17, %v1338_v51  ;;  %1400 = vst [vmem:[#allocation3 + $0x98] sm:$0xf] %v1335_v36  ;;  %v730_v20 = vor.u32 %v728_v63, %v727_v56  ;;  %4875 = vmatprep.subr.bf16.mxu0 %v5141_v53  ;;  %v4520_v26 = vcombine.low %v5798_v12, %v5802_v14 }
 0x180   :  { %v872_v50 = vld [vmem:[#allocation2 + $0x40] sm:$0xf]  ;;  %3534 = vmatprep.mubr.bf16.mxu0 %v5106_v1  ;;  %1432 = vst [vmem:[#allocation3 + $0x9c] sm:$0xf] %v1416_v23  ;;  %1433 = vst [vmem:[#allocation3 + $0xc0] sm:$0xf] %v1417_v54  ;;  %v446_v35 = vmul.f32 %v5638_v24, %v6653_v34  ;;  %v1034_v33 = vsel %vm5491_vm10, %v1029_v8, %v1033_v16 }
 0x181   :  { %v931_v29 = vld [vmem:[#allocation2 + $0x28] sm:$0xf]  ;;  %946 = vst [vmem:[#allocation3 + $0x90] sm:$0xf] %v930_v52  ;;  %v966_v0 = vld [vmem:[#allocation2 + $0x20] sm:$0xf]  ;;  %v873_v23 = vsel %vm5715_vm12, %v730_v20, %v872_v50 }
 0x182   :  { %v731_v32 = vrot.slane %v727_v56, 4  ;;  %v875_v21 = vld [vmem:[#allocation2 + $0x44] sm:$0x1]  ;;  %v1043_v19 = vrot.slane %v1042_v42, 4  ;;  %1401 = vst [vmem:[#allocation3 + $0xbc] sm:$0xf] %v1339_v2  ;;  %4876 = vmatpush3.bf16.msra.mxu0 %v5143_v38  ;;  %v463_v2 = vmul.f32 %v5671_v48, %v445_v59  ;;  %v464_v50 = vmul.f32 %v5671_v48, %v446_v35 }
 0x183   :  { %947 = vst [vmem:[#allocation3 + $0xb4] sm:$0xf] %v931_v29  ;;  %v967_v7 = vld [vmem:[#allocation2 + $0x24] sm:$0x1]  ;;  %v968_v30 = vld [vmem:[#allocation2 + $0x28] sm:$0xf]  ;;  %4877 = vmatprep.subr.bf16.mxu0 %v5148_v43 }
 0x184   :  { %v1050_v22 = vshrl.u32 %v966_v0, 16  ;;  %v969_v63 = vld [vmem:[#allocation2 + $0x2c] sm:$0x1]  ;;  %v1053_v53 = vshll.u32 %v966_v0, 16  ;;  %v1059_v1 = vshll.u32 %v967_v7, 16  ;;  %v1064_v13 = vshrl.u32 %v968_v30, 16 }
 0x185   :  { %v5113_v17 = vld [vmem:[#allocation4 + $0x138] sm:$0xff]   ;;  %v1048_v12 = vsel %vm5491_vm10, %v1043_v19, %v1047_v58  ;;  %1235 = vst [vmem:[#allocation3 + $0x4c] sm:$0xf] %v1034_v33  ;;  %v1067_v51 = vshll.u32 %v968_v30, 16  ;;  %v1073_v56 = vshll.u32 %v969_v63, 16  ;;  %v5151_v39 = vld [vmem:[#allocation4 + $0x1a8] sm:$0xff]   ;;  %v876_v38 = vsel %vm5434_vm3, %v731_v32, %v875_v21  ;;  %3535 = vmatmul.mubr.bf16.gmra.mxu0 %v4520_v26 }
 0x186   :  { %v1052_v14 = vrot.slane %v1050_v22, 4  ;;  %v1261_v42 = vld [vmem:[#allocation2 + $0x30] sm:$0xe]  ;;  %1236 = vst [vmem:[#allocation3 + $0x70] sm:$0xf] %v1048_v12  ;;  %v1055_v24 = vrot.slane %v1053_v53, 5  ;;  %4878 = vmatpush3.bf16.msra.mxu0 %v5151_v39 }
 0x187   :  { %v5118_v3 = vld [vmem:[#allocation4 + $0x170] sm:$0xff]   ;;  %v1061_v36 = vrot.slane %v1059_v1, 5  ;;  %v1066_v16 = vrot.slane %v1064_v13, 4  ;;  %v5152_v52 = vld [vmem:[#allocation4 + $0x1e0] sm:$0xff]   ;;  %v1069_v8 = vrot.slane %v1067_v51, 5  ;;  %v1075_v19 = vrot.slane %v1073_v56, 5 }
 0x188   :  { %v1262_v54 = vld [vmem:[#allocation2 + $0x34] sm:$0x1]  ;;  %v5109_v5 = vld [vmem:[#allocation3] ss:$36 sps:$4 sm:$0xff]   ;;  %874 = vst [vmem:[#allocation2 + $0x40] sm:$0xf] %v873_v23  ;;  %v1056_v0 = vor.u32 %v1055_v24, %v1052_v14  ;;  %4879 = vmatprep.subr.bf16.mxu0 %v5152_v52  ;;  %v487_v52 = vadd.f32 %v5676_v61, %v5771_v41 }
 0x189   :  { %v5111_v58 = vld [vmem:[#allocation3 + $0x4] ss:$36 sps:$4 sm:$0xff]   ;;  %v1263_v7 = vld [vmem:[#allocation2 + $0x38] sm:$0xe]  ;;  %v1264_v30 = vld [vmem:[#allocation2 + $0x3c] sm:$0x1]  ;;  %v1070_v20 = vor.u32 %v1069_v8, %v1066_v16 }
 0x18a   :  { %v5154_v29 = vld [vmem:[#allocation4 + $0x1a0] sm:$0xff]   ;;  %v4467_v22 = vrot.slane %v1261_v42, 9  ;;  %877 = vst [vmem:[#allocation2 + $0x44] sm:$0x1] %v876_v38  ;;  %3429 = vmatprep.mubr.bf16.mxu1 %v5111_v58  ;;  %v5120_v43 = vld [vmem:[#allocation4 + $0x130] sm:$0xff]   ;;  %v1342_v34 = vrot.slane %v1262_v54, 5  ;;  %v485_v42 = vadd.f32 %v5676_v61, %v463_v2  ;;  %v486_v54 = vadd.f32 %v5676_v61, %v464_v50 }
 0x18b   :  { %v4468_v33 = vrot.slane %v1263_v7, 9  ;;  %v1346_v63 = vrot.slane %v1264_v30, 5  ;;  %v1418_v59 = vld [vmem:[#allocation2 + $0x38] sm:$0xf]  ;;  %3430 = vmatmul.mubr.bf16.vlgmr.msra.gmra.mxu1 %v5109_v5  ;;  %v5116_v21 = vld [vmem:[#allocation3 + $0x9c] ss:$36 sps:$4 sm:$0xff]   ;;  %v5850_v2 = vadd.f32 %v5676_v61, %v5778_v31  ;;  %4880 = vmatpush3.bf16.msra.mxu0 %v5154_v29 }
 0x18c   :  { %v5159_v53 = vld [vmem:[#allocation4 + $0x1d8] sm:$0xff]   ;;  %v1057_v26 = vrot.slane %v1056_v0, 4  ;;  %1434 = vst [vmem:[#allocation3 + $0xe4] sm:$0xf] %v1418_v59  ;;  %v5125_v1 = vld [vmem:[#allocation4 + $0x168] sm:$0xff]   ;;  %4810 = vmatpush3.bf16.msra.mxu1 %v5113_v17  ;;  %v1071_v35 = vrot.slane %v1070_v20, 4  ;;  %v1343_v12 = vsel %vm5461_vm7, %v4467_v22, %v1342_v34  ;;  %3542 = vmatprep.mubr.bf16.mxu0 %v5116_v21  ;;  %v5854_v20 = vadd.f32 %v5676_v61, %v5781_v45 }
 0x18d   :  { %v2394_v32 = vld [vmem:[#allocation3 + $0x98] sm:$0xff]  ;;  %v932_v13 = vld [vmem:[#allocation2 + $0x30] sm:$0xf]  ;;  %v1347_v14 = vsel %vm5461_vm7, %v4468_v33, %v1346_v63  ;;  %4811 = vmatprep.subr.bf16.mxu1 %v5118_v3  ;;  %1402 = vst [vmem:[#allocation3 + $0xe0] sm:$0xf] %v1343_v12  ;;  %v5127_v3 = vld [vmem:[#allocation4 + $0x128] sm:$0xff]   ;;  %4881 = vmatprep.subr.bf16.mxu0 %v5159_v53 }
 0x18e   :  { %v2399_v48 = vld [vmem:[#allocation3 + $0xbc] sm:$0xff]  ;;  %v933_v51 = vld [vmem:[#allocation2 + $0x38] sm:$0xf]  ;;  %948 = vst [vmem:[#allocation3 + $0xd8] sm:$0xf] %v932_v13  ;;  %v1062_v24 = vsel %vm5491_vm10, %v1057_v26, %v1061_v36  ;;  %v1076_v58 = vsel %vm5491_vm10, %v1071_v35, %v1075_v19  ;;  %v5846_v36 = vadd.f32 %v5676_v61, %v5775_v37  ;;  %v5163_v38 = vld [vmem:[#allocation4 + $0x1d0] sm:$0xff]  }
 0x18f   :  { %v970_v56 = vld [vmem:[#allocation2 + $0x30] sm:$0xf]  ;;  %v5162_v39 = vld [vmem:[#allocation4 + $0x198] sm:$0xff]   ;;  %1403 = vst [vmem:[#allocation3 + $0x104] sm:$0xf] %v1347_v14  ;;  %v4529_v41 = vcombine.low %v2394_v32, %v2399_v48  ;;  %v5132_v50 = vld [vmem:[#allocation4 + $0x160] sm:$0xff]  }
 0x190   :  { %949 = vst [vmem:[#allocation3 + $0xfc] sm:$0xf] %v933_v51  ;;  %v971_v17 = vld [vmem:[#allocation2 + $0x34] sm:$0x1]  ;;  %v972_v16 = vld [vmem:[#allocation2 + $0x38] sm:$0xf]  ;;  %4812 = vmatpush3.bf16.msra.mxu1 %v5120_v43  ;;  %4882 = vmatpush3.bf16.msra.mxu0 %v5162_v39 }
 0x191   :  { %v1078_v23 = vshrl.u32 %v970_v56, 16  ;;  %v5114_v5 = vld [vmem:[#allocation3 + $0x4c] ss:$36 sps:$4 sm:$0xff]   ;;  %1237 = vst [vmem:[#allocation3 + $0x94] sm:$0xf] %v1062_v24  ;;  %v1081_v8 = vshll.u32 %v970_v56, 16  ;;  %3543 = vmatmul.mubr.bf16.gmra.mxu0 %v4529_v41  ;;  %4813 = vmatprep.subr.bf16.mxu1 %v5125_v1 }
 0x192   :  { %v5119_v0 = vld [vmem:[#allocation3 + $0x48] ss:$36 sps:$4 sm:$0xff]   ;;  %1238 = vst [vmem:[#allocation3 + $0xb8] sm:$0xf] %v1076_v58  ;;  %v1419_v7 = vld [vmem:[#allocation2 + $0x40] sm:$0xf]  ;;  %3437 = vmatprep.mubr.bf16.mxu1 %v5114_v5  ;;  %4883 = vmatprep.subr.bf16.mxu0 %v5163_v38 }
 0x193   :  { %v973_v30 = vld [vmem:[#allocation2 + $0x3c] sm:$0x1]  ;;  %v1080_v22 = vrot.slane %v1078_v23, 4  ;;  %v1087_v19 = vshll.u32 %v971_v17, 16  ;;  %1435 = vst [vmem:[#allocation3 + $0x108] sm:$0xf] %v1419_v7  ;;  %3438 = vmatmul.mubr.bf16.gmra.mxu1 %v5119_v0 }
 0x194   :  { %v1083_v37 = vrot.slane %v1081_v8, 5  ;;  %v1092_v31 = vshrl.u32 %v972_v16, 16  ;;  %v1095_v29 = vshll.u32 %v972_v16, 16  ;;  %v1101_v34 = vshll.u32 %v973_v30, 16  ;;  %v1427_v33 = vld [vmem:[#allocation2 + $0x90] sm:$0xf]  ;;  %4814 = vmatpush3.bf16.msra.mxu1 %v5127_v3 }
 0x195   :  { %v1089_v63 = vrot.slane %v1087_v19, 5  ;;  %v501_v59 = vmax.f32 %v485_v42, 0.0  ;;  %v502_v32 = vmax.f32 %v486_v54, 0.0  ;;  %v503_v21 = vmax.f32 %v487_v52, 0.0  ;;  %1443 = vst [vmem:[#allocation3 + $0x228] sm:$0xf] %v1427_v33  ;;  %4815 = vmatprep.subr.bf16.mxu1 %v5132_v50 }
 0x196   :  { %v1893_v26 = vld [vmem:[#allocation2 + $0x10] sm:$0xf]  ;;  %v1084_v13 = vor.u32 %v1083_v37, %v1080_v22  ;;  %v1094_v61 = vrot.slane %v1092_v31, 4  ;;  %v1097_v45 = vrot.slane %v1095_v29, 5  ;;  %v1103_v53 = vrot.slane %v1101_v34, 5  ;;  %v5170_v51 = vld [vmem:[#allocation4 + $0x1c8] sm:$0xff]  }
 0x197   :  { %v5165_v43 = vld [vmem:[#allocation4 + $0x190] sm:$0xff]   ;;  %v1894_v48 = vld [vmem:[#allocation2 + $0x18] sm:$0xf]  ;;  %1909 = vst [vmem:[#allocation3 + $0x18] sm:$0xf] %v1893_v26  ;;  %v4673_v35 = vpack.c.bf16 %v501_v59, %v501_v59  ;;  %v4674_v12 = vpack.c.bf16 %v502_v32, %v502_v32  ;;  %v504_v14 = vmax.f32 %v5846_v36, 0.0  ;;  %v5857_v1 = vpack.c.bf16 %v503_v21, %v503_v21 }
 0x198   :  { %1910 = vst [vmem:[#allocation3 + $0x3c] sm:$0xf] %v1894_v48  ;;  %v1085_v56 = vrot.slane %v1084_v13, 4  ;;  %v1098_v42 = vor.u32 %v1097_v45, %v1094_v61  ;;  %v5134_v24 = vld [vmem:[#allocation4 + $0x120] sm:$0xff]   ;;  %v5142_v17 = vld [vmem:[#allocation4 + $0x158] sm:$0xff]   ;;  %v505_v39 = vmax.f32 %v5850_v2, 0.0  ;;  %4884 = vmatpush3.bf16.msra.mxu0 %v5165_v43 }
 0x199   :  { %v506_v16 = vmax.f32 %v5854_v20, 0.0  ;;  %v2404_v23 = vld [vmem:[#allocation3 + $0xe0] sm:$0xff]  ;;  %v733_v54 = vshrl.u32 %v4673_v35, 16  ;;  %v736_v52 = vshll.u32 %v4673_v35, 16  ;;  %v741_v5 = vshrl.u32 %v4674_v12, 16  ;;  %4885 = vmatprep.subr.bf16.mxu0 %v5170_v51  ;;  %4816 = vmatpush3.bf16.msra.mxu1 %v5134_v24  ;;  %v5145_v59 = vld [vmem:[#allocation4 + $0x118] sm:$0xff]  }
 0x19a   :  { %v744_v58 = vshll.u32 %v4674_v12, 16  ;;  %v5121_v8 = vld [vmem:[#allocation3 + $0x94] ss:$36 sps:$4 sm:$0xff]   ;;  %v1090_v36 = vsel %vm5491_vm10, %v1085_v56, %v1089_v63  ;;  %v1099_v38 = vrot.slane %v1098_v42, 4  ;;  %v881_v0 = vld [vmem:[#allocation2 + $0x5c] sm:$0x1]  ;;  %v4676_v7 = vpack.c.bf16 %v504_v14, %v504_v14  ;;  %4817 = vmatprep.subr.bf16.mxu1 %v5142_v17 }
 0x19b   :  { %v878_v3 = vld [vmem:[#allocation2 + $0x58] sm:$0xf]  ;;  %v884_v41 = vld [vmem:[#allocation2 + $0x60] sm:$0xf]  ;;  %v5863_v30 = vpack.c.bf16 %v505_v39, %v505_v39  ;;  %v2409_v2 = vld [vmem:[#allocation3 + $0x104] sm:$0xff]  ;;  %v735_v19 = vrot.slane %v733_v54, 7  ;;  %v5866_v50 = vpack.c.bf16 %v506_v16, %v506_v16  ;;  %3445 = vmatprep.mubr.bf16.mxu1 %v5121_v8 }
 0x19c   :  { %v5123_v22 = vld [vmem:[#allocation3 + $0xe4] ss:$36 sps:$4 sm:$0xff]   ;;  %1239 = vst [vmem:[#allocation3 + $0xdc] sm:$0xf] %v1090_v36  ;;  %v743_v20 = vrot.slane %v741_v5, 7  ;;  %v749_v37 = vshrl.u32 %v5857_v1, 16  ;;  %v1104_v31 = vsel %vm5491_vm10, %v1099_v38, %v1103_v53  ;;  %v4538_v29 = vcombine.low %v2404_v23, %v2409_v2 }
 0x19d   :  { %v752_v34 = vshll.u32 %v5857_v1, 16  ;;  %v757_v33 = vshrl.u32 %v4676_v7, 16  ;;  %v887_v63 = vld [vmem:[#allocation2 + $0x64] sm:$0x1]  ;;  %v5171_v32 = vld [vmem:[#allocation4 + $0x188] sm:$0xff]   ;;  %3550 = vmatprep.mubr.bf16.mxu0 %v5123_v22  ;;  %v738_v26 = vor.u32 %v736_v52, %v735_v19  ;;  %v739_v13 = vrot.slane %v735_v19, 4  ;;  %4818 = vmatpush3.bf16.msra.mxu1 %v5145_v59 }
 0x19e   :  { %v5126_v21 = vld [vmem:[#allocation3 + $0x90] ss:$36 sps:$4 sm:$0xff]   ;;  %1240 = vst [vmem:[#allocation3 + $0x100] sm:$0xf] %v1104_v31  ;;  %v746_v61 = vor.u32 %v744_v58, %v743_v20  ;;  %v747_v45 = vrot.slane %v743_v20, 4  ;;  %v5175_v53 = vld [vmem:[#allocation4 + $0x1c0] sm:$0xff]   ;;  %3551 = vmatmul.mubr.bf16.gmra.mxu0 %v4538_v29 }
 0x19f   :  { %v890_v43 = vld [vmem:[#allocation2 + $0x68] sm:$0xf]  ;;  %v893_v48 = vld [vmem:[#allocation2 + $0x6c] sm:$0x1]  ;;  %v5153_v35 = vld [vmem:[#allocation4 + $0x150] sm:$0xff]   ;;  %v751_v12 = vrot.slane %v749_v37, 7  ;;  %3446 = vmatmul.mubr.bf16.gmra.mxu1 %v5126_v21  ;;  %v879_v42 = vsel %vm5715_vm12, %v738_v26, %v878_v3  ;;  %v882_v24 = vsel %vm5434_vm3, %v739_v13, %v881_v0  ;;  %4886 = vmatpush3.bf16.msra.mxu0 %v5171_v32 }
 0x1a0   :  { %v759_v14 = vrot.slane %v757_v33, 7  ;;  %v760_v1 = vshll.u32 %v4676_v7, 16  ;;  %v896_v51 = vld [vmem:[#allocation2 + $0x70] sm:$0xf]  ;;  %v765_v56 = vshrl.u32 %v5863_v30, 16  ;;  %v885_v39 = vsel %vm5715_vm12, %v746_v61, %v884_v41  ;;  %v5177_v54 = vld [vmem:[#allocation4 + $0x180] sm:$0xff]   ;;  %4819 = vmatprep.subr.bf16.mxu1 %v5153_v35  ;;  %4887 = vmatprep.subr.bf16.mxu0 %v5175_v53 }
 0x1a1   :  { %v888_v17 = vsel %vm5434_vm3, %v747_v45, %v887_v63  ;;  %v899_v16 = vld [vmem:[#allocation2 + $0x74] sm:$0x1]  ;;  %880 = vst [vmem:[#allocation2 + $0x58] sm:$0xf] %v879_v42  ;;  %883 = vst [vmem:[#allocation2 + $0x5c] sm:$0x1] %v882_v24  ;;  %v754_v52 = vor.u32 %v752_v34, %v751_v12 }
 0x1a2   :  { %v5156_v23 = vld [vmem:[#allocation4 + $0x110] sm:$0xff]   ;;  %886 = vst [vmem:[#allocation2 + $0x60] sm:$0xf] %v885_v39  ;;  %v755_v5 = vrot.slane %v751_v12, 4  ;;  %v762_v58 = vor.u32 %v760_v1, %v759_v14  ;;  %v763_v8 = vrot.slane %v759_v14, 4  ;;  %v767_v0 = vrot.slane %v765_v56, 7 }
 0x1a3   :  { %889 = vst [vmem:[#allocation2 + $0x64] sm:$0x1] %v888_v17  ;;  %v902_v36 = vld [vmem:[#allocation2 + $0x78] sm:$0xf]  ;;  %v5880_v38 = vld [vmem:[#allocation2 + $0x10] sm:$0xf]  ;;  %v891_v19 = vsel %vm5715_vm12, %v754_v52, %v890_v43  ;;  %4820 = vmatpush3.bf16.msra.mxu1 %v5156_v23  ;;  %4888 = vmatpush3.bf16.msra.mxu0 %v5177_v54 }
 0x1a4   :  { %v1895_v3 = vld [vmem:[#allocation2 + $0x20] sm:$0xf]  ;;  %v768_v41 = vshll.u32 %v5863_v30, 16  ;;  %v773_v7 = vshrl.u32 %v5866_v50, 16  ;;  %v5164_v2 = vld [vmem:[#allocation4 + $0x148] sm:$0xff]   ;;  %v894_v20 = vsel %vm5434_vm3, %v755_v5, %v893_v48  ;;  %v897_v37 = vsel %vm5715_vm12, %v762_v58, %v896_v51 }
 0x1a5   :  { %v1896_v22 = vld [vmem:[#allocation2 + $0x28] sm:$0xf]  ;;  %1911 = vst [vmem:[#allocation3 + $0x60] sm:$0xf] %v1895_v3  ;;  %v900_v31 = vsel %vm5434_vm3, %v763_v8, %v899_v16  ;;  %v905_v30 = vld [vmem:[#allocation2 + $0x7c] sm:$0x1]  ;;  %4821 = vmatprep.subr.bf16.mxu1 %v5164_v2 }
 0x1a6   :  { %v908_v29 = vld [vmem:[#allocation2 + $0x80] sm:$0xf]  ;;  %1912 = vst [vmem:[#allocation3 + $0x84] sm:$0xf] %v1896_v22  ;;  %892 = vst [vmem:[#allocation2 + $0x68] sm:$0xf] %v891_v19  ;;  %v770_v34 = vor.u32 %v768_v41, %v767_v0 }
 0x1a7   :  { %895 = vst [vmem:[#allocation2 + $0x6c] sm:$0x1] %v894_v20  ;;  %898 = vst [vmem:[#allocation2 + $0x70] sm:$0xf] %v897_v37  ;;  %v771_v33 = vrot.slane %v767_v0, 4  ;;  %v775_v63 = vrot.slane %v773_v7, 7 }
 0x1a8   :  { %v776_v59 = vshll.u32 %v5866_v50, 16  ;;  %901 = vst [vmem:[#allocation2 + $0x74] sm:$0x1] %v900_v31  ;;  %v911_v32 = vld [vmem:[#allocation2 + $0x84] sm:$0x1]  ;;  %v5167_v26 = vld [vmem:[#allocation4 + $0x108] sm:$0xff]   ;;  %v903_v48 = vsel %vm5715_vm12, %v770_v34, %v902_v36 }
 0x1a9   :  { %v5128_v21 = vld [vmem:[#allocation3 + $0xdc] ss:$36 sps:$4 sm:$0xff]   ;;  %v1958_v13 = vshrl.u32 %v5880_v38, 16  ;;  %v779_v43 = vrot.slane %v775_v63, 4  ;;  %v906_v35 = vsel %vm5434_vm3, %v771_v33, %v905_v30  ;;  %904 = vst [vmem:[#allocation2 + $0x78] sm:$0xf] %v903_v48  ;;  %4822 = vmatpush3.bf16.msra.mxu1 %v5167_v26 }
 0x1aa   :  { %v5133_v61 = vld [vmem:[#allocation3 + $0xd8] ss:$36 sps:$4 sm:$0xff]   ;;  %v778_v45 = vor.u32 %v776_v59, %v775_v63  ;;  %v5176_v53 = vld [vmem:[#allocation4 + $0x140] sm:$0xff]   ;;  %3453 = vmatprep.mubr.bf16.mxu1 %v5128_v21  ;;  %907 = vst [vmem:[#allocation2 + $0x7c] sm:$0x1] %v906_v35  ;;  %v507_v50 = vmax.f32 %v5792_v15, 0.0 }
 0x1ab   :  { %v5899_v12 = vrot.slane %v1958_v13, 4  ;;  %v1961_v14 = vshll.u32 %v5880_v38, 16  ;;  %v5179_v1 = vld [vmem:[#allocation4 + $0x100] sm:$0xff]   ;;  %v1267_v51 = vld [vmem:[#allocation2 + $0x58] sm:$0xe]  ;;  %3454 = vmatmul.mubr.bf16.gmra.mxu1 %v5133_v61  ;;  %v912_v39 = vsel %vm5434_vm3, %v779_v43, %v911_v32  ;;  %4823 = vmatprep.subr.bf16.mxu1 %v5176_v53 }
 0x1ac   :  { %v1268_v56 = vld [vmem:[#allocation2 + $0x5c] sm:$0x1]  ;;  %v1420_v42 = vld [vmem:[#allocation2 + $0x58] sm:$0xf]  ;;  %v909_v24 = vsel %vm5715_vm12, %v778_v45, %v908_v29  ;;  %v5906_v17 = vld [vmem:[#allocation2 + $0x14] sm:$0x1]  ;;  %v5912_v37 = vpack.c.bf16 %v507_v50, %v507_v50 }
 0x1ad   :  { %v5908_v16 = vld [vmem:[#allocation4 + $0x238] sm:$0xff]   ;;  %v4470_v15 = vrot.slane %v1267_v51, 9  ;;  %v1354_v23 = vrot.slane %v1268_v56, 5  ;;  %v1421_v54 = vld [vmem:[#allocation2 + $0x60] sm:$0xf]  ;;  %v1967_v33 = vshll.u32 %v5906_v17, 16  ;;  %4824 = vmatpush3.bf16.msra.mxu1 %v5179_v1 }
 0x1ae   :  { %1436 = vst [vmem:[#allocation3 + $0x12c] sm:$0xf] %v1420_v42  ;;  %v935_v52 = vld [vmem:[#allocation2 + $0x58] sm:$0xf]  ;;  %910 = vst [vmem:[#allocation2 + $0x80] sm:$0xf] %v909_v24  ;;  %4969 = vmatprep.subr.bf16.mxu1 %v5908_v16 }
 0x1af   :  { %913 = vst [vmem:[#allocation2 + $0x84] sm:$0x1] %v912_v39  ;;  %1437 = vst [vmem:[#allocation3 + $0x150] sm:$0xf] %v1421_v54  ;;  %v976_v5 = vld [vmem:[#allocation2 + $0x58] sm:$0xf]  ;;  %v1355_v36 = vsel %vm5461_vm7, %v4470_v15, %v1354_v23 }
 0x1b0   :  { %951 = vst [vmem:[#allocation3 + $0x144] sm:$0xf] %v935_v52  ;;  %v977_v58 = vld [vmem:[#allocation2 + $0x5c] sm:$0x1]  ;;  %v1269_v8 = vld [vmem:[#allocation2 + $0x60] sm:$0xe] }
 0x1b1   :  { %v1120_v3 = vshrl.u32 %v976_v5, 16  ;;  %v1123_v0 = vshll.u32 %v976_v5, 16  ;;  %v1129_v41 = vshll.u32 %v977_v58, 16  ;;  %v1270_v7 = vld [vmem:[#allocation2 + $0x64] sm:$0x1]  ;;  %v4471_v19 = vrot.slane %v1269_v8, 9 }
 0x1b2   :  { %1405 = vst [vmem:[#allocation3 + $0x14c] sm:$0xf] %v1355_v36  ;;  %v1271_v2 = vld [vmem:[#allocation2 + $0x68] sm:$0xe]  ;;  %v1272_v22 = vld [vmem:[#allocation2 + $0x6c] sm:$0x1] }
 0x1b3   :  { %v1358_v20 = vrot.slane %v1270_v7, 5  ;;  %v1122_v31 = vrot.slane %v1120_v3, 4  ;;  %v1125_v30 = vrot.slane %v1123_v0, 5  ;;  %v4472_v29 = vrot.slane %v1271_v2, 9  ;;  %v1422_v34 = vld [vmem:[#allocation2 + $0x68] sm:$0xf] }
 0x1b4   :  { %v1131_v63 = vrot.slane %v1129_v41, 5  ;;  %v1362_v32 = vrot.slane %v1272_v22, 5  ;;  %v1423_v21 = vld [vmem:[#allocation2 + $0x70] sm:$0xf]  ;;  %1438 = vst [vmem:[#allocation3 + $0x174] sm:$0xf] %v1422_v34 }
 0x1b5   :  { %v1359_v59 = vsel %vm5461_vm7, %v4471_v19, %v1358_v20  ;;  %v936_v26 = vld [vmem:[#allocation2 + $0x60] sm:$0xf]  ;;  %v1126_v13 = vor.u32 %v1125_v30, %v1122_v31  ;;  %1439 = vst [vmem:[#allocation3 + $0x198] sm:$0xf] %v1423_v21  ;;  %v937_v61 = vld [vmem:[#allocation2 + $0x68] sm:$0xf] }
 0x1b6   :  { %1406 = vst [vmem:[#allocation3 + $0x170] sm:$0xf] %v1359_v59  ;;  %952 = vst [vmem:[#allocation3 + $0x168] sm:$0xf] %v936_v26  ;;  %v978_v45 = vld [vmem:[#allocation2 + $0x60] sm:$0xf]  ;;  %v1363_v48 = vsel %vm5461_vm7, %v4472_v29, %v1362_v32 }
 0x1b7   :  { %v979_v43 = vld [vmem:[#allocation2 + $0x64] sm:$0x1]  ;;  %953 = vst [vmem:[#allocation3 + $0x18c] sm:$0xf] %v937_v61  ;;  %v980_v35 = vld [vmem:[#allocation2 + $0x68] sm:$0xf] }
 0x1b8   :  { %v981_v53 = vld [vmem:[#allocation2 + $0x6c] sm:$0x1]  ;;  %v1134_v50 = vshrl.u32 %v978_v45, 16  ;;  %v781_v1 = vshrl.u32 %v5912_v37, 16  ;;  %v1127_v51 = vrot.slane %v1126_v13, 4  ;;  %v1137_v56 = vshll.u32 %v978_v45, 16 }
 0x1b9   :  { %1407 = vst [vmem:[#allocation3 + $0x194] sm:$0xf] %v1363_v48  ;;  %v1143_v42 = vshll.u32 %v979_v43, 16  ;;  %v1148_v24 = vshrl.u32 %v980_v35, 16  ;;  %v1273_v39 = vld [vmem:[#allocation2 + $0x70] sm:$0xe] }
 0x1ba   :  { %v2414_v15 = vld [vmem:[#allocation3 + $0x128] sm:$0xff]  ;;  %v1136_v23 = vrot.slane %v1134_v50, 4  ;;  %v1151_v54 = vshll.u32 %v980_v35, 16  ;;  %v1157_v52 = vshll.u32 %v981_v53, 16  ;;  %v1274_v5 = vld [vmem:[#allocation2 + $0x74] sm:$0x1]  ;;  %v1132_v36 = vsel %vm5491_vm10, %v1127_v51, %v1131_v63 }
 0x1bb   :  { %v2419_v58 = vld [vmem:[#allocation3 + $0x14c] sm:$0xff]  ;;  %v1139_v3 = vrot.slane %v1137_v56, 5  ;;  %v1150_v0 = vrot.slane %v1148_v24, 4  ;;  %v4473_v41 = vrot.slane %v1273_v39, 9  ;;  %1242 = vst [vmem:[#allocation3 + $0x148] sm:$0xf] %v1132_v36 }
 0x1bc   :  { %v5130_v8 = vld [vmem:[#allocation3 + $0x12c] ss:$36 sps:$4 sm:$0xff]   ;;  %v4547_v7 = vcombine.low %v2414_v15, %v2419_v58  ;;  %v1145_v2 = vrot.slane %v1143_v42, 5  ;;  %v1153_v22 = vrot.slane %v1151_v54, 5  ;;  %v1275_v19 = vld [vmem:[#allocation2 + $0x78] sm:$0xe] }
 0x1bd   :  { %v1276_v20 = vld [vmem:[#allocation2 + $0x7c] sm:$0x1]  ;;  %3558 = vmatprep.mubr.bf16.mxu0 %v5130_v8  ;;  %v1140_v31 = vor.u32 %v1139_v3, %v1136_v23  ;;  %v1366_v30 = vrot.slane %v1274_v5, 5  ;;  %v4474_v29 = vrot.slane %v1275_v19, 9  ;;  %v1424_v59 = vld [vmem:[#allocation2 + $0x78] sm:$0xf] }
 0x1be   :  { %v1370_v34 = vrot.slane %v1276_v20, 5  ;;  %3559 = vmatmul.mubr.bf16.gmra.mxu0 %v4547_v7  ;;  %v1154_v32 = vor.u32 %v1153_v22, %v1150_v0  ;;  %v1159_v21 = vrot.slane %v1157_v52, 5  ;;  %v1425_v26 = vld [vmem:[#allocation2 + $0x80] sm:$0xf]  ;;  %1440 = vst [vmem:[#allocation3 + $0x1bc] sm:$0xf] %v1424_v59 }
 0x1bf   :  { %v938_v63 = vld [vmem:[#allocation2 + $0x70] sm:$0xf]  ;;  %v5923_v13 = vrot.slane %v781_v1, 7  ;;  %v1141_v45 = vrot.slane %v1140_v31, 4  ;;  %v1367_v43 = vsel %vm5461_vm7, %v4473_v41, %v1366_v30  ;;  %1441 = vst [vmem:[#allocation3 + $0x1e0] sm:$0xf] %v1425_v26 }
 0x1c0   :  { %v2424_v61 = vld [vmem:[#allocation3 + $0x170] sm:$0xff]  ;;  %v1371_v48 = vsel %vm5461_vm7, %v4474_v29, %v1370_v34  ;;  %v939_v35 = vld [vmem:[#allocation2 + $0x78] sm:$0xf]  ;;  %954 = vst [vmem:[#allocation3 + $0x1b0] sm:$0xf] %v938_v63  ;;  %v784_v50 = vshll.u32 %v5912_v37, 16 }
 0x1c1   :  { %v982_v53 = vld [vmem:[#allocation2 + $0x70] sm:$0xf]  ;;  %v2429_v51 = vld [vmem:[#allocation3 + $0x194] sm:$0xff]  ;;  %v1155_v42 = vrot.slane %v1154_v32, 4  ;;  %1408 = vst [vmem:[#allocation3 + $0x1b8] sm:$0xf] %v1367_v43  ;;  %v1146_v39 = vsel %vm5491_vm10, %v1141_v45, %v1145_v2 }
 0x1c2   :  { %v5138_v56 = vld [vmem:[#allocation3 + $0x174] ss:$36 sps:$4 sm:$0xff]   ;;  %1409 = vst [vmem:[#allocation3 + $0x1dc] sm:$0xf] %v1371_v48  ;;  %955 = vst [vmem:[#allocation3 + $0x1d4] sm:$0xf] %v939_v35  ;;  %v786_v2 = vor.u32 %v784_v50, %v5923_v13  ;;  %v4556_v22 = vcombine.low %v2424_v61, %v2429_v51 }
 0x1c3   :  { %v983_v1 = vld [vmem:[#allocation2 + $0x74] sm:$0x1]  ;;  %v914_v24 = vld [vmem:[#allocation2 + $0x88] sm:$0xf]  ;;  %v984_v15 = vld [vmem:[#allocation2 + $0x78] sm:$0xf]  ;;  %3566 = vmatprep.mubr.bf16.mxu0 %v5138_v56  ;;  %v1160_v5 = vsel %vm5491_vm10, %v1155_v42, %v1159_v21 }
 0x1c4   :  { %v985_v23 = vld [vmem:[#allocation2 + $0x7c] sm:$0x1]  ;;  %v1162_v54 = vshrl.u32 %v982_v53, 16  ;;  %v1165_v52 = vshll.u32 %v982_v53, 16  ;;  %1243 = vst [vmem:[#allocation3 + $0x16c] sm:$0xf] %v1146_v39  ;;  %v915_v59 = vsel %vm5715_vm12, %v786_v2, %v914_v24 }
 0x1c5   :  { %v1171_v37 = vshll.u32 %v983_v1, 16  ;;  %v1176_v58 = vshrl.u32 %v984_v15, 16  ;;  %v1179_v8 = vshll.u32 %v984_v15, 16  ;;  %v917_v36 = vld [vmem:[#allocation2 + $0x8c] sm:$0x1]  ;;  %v1185_v29 = vshll.u32 %v985_v23, 16 }
 0x1c6   :  { %v1277_v3 = vld [vmem:[#allocation2 + $0x80] sm:$0xe]  ;;  %v5135_v0 = vld [vmem:[#allocation3 + $0x124] ss:$36 sps:$4 sm:$0xff]   ;;  %1244 = vst [vmem:[#allocation3 + $0x190] sm:$0xf] %v1160_v5  ;;  %3567 = vmatmul.mubr.bf16.gmra.mxu0 %v4556_v22 }
 0x1c7   :  { %v5144_v41 = vld [vmem:[#allocation3 + $0x120] ss:$36 sps:$4 sm:$0xff]   ;;  %v1164_v7 = vrot.slane %v1162_v54, 4  ;;  %v1167_v19 = vrot.slane %v1165_v52, 5  ;;  %v1178_v20 = vrot.slane %v1176_v58, 4  ;;  %v1181_v31 = vrot.slane %v1179_v8, 5  ;;  %3461 = vmatprep.mubr.bf16.mxu1 %v5135_v0 }
 0x1c8   :  { %v1278_v30 = vld [vmem:[#allocation2 + $0x84] sm:$0x1]  ;;  %v787_v34 = vrot.slane %v5923_v13, 4  ;;  %v4475_v32 = vrot.slane %v1277_v3, 9  ;;  %v940_v21 = vld [vmem:[#allocation2 + $0x80] sm:$0xf]  ;;  %3462 = vmatmul.mubr.bf16.gmra.mxu1 %v5144_v41 }
 0x1c9   :  { %v1168_v26 = vor.u32 %v1167_v19, %v1164_v7  ;;  %v1182_v63 = vor.u32 %v1181_v31, %v1178_v20  ;;  %916 = vst [vmem:[#allocation2 + $0x88] sm:$0xf] %v915_v59  ;;  %v1374_v45 = vrot.slane %v1278_v30, 5  ;;  %956 = vst [vmem:[#allocation3 + $0x1f8] sm:$0xf] %v940_v21  ;;  %v1963_v35 = vrot.slane %v1961_v14, 5 }
 0x1ca   :  { %v986_v61 = vld [vmem:[#allocation2 + $0x80] sm:$0xf]  ;;  %v987_v43 = vld [vmem:[#allocation2 + $0x84] sm:$0x1]  ;;  %v1927_v48 = vld [vmem:[#allocation2 + $0x18] sm:$0xf]  ;;  %v918_v51 = vsel %vm5434_vm3, %v787_v34, %v917_v36 }
 0x1cb   :  { %v2434_v53 = vld [vmem:[#allocation3 + $0x1b8] sm:$0xff]  ;;  %v1173_v11 = vrot.slane %v1171_v37, 5  ;;  %v1190_v56 = vshrl.u32 %v986_v61, 16  ;;  %v1169_v42 = vrot.slane %v1168_v26, 4  ;;  %v1183_v1 = vrot.slane %v1182_v63, 4 }
 0x1cc   :  { %v2439_v13 = vld [vmem:[#allocation3 + $0x1dc] sm:$0xff]  ;;  %v1187_v24 = vrot.slane %v1185_v29, 5  ;;  %919 = vst [vmem:[#allocation2 + $0x8c] sm:$0x1] %v918_v51  ;;  %v1375_v39 = vsel %vm5461_vm7, %v4475_v32, %v1374_v45  ;;  %v1193_v14 = vshll.u32 %v986_v61, 16  ;;  %v1199_v23 = vshll.u32 %v987_v43, 16 }
 0x1cd   :  { %v5149_v50 = vld [vmem:[#allocation3 + $0x1bc] ss:$36 sps:$4 sm:$0xff]   ;;  %1410 = vst [vmem:[#allocation3 + $0x200] sm:$0xf] %v1375_v39  ;;  %v1192_v38 = vrot.slane %v1190_v56, 4  ;;  %v1964_v54 = vor.u32 %v1963_v35, %v5899_v12  ;;  %v1174_v27 = vsel %vm5491_vm10, %v1169_v42, %v1173_v11  ;;  %v4565_v58 = vcombine.low %v2434_v53, %v2439_v13 }
 0x1ce   :  { %v1928_v15 = vld [vmem:[#allocation2 + $0x1c] sm:$0x1]  ;;  %3574 = vmatprep.mubr.bf16.mxu0 %v5149_v50  ;;  %v1444_v52 = vld [vmem:[#allocation2 + $0x8] sm:$0xf]  ;;  %v5146_v5 = vld [vmem:[#allocation3 + $0x16c] ss:$36 sps:$4 sm:$0xff]   ;;  %v1188_v37 = vsel %vm5491_vm10, %v1183_v1, %v1187_v24 }
 0x1cf   :  { %v1969_v8 = vrot.slane %v1967_v33, 5  ;;  %1245 = vst [vmem:[#allocation3 + $0x1b4] sm:$0xf] %v1174_v27  ;;  %1246 = vst [vmem:[#allocation3 + $0x1d8] sm:$0xf] %v1188_v37  ;;  %v1195_v36 = vrot.slane %v1193_v14, 5  ;;  %3469 = vmatprep.mubr.bf16.mxu1 %v5146_v5  ;;  %3575 = vmatmul.mubr.bf16.gmra.mxu0 %v4565_v58 }
 0x1d0   :  { %v1201_v3 = vrot.slane %v1199_v23, 5  ;;  %v1965_v0 = vrot.slane %v1964_v54, 4  ;;  %v1972_v41 = vshrl.u32 %v1927_v48, 16  ;;  %v5155_v12 = vld [vmem:[#allocation3 + $0x168] ss:$36 sps:$4 sm:$0xff]   ;;  %v1975_v7 = vshll.u32 %v1927_v48, 16 }
 0x1d1   :  { %v1981_v2 = vshll.u32 %v1928_v15, 16  ;;  %v1477_v22 = vshrl.u32 %v1444_v52, 16  ;;  %v1480_v19 = vshll.u32 %v1444_v52, 16  ;;  %v1279_v20 = vld [vmem:[#allocation2 + $0x88] sm:$0xe]  ;;  %v1196_v29 = vor.u32 %v1195_v36, %v1192_v38  ;;  %3470 = vmatmul.mubr.bf16.gmra.mxu1 %v5155_v12 }
 0x1d2   :  { %v1426_v31 = vld [vmem:[#allocation2 + $0x88] sm:$0xf]  ;;  %v1970_v17 = vsel %vm5491_vm10, %v1965_v0, %v1969_v8  ;;  %v4476_v33 = vrot.slane %v1279_v20, 9  ;;  %v1974_v59 = vrot.slane %v1972_v41, 4  ;;  %v1977_v32 = vrot.slane %v1975_v7, 5 }
 0x1d3   :  { %v941_v30 = vld [vmem:[#allocation2 + $0x88] sm:$0xf]  ;;  %1442 = vst [vmem:[#allocation3 + $0x204] sm:$0xf] %v1426_v31  ;;  %v1983_v21 = vrot.slane %v1981_v2, 5  ;;  %v1197_v43 = vrot.slane %v1196_v29, 4 }
 0x1d4   :  { %957 = vst [vmem:[#allocation3 + $0x21c] sm:$0xf] %v941_v30  ;;  %v988_v34 = vld [vmem:[#allocation2 + $0x88] sm:$0xf]  ;;  %2197 = vst [vmem:[#allocation3 + $0x1c] sm:$0xf] %v1970_v17  ;;  %v1978_v11 = vor.u32 %v1977_v32, %v1974_v59 }
 0x1d5   :  { %v1445_v26 = vld [vmem:[#allocation2 + $0xc] sm:$0x1]  ;;  %v1446_v63 = vld [vmem:[#allocation2 + $0x10] sm:$0xf]  ;;  %v1204_v48 = vshrl.u32 %v988_v34, 16  ;;  %v1207_v13 = vshll.u32 %v988_v34, 16  ;;  %v1202_v56 = vsel %vm5491_vm10, %v1197_v43, %v1201_v3 }
 0x1d6   :  { %v1280_v45 = vld [vmem:[#allocation2 + $0x8c] sm:$0x1]  ;;  %v1447_v35 = vld [vmem:[#allocation2 + $0x14] sm:$0x1]  ;;  %v1732_v51 = vld [vmem:[#allocation2 + $0x8] sm:$0xe] }
 0x1d7   :  { %v989_v61 = vld [vmem:[#allocation2 + $0x8c] sm:$0x1]  ;;  %v1378_v53 = vrot.slane %v1280_v45, 5  ;;  %v1206_v42 = vrot.slane %v1204_v48, 4  ;;  %v1479_v1 = vrot.slane %v1477_v22, 4  ;;  %v1482_v24 = vrot.slane %v1480_v19, 5 }
 0x1d8   :  { %v1213_v50 = vshll.u32 %v989_v61, 16  ;;  %v1733_v39 = vld [vmem:[#allocation2 + $0xc] sm:$0x1]  ;;  %v1897_v15 = vld [vmem:[#allocation2 + $0x30] sm:$0xf]  ;;  %v1209_v23 = vrot.slane %v1207_v13, 5 }
 0x1d9   :  { %v5157_v38 = vld [vmem:[#allocation3 + $0x1b4] ss:$36 sps:$4 sm:$0xff]   ;;  %v1379_v14 = vsel %vm5461_vm7, %v4476_v33, %v1378_v53  ;;  %1247 = vst [vmem:[#allocation3 + $0x1fc] sm:$0xf] %v1202_v56  ;;  %v1734_v52 = vld [vmem:[#allocation2 + $0x10] sm:$0xe]  ;;  %v1483_v8 = vor.u32 %v1482_v24, %v1479_v1 }
 0x1da   :  { %v1215_v54 = vrot.slane %v1213_v50, 5  ;;  %v1735_v5 = vld [vmem:[#allocation2 + $0x14] sm:$0x1]  ;;  %v1929_v27 = vld [vmem:[#allocation2 + $0x20] sm:$0xf]  ;;  %v1979_v58 = vrot.slane %v1978_v11, 4  ;;  %3477 = vmatprep.mubr.bf16.mxu1 %v5157_v38  ;;  %v1210_v0 = vor.u32 %v1209_v23, %v1206_v42 }
 0x1db   :  { %1913 = vst [vmem:[#allocation3 + $0xa8] sm:$0xf] %v1897_v15  ;;  %1411 = vst [vmem:[#allocation3 + $0x224] sm:$0xf] %v1379_v14  ;;  %v5166_v37 = vld [vmem:[#allocation3 + $0x1b0] ss:$36 sps:$4 sm:$0xff]  }
 0x1dc   :  { %v1486_v36 = vshll.u32 %v1445_v26, 16  ;;  %v1491_v3 = vshrl.u32 %v1446_v63, 16  ;;  %v1494_v41 = vshll.u32 %v1446_v63, 16  ;;  %v1500_v12 = vshll.u32 %v1447_v35, 16  ;;  %v1898_v2 = vld [vmem:[#allocation2 + $0x38] sm:$0xf]  ;;  %3478 = vmatmul.mubr.bf16.gmra.mxu1 %v5166_v37 }
 0x1dd   :  { %v4477_v7 = vrot.slane %v1732_v51, 9  ;;  %v1984_v22 = vsel %vm5491_vm10, %v1979_v58, %v1983_v21  ;;  %v1484_v19 = vrot.slane %v1483_v8, 4  ;;  %v1930_v30 = vld [vmem:[#allocation2 + $0x24] sm:$0x1]  ;;  %1914 = vst [vmem:[#allocation3 + $0xcc] sm:$0xf] %v1898_v2 }
 0x1de   :  { %v1488_v20 = vrot.slane %v1486_v36, 5  ;;  %v1493_v31 = vrot.slane %v1491_v3, 4  ;;  %v1211_v29 = vrot.slane %v1210_v0, 4  ;;  %2198 = vst [vmem:[#allocation3 + $0x40] sm:$0xf] %v1984_v22  ;;  %v1496_v17 = vrot.slane %v1494_v41, 5 }
 0x1df   :  { %v1502_v33 = vrot.slane %v1500_v12, 5  ;;  %v1798_v34 = vrot.slane %v1733_v39, 5  ;;  %v1931_v59 = vld [vmem:[#allocation2 + $0x28] sm:$0xf]  ;;  %v4478_v26 = vrot.slane %v1734_v52, 9  ;;  %v1802_v63 = vrot.slane %v1735_v5, 5 }
 0x1e0   :  { %v1489_v32 = vsel %vm5491_vm10, %v1484_v19, %v1488_v20  ;;  %v1986_v45 = vshrl.u32 %v1929_v27, 16  ;;  %v2444_v61 = vld [vmem:[#allocation3 + $0x200] sm:$0xff]  ;;  %v1216_v21 = vsel %vm5491_vm10, %v1211_v29, %v1215_v54  ;;  %v1497_v43 = vor.u32 %v1496_v17, %v1493_v31  ;;  %v1932_v35 = vld [vmem:[#allocation2 + $0x2c] sm:$0x1]  ;;  %v1448_v56 = vld [vmem:[#allocation2 + $0x18] sm:$0xf] }
 0x1e1   :  { %1716 = vst [vmem:[#allocation3 + $0x10] sm:$0xf] %v1489_v32  ;;  %v1799_v48 = vsel %vm5461_vm7, %v4477_v7, %v1798_v34  ;;  %v1989_v53 = vshll.u32 %v1929_v27, 16  ;;  %1248 = vst [vmem:[#allocation3 + $0x220] sm:$0xf] %v1216_v21  ;;  %v1803_v13 = vsel %vm5461_vm7, %v4478_v26, %v1802_v63  ;;  %v1995_v11 = vshll.u32 %v1930_v30, 16 }
 0x1e2   :  { %1876 = vst [vmem:[#allocation3 + $0x14] sm:$0xf] %v1799_v48  ;;  %v1988_v50 = vrot.slane %v1986_v45, 4  ;;  %v2000_v51 = vshrl.u32 %v1931_v59, 16  ;;  %v2449_v42 = vld [vmem:[#allocation3 + $0x224] sm:$0xff]  ;;  %v1498_v24 = vrot.slane %v1497_v43, 4 }
 0x1e3   :  { %v5160_v1 = vld [vmem:[#allocation3 + $0x204] ss:$36 sps:$4 sm:$0xff]   ;;  %1877 = vst [vmem:[#allocation3 + $0x38] sm:$0xf] %v1803_v13  ;;  %v1991_v39 = vrot.slane %v1989_v53, 5  ;;  %v2003_v15 = vshll.u32 %v1931_v59, 16  ;;  %v4574_v38 = vcombine.low %v2444_v61, %v2449_v42 }
 0x1e4   :  { %v2002_v14 = vrot.slane %v2000_v51, 4  ;;  %v2009_v23 = vshll.u32 %v1932_v35, 16  ;;  %v1449_v54 = vld [vmem:[#allocation2 + $0x1c] sm:$0x1]  ;;  %3582 = vmatprep.mubr.bf16.mxu0 %v5160_v1  ;;  %v1503_v52 = vsel %vm5491_vm10, %v1498_v24, %v1502_v33  ;;  %v1450_v37 = vld [vmem:[#allocation2 + $0x20] sm:$0xf] }
 0x1e5   :  { %v1992_v5 = vor.u32 %v1991_v39, %v1988_v50  ;;  %v2005_v27 = vrot.slane %v2003_v15, 5  ;;  %v1451_v58 = vld [vmem:[#allocation2 + $0x24] sm:$0x1]  ;;  %v1505_v8 = vshrl.u32 %v1448_v56, 16  ;;  %3583 = vmatmul.mubr.bf16.gmra.mxu0 %v4574_v38  ;;  %v5174_v36 = vld [vmem:[#allocation3 + $0x1c] ss:$36 sps:$4 sm:$0xff]  }
 0x1e6   :  { %1717 = vst [vmem:[#allocation3 + $0x34] sm:$0xf] %v1503_v52  ;;  %v1736_v3 = vld [vmem:[#allocation2 + $0x18] sm:$0xe]  ;;  %v1737_v0 = vld [vmem:[#allocation2 + $0x1c] sm:$0x1]  ;;  %3720 = vmatprep.mubr.bf16.mxu0 %v5174_v36 }
 0x1e7   :  { %v1993_v41 = vrot.slane %v1992_v5, 4  ;;  %v1997_v12 = vrot.slane %v1995_v11, 5  ;;  %v2006_v7 = vor.u32 %v2005_v27, %v2002_v14  ;;  %v1508_v2 = vshll.u32 %v1448_v56, 16  ;;  %v1738_v22 = vld [vmem:[#allocation2 + $0x20] sm:$0xe] }
 0x1e8   :  { %v1739_v19 = vld [vmem:[#allocation2 + $0x24] sm:$0x1]  ;;  %v2011_v20 = vrot.slane %v2009_v23, 5  ;;  %v1507_v31 = vrot.slane %v1505_v8, 4  ;;  %v1519_v30 = vshrl.u32 %v1450_v37, 16  ;;  %v1522_v29 = vshll.u32 %v1450_v37, 16 }
 0x1e9   :  { %v1933_v17 = vld [vmem:[#allocation2 + $0x30] sm:$0xf]  ;;  %v5168_v33 = vld [vmem:[#allocation3 + $0x1fc] ss:$36 sps:$4 sm:$0xff]   ;;  %v1998_v34 = vsel %vm5491_vm10, %v1993_v41, %v1997_v12  ;;  %v2007_v59 = vrot.slane %v2006_v7, 4  ;;  %v1514_v32 = vshll.u32 %v1449_v54, 16 }
 0x1ea   :  { %v1528_v26 = vshll.u32 %v1451_v58, 16  ;;  %v5178_v63 = vld [vmem:[#allocation3 + $0x1f8] ss:$36 sps:$4 sm:$0xff]   ;;  %2199 = vst [vmem:[#allocation3 + $0x64] sm:$0xf] %v1998_v34  ;;  %v1510_v45 = vrot.slane %v1508_v2, 5  ;;  %3485 = vmatprep.mubr.bf16.mxu1 %v5168_v33 }
 0x1eb   :  { %v1521_v61 = vrot.slane %v1519_v30, 4  ;;  %v1524_v21 = vrot.slane %v1522_v29, 5  ;;  %v1934_v43 = vld [vmem:[#allocation2 + $0x34] sm:$0x1]  ;;  %v2012_v48 = vsel %vm5491_vm10, %v2007_v59, %v2011_v20  ;;  %v4479_v35 = vrot.slane %v1736_v3, 9  ;;  %3486 = vmatmul.mubr.bf16.gmra.mxu1 %v5178_v63 }
 0x1ec   :  { %v1806_v53 = vrot.slane %v1737_v0, 5  ;;  %v1935_v13 = vld [vmem:[#allocation2 + $0x38] sm:$0xf]  ;;  %v1936_v50 = vld [vmem:[#allocation2 + $0x3c] sm:$0x1]  ;;  %v1511_v51 = vor.u32 %v1510_v45, %v1507_v31  ;;  %v4480_v42 = vrot.slane %v1738_v22, 9 }
 0x1ed   :  { %v5172_v11 = vld [vmem:[#allocation3 + $0x18] ss:$36 sps:$4 sm:$0xff]   ;;  %2200 = vst [vmem:[#allocation3 + $0x88] sm:$0xf] %v2012_v48  ;;  %v1525_v56 = vor.u32 %v1524_v21, %v1521_v61  ;;  %v1810_v1 = vrot.slane %v1739_v19, 5  ;;  %v1516_v15 = vrot.slane %v1514_v32, 5 }
 0x1ee   :  { %v1899_v24 = vld [vmem:[#allocation2 + $0x40] sm:$0xf]  ;;  %v5182_v39 = vld [vmem:[#allocation3 + $0x14] ss:$36 sps:$4 sm:$0xff]   ;;  %v1530_v38 = vrot.slane %v1528_v26, 5  ;;  %v1807_v14 = vsel %vm5461_vm7, %v4479_v35, %v1806_v53  ;;  %v2014_v23 = vshrl.u32 %v1933_v17, 16  ;;  %3721 = vmatmul.mubr.bf16.vlgmr.msra.gmra.mxu0 %v5172_v11 }
 0x1ef   :  { %1915 = vst [vmem:[#allocation3 + $0xf0] sm:$0xf] %v1899_v24  ;;  %v1512_v54 = vrot.slane %v1511_v51, 4  ;;  %v1526_v52 = vrot.slane %v1525_v56, 4  ;;  %v1811_v5 = vsel %vm5461_vm7, %v4480_v42, %v1810_v1  ;;  %1878 = vst [vmem:[#allocation3 + $0x5c] sm:$0xf] %v1807_v14  ;;  %3623 = vmatprep.mubr.bf16.mxu1 %v5182_v39 }
 0x1f0   :  { %v2017_v27 = vshll.u32 %v1933_v17, 16  ;;  %v1452_v37 = vld [vmem:[#allocation2 + $0x28] sm:$0xf]  ;;  %1879 = vst [vmem:[#allocation3 + $0x80] sm:$0xf] %v1811_v5  ;;  %v2016_v58 = vrot.slane %v2014_v23, 4 }
 0x1f1   :  { %v2023_v8 = vshll.u32 %v1934_v43, 16  ;;  %v2028_v36 = vshrl.u32 %v1935_v13, 16  ;;  %v2031_v3 = vshll.u32 %v1935_v13, 16  ;;  %v1453_v0 = vld [vmem:[#allocation2 + $0x2c] sm:$0x1]  ;;  %v1517_v41 = vsel %vm5491_vm10, %v1512_v54, %v1516_v15  ;;  %v2386_v20 = vld [vmem:[#allocation3 + $0x60] sm:$0xff] }
 0x1f2   :  { %v1531_v12 = vsel %vm5491_vm10, %v1526_v52, %v1530_v38  ;;  %v2019_v7 = vrot.slane %v2017_v27, 5  ;;  %v2037_v2 = vshll.u32 %v1936_v50, 16  ;;  %v1454_v22 = vld [vmem:[#allocation2 + $0x30] sm:$0xf]  ;;  %v1455_v19 = vld [vmem:[#allocation2 + $0x34] sm:$0x1] }
 0x1f3   :  { %1718 = vst [vmem:[#allocation3 + $0x58] sm:$0xf] %v1517_v41  ;;  %1719 = vst [vmem:[#allocation3 + $0x7c] sm:$0xf] %v1531_v12  ;;  %v2025_v31 = vrot.slane %v2023_v8, 5  ;;  %v2030_v30 = vrot.slane %v2028_v36, 4 }
 0x1f4   :  { %v2033_v29 = vrot.slane %v2031_v3, 5  ;;  %v1533_v17 = vshrl.u32 %v1452_v37, 16  ;;  %v1740_v33 = vld [vmem:[#allocation2 + $0x28] sm:$0xe]  ;;  %v1741_v34 = vld [vmem:[#allocation2 + $0x2c] sm:$0x1]  ;;  %v2020_v32 = vor.u32 %v2019_v7, %v2016_v58 }
 0x1f5   :  { %v5180_v59 = vld [vmem:[#allocation3 + $0x10] ss:$36 sps:$4 sm:$0xff]   ;;  %v2039_v26 = vrot.slane %v2037_v2, 5  ;;  %v1536_v45 = vshll.u32 %v1452_v37, 16  ;;  %v1542_v61 = vshll.u32 %v1453_v0, 16  ;;  %v2391_v21 = vld [vmem:[#allocation3 + $0x84] sm:$0xff] }
 0x1f6   :  { %v5190_v63 = vld [vmem:[#allocation4 + $0x230] sm:$0xff]   ;;  %v5183_v43 = vld [vmem:[#allocation3 + $0x64] ss:$36 sps:$4 sm:$0xff]   ;;  %v2034_v48 = vor.u32 %v2033_v29, %v2030_v30  ;;  %v1535_v35 = vrot.slane %v1533_v17, 4  ;;  %v1547_v53 = vshrl.u32 %v1454_v22, 16  ;;  %v1550_v13 = vshll.u32 %v1454_v22, 16  ;;  %3624 = vmatmul.mubr.bf16.vlgmr.msra.gmra.mxu1 %v5180_v59 }
 0x1f7   :  { %v4524_v50 = vcombine.low %v2386_v20, %v2391_v21  ;;  %v2021_v11 = vrot.slane %v2020_v32, 4  ;;  %v1538_v51 = vrot.slane %v1536_v45, 5  ;;  %v1544_v56 = vrot.slane %v1542_v61, 5  ;;  %v1742_v42 = vld [vmem:[#allocation2 + $0x30] sm:$0xe]  ;;  %v5981_v1 = vld [vmem:[#allocation4 + $0x228] sm:$0xff]   ;;  %3728 = vmatprep.mubr.bf16.mxu0 %v5183_v43  ;;  %4970 = vmatpush3.bf16.msra.mxu1 %v5908_v16 }
 0x1f8   :  { %v2035_v24 = vrot.slane %v2034_v48, 4  ;;  %v1549_v39 = vrot.slane %v1547_v53, 4  ;;  %v1552_v15 = vrot.slane %v1550_v13, 5  ;;  %v1556_v38 = vshll.u32 %v1455_v19, 16  ;;  %v1743_v14 = vld [vmem:[#allocation2 + $0x34] sm:$0x1]  ;;  %4971 = vmatprep.subr.bf16.mxu1 %v5190_v63 }
 0x1f9   :  { %v1939_v23 = vld [vmem:[#allocation2 + $0x48] sm:$0xf]  ;;  %3729 = vmatmul.mubr.bf16.gmra.mxu0 %v4524_v50  ;;  %v2026_v54 = vsel %vm5491_vm10, %v2021_v11, %v2025_v31  ;;  %v1539_v52 = vor.u32 %v1538_v51, %v1535_v35  ;;  %v4481_v5 = vrot.slane %v1740_v33, 9  ;;  %v1814_v27 = vrot.slane %v1741_v34, 5  ;;  %v1937_v37 = vld [vmem:[#allocation2 + $0x40] sm:$0xf] }
 0x1fa   :  { %v1938_v58 = vld [vmem:[#allocation2 + $0x44] sm:$0x1]  ;;  %v2040_v8 = vsel %vm5491_vm10, %v2035_v24, %v2039_v26  ;;  %2201 = vst [vmem:[#allocation3 + $0xac] sm:$0xf] %v2026_v54  ;;  %v1553_v16 = vor.u32 %v1552_v15, %v1549_v39  ;;  %v1558_v36 = vrot.slane %v1556_v38, 5  ;;  %v4482_v3 = vrot.slane %v1742_v42, 9 }
 0x1fb   :  { %v1940_v0 = vld [vmem:[#allocation2 + $0x4c] sm:$0x1]  ;;  %v1456_v41 = vld [vmem:[#allocation2 + $0x38] sm:$0xf]  ;;  %v1901_v12 = vld [vmem:[#allocation2 + $0x60] sm:$0xf]  ;;  %v1815_v22 = vsel %vm5461_vm7, %v4481_v5, %v1814_v27  ;;  %4972 = vmatpush3.bf16.msra.mxu1 %v5190_v63 }
 0x1fc   :  { %v5186_v7 = vld [vmem:[#allocation3 + $0x5c] ss:$36 sps:$4 sm:$0xff]   ;;  %2202 = vst [vmem:[#allocation3 + $0xd0] sm:$0xf] %v2040_v8  ;;  %v1540_v2 = vrot.slane %v1539_v52, 4  ;;  %v1818_v19 = vrot.slane %v1743_v14, 5  ;;  %4973 = vmatprep.subr.bf16.mxu1 %v5981_v1 }
 0x1fd   :  { %1917 = vst [vmem:[#allocation3 + $0x138] sm:$0xf] %v1901_v12  ;;  %v5202_v20 = vld [vmem:[#allocation4 + $0x220] sm:$0xff]   ;;  %v1554_v31 = vrot.slane %v1553_v16, 4  ;;  %1880 = vst [vmem:[#allocation3 + $0xa4] sm:$0xf] %v1815_v22  ;;  %3631 = vmatprep.mubr.bf16.mxu1 %v5186_v7 }
 0x1fe   :  { %v2042_v30 = vshrl.u32 %v1937_v37, 16  ;;  %v2045_v29 = vshll.u32 %v1937_v37, 16  ;;  %v2051_v17 = vshll.u32 %v1938_v58, 16  ;;  %v1458_v33 = vld [vmem:[#allocation2 + $0x40] sm:$0xf]  ;;  %v1545_v59 = vsel %vm5491_vm10, %v1540_v2, %v1544_v56  ;;  %v5208_v38 = vld [vmem:[#allocation4 + $0x218] sm:$0xff]  }
 0x1ff   :  { %v5191_v34 = vld [vmem:[#allocation3 + $0x58] ss:$36 sps:$4 sm:$0xff]   ;;  %v1819_v32 = vsel %vm5461_vm7, %v4482_v3, %v1818_v19  ;;  %v2056_v26 = vshrl.u32 %v1939_v23, 16  ;;  %v2059_v45 = vshll.u32 %v1939_v23, 16  ;;  %v1902_v61 = vld [vmem:[#allocation2 + $0x68] sm:$0xf]  ;;  %v1559_v63 = vsel %vm5491_vm10, %v1554_v31, %v1558_v36  ;;  %4974 = vmatpush3.bf16.msra.mxu1 %v5981_v1 }
 0x200   :  { %1720 = vst [vmem:[#allocation3 + $0xa0] sm:$0xf] %v1545_v59  ;;  %1881 = vst [vmem:[#allocation3 + $0xc8] sm:$0xf] %v1819_v32  ;;  %v2044_v21 = vrot.slane %v2042_v30, 4  ;;  %v2047_v43 = vrot.slane %v2045_v29, 5  ;;  %3632 = vmatmul.mubr.bf16.gmra.mxu1 %v5191_v34  ;;  %4975 = vmatprep.subr.bf16.mxu1 %v5202_v20 }
 0x201   :  { %v1457_v48 = vld [vmem:[#allocation2 + $0x3c] sm:$0x1]  ;;  %1918 = vst [vmem:[#allocation3 + $0x15c] sm:$0xf] %v1902_v61  ;;  %1721 = vst [vmem:[#allocation3 + $0xc4] sm:$0xf] %v1559_v63 }
 0x202   :  { %v2058_v35 = vrot.slane %v2056_v26, 4  ;;  %v2061_v53 = vrot.slane %v2059_v45, 5  ;;  %v2065_v13 = vshll.u32 %v1940_v0, 16  ;;  %v1459_v50 = vld [vmem:[#allocation2 + $0x44] sm:$0x1]  ;;  %v1561_v11 = vshrl.u32 %v1456_v41, 16 }
 0x203   :  { %v1744_v51 = vld [vmem:[#allocation2 + $0x38] sm:$0xe]  ;;  %v2048_v56 = vor.u32 %v2047_v43, %v2044_v21  ;;  %v2053_v42 = vrot.slane %v2051_v17, 5  ;;  %v1564_v24 = vshll.u32 %v1456_v41, 16  ;;  %v1575_v39 = vshrl.u32 %v1458_v33, 16  ;;  %v2396_v14 = vld [vmem:[#allocation3 + $0xa8] sm:$0xff]  ;;  %4976 = vmatpush3.bf16.msra.mxu1 %v5202_v20 }
 0x204   :  { %v1745_v15 = vld [vmem:[#allocation2 + $0x3c] sm:$0x1]  ;;  %v2062_v23 = vor.u32 %v2061_v53, %v2058_v35  ;;  %v2067_v54 = vrot.slane %v2065_v13, 5  ;;  %v1563_v52 = vrot.slane %v1561_v11, 4  ;;  %v1578_v5 = vshll.u32 %v1458_v33, 16  ;;  %v2401_v37 = vld [vmem:[#allocation3 + $0xcc] sm:$0xff]  ;;  %4977 = vmatprep.subr.bf16.mxu1 %v5208_v38 }
 0x205   :  { %v1746_v27 = vld [vmem:[#allocation2 + $0x40] sm:$0xe]  ;;  %v5188_v58 = vld [vmem:[#allocation3 + $0xac] ss:$36 sps:$4 sm:$0xff]   ;;  %v2049_v8 = vrot.slane %v2048_v56, 4  ;;  %v1566_v16 = vrot.slane %v1564_v24, 5  ;;  %v4533_v0 = vcombine.low %v2396_v14, %v2401_v37 }
 0x206   :  { %v1570_v36 = vshll.u32 %v1457_v48, 16  ;;  %v1747_v3 = vld [vmem:[#allocation2 + $0x44] sm:$0x1]  ;;  %v2063_v12 = vrot.slane %v2062_v23, 4  ;;  %v1577_v1 = vrot.slane %v1575_v39, 4  ;;  %v1580_v41 = vrot.slane %v1578_v5, 5  ;;  %3736 = vmatprep.mubr.bf16.mxu0 %v5188_v58 }
 0x207   :  { %v1941_v7 = vld [vmem:[#allocation2 + $0x60] sm:$0xf]  ;;  %v2054_v2 = vsel %vm5491_vm10, %v2049_v8, %v2053_v42  ;;  %v1567_v22 = vor.u32 %v1566_v16, %v1563_v52  ;;  %v1584_v19 = vshll.u32 %v1459_v50, 16  ;;  %v4483_v31 = vrot.slane %v1744_v51, 9  ;;  %v1942_v30 = vld [vmem:[#allocation2 + $0x64] sm:$0x1]  ;;  %3737 = vmatmul.mubr.bf16.gmra.mxu0 %v4533_v0  ;;  %4978 = vmatpush3.bf16.msra.mxu1 %v5208_v38 }
 0x208   :  { %v1943_v29 = vld [vmem:[#allocation2 + $0x68] sm:$0xf]  ;;  %v2068_v17 = vsel %vm5491_vm10, %v2063_v12, %v2067_v54  ;;  %2203 = vst [vmem:[#allocation3 + $0xf4] sm:$0xf] %v2054_v2  ;;  %v1581_v33 = vor.u32 %v1580_v41, %v1577_v1  ;;  %v1822_v34 = vrot.slane %v1745_v15, 5  ;;  %v4484_v59 = vrot.slane %v1746_v27, 9 }
 0x209   :  { %v1944_v32 = vld [vmem:[#allocation2 + $0x6c] sm:$0x1]  ;;  %v5214_v26 = vld [vmem:[#allocation4 + $0x210] sm:$0xff]   ;;  %v5192_v45 = vld [vmem:[#allocation3 + $0xa4] ss:$36 sps:$4 sm:$0xff]   ;;  %v1568_v61 = vrot.slane %v1567_v22, 4 }
 0x20a   :  { %2204 = vst [vmem:[#allocation3 + $0x118] sm:$0xf] %v2068_v17  ;;  %v1572_v63 = vrot.slane %v1570_v36, 5  ;;  %v1460_v21 = vld [vmem:[#allocation2 + $0x58] sm:$0xf]  ;;  %v1582_v48 = vrot.slane %v1581_v33, 4  ;;  %v1823_v20 = vsel %vm5461_vm7, %v4483_v31, %v1822_v34  ;;  %3639 = vmatprep.mubr.bf16.mxu1 %v5192_v45  ;;  %4979 = vmatprep.subr.bf16.mxu1 %v5214_v26 }
 0x20b   :  { %v5197_v43 = vld [vmem:[#allocation3 + $0xa0] ss:$36 sps:$4 sm:$0xff]   ;;  %v1586_v35 = vrot.slane %v1584_v19, 5  ;;  %v1826_v53 = vrot.slane %v1747_v3, 5  ;;  %1882 = vst [vmem:[#allocation3 + $0xec] sm:$0xf] %v1823_v20  ;;  %4980 = vmatpush3.bf16.msra.mxu1 %v5214_v26 }
 0x20c   :  { %v1573_v13 = vsel %vm5491_vm10, %v1568_v61, %v1572_v63  ;;  %v2070_v50 = vshrl.u32 %v1941_v7, 16  ;;  %v2073_v11 = vshll.u32 %v1941_v7, 16  ;;  %v2079_v51 = vshll.u32 %v1942_v30, 16  ;;  %v1461_v56 = vld [vmem:[#allocation2 + $0x5c] sm:$0x1]  ;;  %v5220_v42 = vld [vmem:[#allocation4 + $0x208] sm:$0xff]   ;;  %3640 = vmatmul.mubr.bf16.gmra.mxu1 %v5197_v43 }
 0x20d   :  { %v1587_v24 = vsel %vm5491_vm10, %v1582_v48, %v1586_v35  ;;  %1722 = vst [vmem:[#allocation3 + $0xe8] sm:$0xf] %v1573_v13  ;;  %v1827_v39 = vsel %vm5461_vm7, %v4484_v59, %v1826_v53  ;;  %v2084_v15 = vshrl.u32 %v1943_v29, 16  ;;  %v2087_v14 = vshll.u32 %v1943_v29, 16  ;;  %v1462_v23 = vld [vmem:[#allocation2 + $0x60] sm:$0xf]  ;;  %4981 = vmatprep.subr.bf16.mxu1 %v5220_v42 }
 0x20e   :  { %v1903_v54 = vld [vmem:[#allocation2 + $0x70] sm:$0xf]  ;;  %1723 = vst [vmem:[#allocation3 + $0x10c] sm:$0xf] %v1587_v24  ;;  %1883 = vst [vmem:[#allocation3 + $0x110] sm:$0xf] %v1827_v39 }
 0x20f   :  { %v2072_v52 = vrot.slane %v2070_v50, 4  ;;  %v2075_v5 = vrot.slane %v2073_v11, 5  ;;  %v2081_v27 = vrot.slane %v2079_v51, 5  ;;  %v2093_v38 = vshll.u32 %v1944_v32, 16  ;;  %v1463_v37 = vld [vmem:[#allocation2 + $0x64] sm:$0x1]  ;;  %4982 = vmatpush3.bf16.msra.mxu1 %v5220_v42 }
 0x210   :  { %v1904_v58 = vld [vmem:[#allocation2 + $0x78] sm:$0xf]  ;;  %1919 = vst [vmem:[#allocation3 + $0x180] sm:$0xf] %v1903_v54  ;;  %v2086_v8 = vrot.slane %v2084_v15, 4  ;;  %v2089_v16 = vrot.slane %v2087_v14, 5 }
 0x211   :  { %v1589_v36 = vshrl.u32 %v1460_v21, 16  ;;  %v1592_v3 = vshll.u32 %v1460_v21, 16  ;;  %v1748_v0 = vld [vmem:[#allocation2 + $0x58] sm:$0xe]  ;;  %v1749_v12 = vld [vmem:[#allocation2 + $0x5c] sm:$0x1]  ;;  %v2076_v7 = vor.u32 %v2075_v5, %v2072_v52 }
 0x212   :  { %1920 = vst [vmem:[#allocation3 + $0x1a4] sm:$0xf] %v1904_v58  ;;  %v6010_v1 = vld [vmem:[#allocation4 + $0x200] sm:$0xff]   ;;  %v2406_v41 = vld [vmem:[#allocation3 + $0xf0] sm:$0xff]  ;;  %v2095_v2 = vrot.slane %v2093_v38, 5  ;;  %v1598_v22 = vshll.u32 %v1461_v56, 16  ;;  %v2090_v17 = vor.u32 %v2089_v16, %v2086_v8 }
 0x213   :  { %v1603_v19 = vshrl.u32 %v1462_v23, 16  ;;  %v1750_v31 = vld [vmem:[#allocation2 + $0x60] sm:$0xe]  ;;  %v2411_v30 = vld [vmem:[#allocation3 + $0x114] sm:$0xff]  ;;  %v1591_v33 = vrot.slane %v1589_v36, 4  ;;  %v1594_v34 = vrot.slane %v1592_v3, 5  ;;  %4983 = vmatprep.subr.bf16.mxu1 %v6010_v1 }
 0x214   :  { %v5194_v29 = vld [vmem:[#allocation3 + $0xf4] ss:$36 sps:$4 sm:$0xff]   ;;  %v1606_v59 = vshll.u32 %v1462_v23, 16  ;;  %v1751_v32 = vld [vmem:[#allocation2 + $0x64] sm:$0x1]  ;;  %v4542_v61 = vcombine.low %v2406_v41, %v2411_v30  ;;  %v2077_v63 = vrot.slane %v2076_v7, 4  ;;  %4984 = vmatpush3.bf16.msra.mxu1 %v6010_v1 }
 0x215   :  { %v1945_v45 = vld [vmem:[#allocation2 + $0x70] sm:$0xf]  ;;  %v1600_v21 = vrot.slane %v1598_v22, 5  ;;  %v1605_v43 = vrot.slane %v1603_v19, 4  ;;  %v1946_v48 = vld [vmem:[#allocation2 + $0x74] sm:$0x1]  ;;  %3744 = vmatprep.mubr.bf16.mxu0 %v5194_v29  ;;  %v1595_v20 = vor.u32 %v1594_v34, %v1591_v33 }
 0x216   :  { %v2091_v35 = vrot.slane %v2090_v17, 4  ;;  %v1608_v53 = vrot.slane %v1606_v59, 5  ;;  %v1612_v13 = vshll.u32 %v1463_v37, 16  ;;  %v1947_v26 = vld [vmem:[#allocation2 + $0x78] sm:$0xf]  ;;  %3745 = vmatmul.mubr.bf16.gmra.mxu0 %v4542_v61  ;;  %v2082_v50 = vsel %vm5491_vm10, %v2077_v63, %v2081_v27 }
 0x217   :  { %v4485_v11 = vrot.slane %v1748_v0, 9  ;;  %v1830_v51 = vrot.slane %v1749_v12, 5  ;;  %v4486_v56 = vrot.slane %v1750_v31, 9  ;;  %v1948_v24 = vld [vmem:[#allocation2 + $0x7c] sm:$0x1]  ;;  %v1596_v14 = vrot.slane %v1595_v20, 4 }
 0x218   :  { %v5198_v39 = vld [vmem:[#allocation3 + $0xec] ss:$36 sps:$4 sm:$0xff]   ;;  %v2096_v15 = vsel %vm5491_vm10, %v2091_v35, %v2095_v2  ;;  %2205 = vst [vmem:[#allocation3 + $0x13c] sm:$0xf] %v2082_v50  ;;  %v1609_v23 = vor.u32 %v1608_v53, %v1605_v43  ;;  %v1464_v54 = vld [vmem:[#allocation2 + $0x68] sm:$0xf] }
 0x219   :  { %2206 = vst [vmem:[#allocation3 + $0x160] sm:$0xf] %v2096_v15  ;;  %v5203_v52 = vld [vmem:[#allocation3 + $0xe8] ss:$36 sps:$4 sm:$0xff]   ;;  %v1614_v5 = vrot.slane %v1612_v13, 5  ;;  %v1831_v27 = vsel %vm5461_vm7, %v4485_v11, %v1830_v51  ;;  %v1834_v38 = vrot.slane %v1751_v32, 5  ;;  %3647 = vmatprep.mubr.bf16.mxu1 %v5198_v39  ;;  %v1601_v42 = vsel %vm5491_vm10, %v1596_v14, %v1600_v21 }
 0x21a   :  { %v2098_v37 = vshrl.u32 %v1945_v45, 16  ;;  %v1610_v58 = vrot.slane %v1609_v23, 4  ;;  %1884 = vst [vmem:[#allocation3 + $0x134] sm:$0xf] %v1831_v27  ;;  %v2101_v8 = vshll.u32 %v1945_v45, 16  ;;  %v2107_v16 = vshll.u32 %v1946_v48, 16  ;;  %3648 = vmatmul.mubr.bf16.gmra.mxu1 %v5203_v52 }
 0x21b   :  { %v1465_v36 = vld [vmem:[#allocation2 + $0x6c] sm:$0x1]  ;;  %1724 = vst [vmem:[#allocation3 + $0x130] sm:$0xf] %v1601_v42  ;;  %v1835_v3 = vsel %vm5461_vm7, %v4486_v56, %v1834_v38  ;;  %v2112_v12 = vshrl.u32 %v1947_v26, 16  ;;  %v2115_v41 = vshll.u32 %v1947_v26, 16 }
 0x21c   :  { %v2100_v0 = vrot.slane %v2098_v37, 4  ;;  %v1466_v7 = vld [vmem:[#allocation2 + $0x70] sm:$0xf]  ;;  %v1615_v2 = vsel %vm5491_vm10, %v1610_v58, %v1614_v5  ;;  %1885 = vst [vmem:[#allocation3 + $0x158] sm:$0xf] %v1835_v3  ;;  %v2103_v22 = vrot.slane %v2101_v8, 5 }
 0x21d   :  { %v2109_v19 = vrot.slane %v2107_v16, 5  ;;  %v2121_v31 = vshll.u32 %v1948_v24, 16  ;;  %1725 = vst [vmem:[#allocation3 + $0x154] sm:$0xf] %v1615_v2  ;;  %v2114_v30 = vrot.slane %v2112_v12, 4  ;;  %v2117_v29 = vrot.slane %v2115_v41, 5 }
 0x21e   :  { %v1467_v17 = vld [vmem:[#allocation2 + $0x74] sm:$0x1]  ;;  %v1617_v33 = vshrl.u32 %v1464_v54, 16  ;;  %v1620_v34 = vshll.u32 %v1464_v54, 16  ;;  %v1752_v59 = vld [vmem:[#allocation2 + $0x68] sm:$0xe]  ;;  %v2104_v32 = vor.u32 %v2103_v22, %v2100_v0 }
 0x21f   :  { %v2123_v45 = vrot.slane %v2121_v31, 5  ;;  %v1626_v61 = vshll.u32 %v1465_v36, 16  ;;  %v1631_v63 = vshrl.u32 %v1466_v7, 16  ;;  %v1753_v21 = vld [vmem:[#allocation2 + $0x6c] sm:$0x1]  ;;  %v2416_v43 = vld [vmem:[#allocation3 + $0x138] sm:$0xff]  ;;  %v2118_v48 = vor.u32 %v2117_v29, %v2114_v30 }
 0x220   :  { %v1619_v35 = vrot.slane %v1617_v33, 4  ;;  %v1622_v20 = vrot.slane %v1620_v34, 5  ;;  %v1634_v53 = vshll.u32 %v1466_v7, 16  ;;  %v1754_v13 = vld [vmem:[#allocation2 + $0x70] sm:$0xe]  ;;  %v2421_v26 = vld [vmem:[#allocation3 + $0x15c] sm:$0xff] }
 0x221   :  { %v5200_v1 = vld [vmem:[#allocation3 + $0x13c] ss:$36 sps:$4 sm:$0xff]   ;;  %v2105_v50 = vrot.slane %v2104_v32, 4  ;;  %v1628_v11 = vrot.slane %v1626_v61, 5  ;;  %v1633_v51 = vrot.slane %v1631_v63, 4  ;;  %v4551_v24 = vcombine.low %v2416_v43, %v2421_v26 }
 0x222   :  { %v1755_v56 = vld [vmem:[#allocation2 + $0x74] sm:$0x1]  ;;  %v2119_v39 = vrot.slane %v2118_v48, 4  ;;  %v1623_v15 = vor.u32 %v1622_v20, %v1619_v35  ;;  %v1636_v14 = vrot.slane %v1634_v53, 5  ;;  %v1905_v23 = vld [vmem:[#allocation2 + $0x80] sm:$0xf]  ;;  %3752 = vmatprep.mubr.bf16.mxu0 %v5200_v1 }
 0x223   :  { %v1906_v54 = vld [vmem:[#allocation2 + $0x88] sm:$0xf]  ;;  %v2110_v52 = vsel %vm5491_vm10, %v2105_v50, %v2109_v19  ;;  %v1640_v5 = vshll.u32 %v1467_v17, 16  ;;  %v4487_v27 = vrot.slane %v1752_v59, 9  ;;  %v1838_v38 = vrot.slane %v1753_v21, 5  ;;  %3753 = vmatmul.mubr.bf16.gmra.mxu0 %v4551_v24 }
 0x224   :  { %1921 = vst [vmem:[#allocation3 + $0x1c8] sm:$0xf] %v1905_v23  ;;  %1922 = vst [vmem:[#allocation3 + $0x1ec] sm:$0xf] %v1906_v54  ;;  %v1949_v37 = vld [vmem:[#allocation2 + $0x80] sm:$0xf]  ;;  %v2124_v42 = vsel %vm5491_vm10, %v2119_v39, %v2123_v45  ;;  %v1637_v8 = vor.u32 %v1636_v14, %v1633_v51 }
 0x225   :  { %2207 = vst [vmem:[#allocation3 + $0x184] sm:$0xf] %v2110_v52  ;;  %v1624_v58 = vrot.slane %v1623_v15, 4  ;;  %v4488_v16 = vrot.slane %v1754_v13, 9  ;;  %v1950_v36 = vld [vmem:[#allocation2 + $0x84] sm:$0x1]  ;;  %v1839_v7 = vsel %vm5461_vm7, %v4487_v27, %v1838_v38 }
 0x226   :  { %v1951_v3 = vld [vmem:[#allocation2 + $0x88] sm:$0xf]  ;;  %v5204_v0 = vld [vmem:[#allocation3 + $0x134] ss:$36 sps:$4 sm:$0xff]   ;;  %2208 = vst [vmem:[#allocation3 + $0x1a8] sm:$0xf] %v2124_v42 }
 0x227   :  { %v5209_v12 = vld [vmem:[#allocation3 + $0x130] ss:$36 sps:$4 sm:$0xff]   ;;  %v1642_v41 = vrot.slane %v1640_v5, 5  ;;  %v1629_v2 = vsel %vm5491_vm10, %v1624_v58, %v1628_v11  ;;  %v1638_v22 = vrot.slane %v1637_v8, 4  ;;  %v1842_v19 = vrot.slane %v1755_v56, 5  ;;  %3655 = vmatprep.mubr.bf16.mxu1 %v5204_v0 }
 0x228   :  { %1886 = vst [vmem:[#allocation3 + $0x17c] sm:$0xf] %v1839_v7  ;;  %v1952_v31 = vld [vmem:[#allocation2 + $0x8c] sm:$0x1]  ;;  %v2126_v30 = vshrl.u32 %v1949_v37, 16  ;;  %v2129_v29 = vshll.u32 %v1949_v37, 16  ;;  %3656 = vmatmul.mubr.bf16.gmra.mxu1 %v5209_v12 }
 0x229   :  { %1726 = vst [vmem:[#allocation3 + $0x178] sm:$0xf] %v1629_v2  ;;  %v2135_v17 = vshll.u32 %v1950_v36, 16  ;;  %v2140_v33 = vshrl.u32 %v1951_v3, 16  ;;  %v2143_v34 = vshll.u32 %v1951_v3, 16  ;;  %v1643_v32 = vsel %vm5491_vm10, %v1638_v22, %v1642_v41 }
 0x22a   :  { %v1468_v59 = vld [vmem:[#allocation2 + $0x78] sm:$0xf]  ;;  %v1843_v45 = vsel %vm5461_vm7, %v4488_v16, %v1842_v19  ;;  %v2128_v61 = vrot.slane %v2126_v30, 4  ;;  %v2149_v63 = vshll.u32 %v1952_v31, 16  ;;  %v1469_v21 = vld [vmem:[#allocation2 + $0x7c] sm:$0x1] }
 0x22b   :  { %v1470_v43 = vld [vmem:[#allocation2 + $0x80] sm:$0xf]  ;;  %1727 = vst [vmem:[#allocation3 + $0x19c] sm:$0xf] %v1643_v32  ;;  %1887 = vst [vmem:[#allocation3 + $0x1a0] sm:$0xf] %v1843_v45 }
 0x22c   :  { %v2131_v48 = vrot.slane %v2129_v29, 5  ;;  %v2137_v35 = vrot.slane %v2135_v17, 5  ;;  %v2142_v20 = vrot.slane %v2140_v33, 4  ;;  %v2145_v53 = vrot.slane %v2143_v34, 5  ;;  %v1471_v13 = vld [vmem:[#allocation2 + $0x84] sm:$0x1] }
 0x22d   :  { %v2151_v26 = vrot.slane %v2149_v63, 5  ;;  %v1645_v1 = vshrl.u32 %v1468_v59, 16  ;;  %v1648_v50 = vshll.u32 %v1468_v59, 16  ;;  %v1654_v11 = vshll.u32 %v1469_v21, 16  ;;  %v1756_v51 = vld [vmem:[#allocation2 + $0x78] sm:$0xe] }
 0x22e   :  { %v2426_v56 = vld [vmem:[#allocation3 + $0x180] sm:$0xff]  ;;  %v2132_v24 = vor.u32 %v2131_v48, %v2128_v61  ;;  %v2146_v39 = vor.u32 %v2145_v53, %v2142_v20  ;;  %v1659_v15 = vshrl.u32 %v1470_v43, 16  ;;  %v1662_v14 = vshll.u32 %v1470_v43, 16  ;;  %v1757_v23 = vld [vmem:[#allocation2 + $0x7c] sm:$0x1] }
 0x22f   :  { %v2431_v54 = vld [vmem:[#allocation3 + $0x1a4] sm:$0xff]  ;;  %v1647_v5 = vrot.slane %v1645_v1, 4  ;;  %v1650_v27 = vrot.slane %v1648_v50, 5  ;;  %v1656_v38 = vrot.slane %v1654_v11, 5  ;;  %v1758_v16 = vld [vmem:[#allocation2 + $0x80] sm:$0xe] }
 0x230   :  { %v5206_v52 = vld [vmem:[#allocation3 + $0x184] ss:$36 sps:$4 sm:$0xff]   ;;  %v4560_v37 = vcombine.low %v2426_v56, %v2431_v54  ;;  %v2133_v42 = vrot.slane %v2132_v24, 4  ;;  %v2147_v58 = vrot.slane %v2146_v39, 4  ;;  %v1661_v8 = vrot.slane %v1659_v15, 4 }
 0x231   :  { %3760 = vmatprep.mubr.bf16.mxu0 %v5206_v52  ;;  %v1651_v36 = vor.u32 %v1650_v27, %v1647_v5  ;;  %v1664_v3 = vrot.slane %v1662_v14, 5  ;;  %v1668_v0 = vshll.u32 %v1471_v13, 16  ;;  %v1759_v12 = vld [vmem:[#allocation2 + $0x84] sm:$0x1]  ;;  %v4489_v41 = vrot.slane %v1756_v51, 9 }
 0x232   :  { %3761 = vmatmul.mubr.bf16.gmra.mxu0 %v4560_v37  ;;  %v2138_v7 = vsel %vm5491_vm10, %v2133_v42, %v2137_v35  ;;  %v2152_v2 = vsel %vm5491_vm10, %v2147_v58, %v2151_v26  ;;  %v1846_v22 = vrot.slane %v1757_v23, 5  ;;  %v4490_v19 = vrot.slane %v1758_v16, 9  ;;  %v1907_v31 = vld [vmem:[#allocation2 + $0x90] sm:$0xf]  ;;  %v1908_v30 = vld [vmem:[#allocation2 + $0x98] sm:$0xf] }
 0x233   :  { %v5210_v29 = vld [vmem:[#allocation3 + $0x17c] ss:$36 sps:$4 sm:$0xff]   ;;  %2209 = vst [vmem:[#allocation3 + $0x1cc] sm:$0xf] %v2138_v7  ;;  %2210 = vst [vmem:[#allocation3 + $0x1f0] sm:$0xf] %v2152_v2  ;;  %v1665_v34 = vor.u32 %v1664_v3, %v1661_v8 }
 0x234   :  { %v5215_v17 = vld [vmem:[#allocation3 + $0x178] ss:$36 sps:$4 sm:$0xff]   ;;  %v1652_v33 = vrot.slane %v1651_v36, 4  ;;  %1923 = vst [vmem:[#allocation3 + $0x210] sm:$0xf] %v1907_v31  ;;  %v1670_v59 = vrot.slane %v1668_v0, 5  ;;  %v1847_v32 = vsel %vm5461_vm7, %v4489_v41, %v1846_v22  ;;  %3663 = vmatprep.mubr.bf16.mxu1 %v5210_v29 }
 0x235   :  { %1924 = vst [vmem:[#allocation3 + $0x234] sm:$0xf] %v1908_v30  ;;  %v1850_v45 = vrot.slane %v1759_v12, 5  ;;  %v1953_v61 = vld [vmem:[#allocation2 + $0x90] sm:$0xf]  ;;  %v1666_v43 = vrot.slane %v1665_v34, 4  ;;  %3664 = vmatmul.mubr.bf16.gmra.mxu1 %v5215_v17 }
 0x236   :  { %v1954_v63 = vld [vmem:[#allocation2 + $0x94] sm:$0x1]  ;;  %v1657_v21 = vsel %vm5491_vm10, %v1652_v33, %v1656_v38  ;;  %1888 = vst [vmem:[#allocation3 + $0x1c4] sm:$0xf] %v1847_v32  ;;  %v1955_v48 = vld [vmem:[#allocation2 + $0x98] sm:$0xf] }
 0x237   :  { %v1956_v35 = vld [vmem:[#allocation2 + $0x9c] sm:$0x1]  ;;  %v2154_v20 = vshrl.u32 %v1953_v61, 16  ;;  %1728 = vst [vmem:[#allocation3 + $0x1c0] sm:$0xf] %v1657_v21  ;;  %v1851_v53 = vsel %vm5461_vm7, %v4490_v19, %v1850_v45  ;;  %v2157_v13 = vshll.u32 %v1953_v61, 16  ;;  %v1671_v11 = vsel %vm5491_vm10, %v1666_v43, %v1670_v59 }
 0x238   :  { %v2163_v26 = vshll.u32 %v1954_v63, 16  ;;  %v2168_v1 = vshrl.u32 %v1955_v48, 16  ;;  %v1472_v50 = vld [vmem:[#allocation2 + $0x88] sm:$0xf]  ;;  %1889 = vst [vmem:[#allocation3 + $0x1e8] sm:$0xf] %v1851_v53 }
 0x239   :  { %v2156_v51 = vrot.slane %v2154_v20, 4  ;;  %v2171_v56 = vshll.u32 %v1955_v48, 16  ;;  %v2177_v24 = vshll.u32 %v1956_v35, 16  ;;  %v1473_v39 = vld [vmem:[#allocation2 + $0x8c] sm:$0x1]  ;;  %v2159_v15 = vrot.slane %v2157_v13, 5 }
 0x23a   :  { %1729 = vst [vmem:[#allocation3 + $0x1e4] sm:$0xf] %v1671_v11  ;;  %v2165_v14 = vrot.slane %v2163_v26, 5  ;;  %v2170_v23 = vrot.slane %v2168_v1, 4  ;;  %v1474_v54 = vld [vmem:[#allocation2 + $0x90] sm:$0xf] }
 0x23b   :  { %v1673_v52 = vshrl.u32 %v1472_v50, 16  ;;  %v2173_v5 = vrot.slane %v2171_v56, 5  ;;  %v2179_v27 = vrot.slane %v2177_v24, 5  ;;  %v1475_v38 = vld [vmem:[#allocation2 + $0x94] sm:$0x1]  ;;  %v1676_v37 = vshll.u32 %v1472_v50, 16 }
 0x23c   :  { %v1682_v42 = vshll.u32 %v1473_v39, 16  ;;  %v2436_v58 = vld [vmem:[#allocation3 + $0x1c8] sm:$0xff]  ;;  %v2160_v36 = vor.u32 %v2159_v15, %v2156_v51  ;;  %v1687_v0 = vshrl.u32 %v1474_v54, 16  ;;  %v1690_v29 = vshll.u32 %v1474_v54, 16  ;;  %v1762_v33 = vld [vmem:[#allocation2 + $0x90] sm:$0xe] }
 0x23d   :  { %v2441_v8 = vld [vmem:[#allocation3 + $0x1ec] sm:$0xff]  ;;  %v1675_v3 = vrot.slane %v1673_v52, 4  ;;  %v2174_v41 = vor.u32 %v2173_v5, %v2170_v23  ;;  %v1678_v7 = vrot.slane %v1676_v37, 5  ;;  %v1760_v22 = vld [vmem:[#allocation2 + $0x88] sm:$0xe]  ;;  %v1696_v17 = vshll.u32 %v1475_v38, 16 }
 0x23e   :  { %v5212_v16 = vld [vmem:[#allocation3 + $0x1cc] ss:$36 sps:$4 sm:$0xff]   ;;  %v4569_v12 = vcombine.low %v2436_v58, %v2441_v8  ;;  %v1684_v2 = vrot.slane %v1682_v42, 5  ;;  %v2161_v31 = vrot.slane %v2160_v36, 4  ;;  %v1689_v30 = vrot.slane %v1687_v0, 4 }
 0x23f   :  { %v1761_v19 = vld [vmem:[#allocation2 + $0x8c] sm:$0x1]  ;;  %3768 = vmatprep.mubr.bf16.mxu0 %v5212_v16  ;;  %v2175_v34 = vrot.slane %v2174_v41, 4  ;;  %v1679_v59 = vor.u32 %v1678_v7, %v1675_v3  ;;  %v1763_v32 = vld [vmem:[#allocation2 + $0x94] sm:$0x1]  ;;  %v4491_v45 = vrot.slane %v1760_v22, 9 }
 0x240   :  { %3769 = vmatmul.mubr.bf16.gmra.mxu0 %v4569_v12  ;;  %v1854_v61 = vrot.slane %v1761_v19, 5  ;;  %v2166_v63 = vsel %vm5491_vm10, %v2161_v31, %v2165_v14  ;;  %v1692_v21 = vrot.slane %v1690_v29, 5  ;;  %v1698_v43 = vrot.slane %v1696_v17, 5  ;;  %v2213_v35 = vld [vmem:[#allocation2 + $0x10] sm:$0xe] }
 0x241   :  { %v4492_v48 = vrot.slane %v1762_v33, 9  ;;  %v5216_v20 = vld [vmem:[#allocation3 + $0x1c4] ss:$36 sps:$4 sm:$0xff]   ;;  %v2180_v53 = vsel %vm5491_vm10, %v2175_v34, %v2179_v27  ;;  %2211 = vst [vmem:[#allocation3 + $0x214] sm:$0xf] %v2166_v63  ;;  %v1680_v26 = vrot.slane %v1679_v59, 4 }
 0x242   :  { %v5221_v13 = vld [vmem:[#allocation3 + $0x1c0] ss:$36 sps:$4 sm:$0xff]   ;;  %v1855_v1 = vsel %vm5461_vm7, %v4491_v45, %v1854_v61  ;;  %2212 = vst [vmem:[#allocation3 + $0x238] sm:$0xf] %v2180_v53  ;;  %v1693_v50 = vor.u32 %v1692_v21, %v1689_v30  ;;  %v1858_v11 = vrot.slane %v1763_v32, 5  ;;  %v4493_v24 = vrot.slane %v2213_v35, 9  ;;  %3671 = vmatprep.mubr.bf16.mxu1 %v5216_v20 }
 0x243   :  { %1890 = vst [vmem:[#allocation3 + $0x20c] sm:$0xf] %v1855_v1  ;;  %v2214_v51 = vld [vmem:[#allocation2 + $0x14] sm:$0x1]  ;;  %v2215_v56 = vld [vmem:[#allocation2 + $0x18] sm:$0xe]  ;;  %v1685_v39 = vsel %vm5491_vm10, %v1680_v26, %v1684_v2  ;;  %3672 = vmatmul.mubr.bf16.gmra.mxu1 %v5221_v13 }
 0x244   :  { %v2216_v15 = vld [vmem:[#allocation2 + $0x1c] sm:$0x1]  ;;  %v2279_v14 = vrot.slane %v2214_v51, 5  ;;  %v4494_v23 = vrot.slane %v2215_v56, 9  ;;  %v2217_v54 = vld [vmem:[#allocation2 + $0x20] sm:$0xe]  ;;  %v1859_v5 = vsel %vm5461_vm7, %v4492_v48, %v1858_v11 }
 0x245   :  { %v1694_v52 = vrot.slane %v1693_v50, 4  ;;  %1730 = vst [vmem:[#allocation3 + $0x208] sm:$0xf] %v1685_v39  ;;  %v2283_v27 = vrot.slane %v2216_v15, 5  ;;  %v2218_v38 = vld [vmem:[#allocation2 + $0x24] sm:$0x1] }
 0x246   :  { %v2219_v37 = vld [vmem:[#allocation2 + $0x28] sm:$0xe]  ;;  %1891 = vst [vmem:[#allocation3 + $0x230] sm:$0xf] %v1859_v5  ;;  %v2280_v42 = vsel %vm5461_vm7, %v4493_v24, %v2279_v14  ;;  %v2220_v58 = vld [vmem:[#allocation2 + $0x2c] sm:$0x1] }
 0x247   :  { %v4495_v8 = vrot.slane %v2217_v54, 9  ;;  %v2287_v16 = vrot.slane %v2218_v38, 5  ;;  %v4496_v36 = vrot.slane %v2219_v37, 9  ;;  %v1699_v3 = vsel %vm5491_vm10, %v1694_v52, %v1698_v43  ;;  %2357 = vst [vmem:[#allocation3 + $0x20] sm:$0xf] %v2280_v42 }
 0x248   :  { %v2284_v0 = vsel %vm5461_vm7, %v4494_v23, %v2283_v27  ;;  %v2291_v12 = vrot.slane %v2220_v58, 5  ;;  %v2221_v41 = vld [vmem:[#allocation2 + $0x30] sm:$0xe]  ;;  %v2222_v7 = vld [vmem:[#allocation2 + $0x34] sm:$0x1] }
 0x249   :  { %1731 = vst [vmem:[#allocation3 + $0x22c] sm:$0xf] %v1699_v3  ;;  %2358 = vst [vmem:[#allocation3 + $0x44] sm:$0xf] %v2284_v0  ;;  %v2288_v2 = vsel %vm5461_vm7, %v4495_v8, %v2287_v16  ;;  %v2223_v22 = vld [vmem:[#allocation2 + $0x38] sm:$0xe] }
 0x24a   :  { %v2224_v19 = vld [vmem:[#allocation2 + $0x3c] sm:$0x1]  ;;  %v4497_v31 = vrot.slane %v2221_v41, 9  ;;  %v2295_v30 = vrot.slane %v2222_v7, 5  ;;  %v2446_v29 = vld [vmem:[#allocation3 + $0x210] sm:$0xff]  ;;  %v2292_v47 = vsel %vm5461_vm7, %v4496_v36, %v2291_v12  ;;  %v4498_v17 = vrot.slane %v2223_v22, 9 }
 0x24b   :  { %2359 = vst [vmem:[#allocation3 + $0x68] sm:$0xf] %v2288_v2  ;;  %v2299_v33 = vrot.slane %v2224_v19, 5  ;;  %v2225_v34 = vld [vmem:[#allocation2 + $0x40] sm:$0xe]  ;;  %v2451_v59 = vld [vmem:[#allocation3 + $0x234] sm:$0xff] }
 0x24c   :  { %v5218_v32 = vld [vmem:[#allocation3 + $0x214] ss:$36 sps:$4 sm:$0xff]   ;;  %2360 = vst [vmem:[#allocation3 + $0x8c] sm:$0xf] %v2292_v47  ;;  %v2296_v45 = vsel %vm5461_vm7, %v4497_v31, %v2295_v30  ;;  %v2226_v61 = vld [vmem:[#allocation2 + $0x44] sm:$0x1]  ;;  %v4578_v21 = vcombine.low %v2446_v29, %v2451_v59 }
 0x24d   :  { %v4499_v63 = vrot.slane %v2225_v34, 9  ;;  %v2300_v43 = vsel %vm5461_vm7, %v4498_v17, %v2299_v33  ;;  %2361 = vst [vmem:[#allocation3 + $0xb0] sm:$0xf] %v2296_v45  ;;  %v2227_v48 = vld [vmem:[#allocation2 + $0x48] sm:$0xe]  ;;  %v2303_v20 = vrot.slane %v2226_v61, 5  ;;  %3776 = vmatprep.mubr.bf16.mxu0 %v5218_v32 }
 0x24e   :  { %v2228_v35 = vld [vmem:[#allocation2 + $0x4c] sm:$0x1]  ;;  %2362 = vst [vmem:[#allocation3 + $0xd4] sm:$0xf] %v2300_v43  ;;  %v4500_v53 = vrot.slane %v2227_v48, 9  ;;  %3777 = vmatmul.mubr.bf16.gmra.mxu0 %v4578_v21 }
 0x24f   :  { %v2307_v13 = vrot.slane %v2228_v35, 5  ;;  %v2229_v26 = vld [vmem:[#allocation2 + $0x60] sm:$0xe]  ;;  %v2304_v1 = vsel %vm5461_vm7, %v4499_v63, %v2303_v20  ;;  %v2230_v50 = vld [vmem:[#allocation2 + $0x64] sm:$0x1] }
 0x250   :  { %v2231_v11 = vld [vmem:[#allocation2 + $0x68] sm:$0xe]  ;;  %v2232_v51 = vld [vmem:[#allocation2 + $0x6c] sm:$0x1]  ;;  %2363 = vst [vmem:[#allocation3 + $0xf8] sm:$0xf] %v2304_v1 }
 0x251   :  { %v2308_v56 = vsel %vm5461_vm7, %v4500_v53, %v2307_v13  ;;  %v4501_v24 = vrot.slane %v2229_v26, 9  ;;  %v2311_v39 = vrot.slane %v2230_v50, 5  ;;  %v4502_v15 = vrot.slane %v2231_v11, 9  ;;  %v5222_v14 = vld [vmem:[#allocation3 + $0x20c] ss:$36 sps:$4 sm:$0xff]   ;;  %v6094_v26 = vpop.f32.mrf.mxu0 }
 0x252   :  { %2364 = vst [vmem:[#allocation3 + $0x11c] sm:$0xf] %v2308_v56  ;;  %v2315_v23 = vrot.slane %v2232_v51, 5  ;;  %v5225_v54 = vld [vmem:[#allocation3 + $0x208] ss:$36 sps:$4 sm:$0xff]   ;;  %3679 = vmatprep.mubr.bf16.mxu1 %v5222_v14  ;;  %6654 = vst [vmem:[#allocation25_spill] sm:$0xff] %v6094_v26 }
 0x253   :  { %v2312_v52 = vsel %vm5461_vm7, %v4501_v24, %v2311_v39  ;;  %v5226_v5 = vld [vmem:[#allocation3 + $0x20] ss:$36 sps:$4 sm:$0xff]   ;;  %v2233_v38 = vld [vmem:[#allocation2 + $0x70] sm:$0xe]  ;;  %3680 = vmatmul.mubr.bf16.gmra.mxu1 %v5225_v54  ;;  %v2234_v37 = vld [vmem:[#allocation2 + $0x74] sm:$0x1]  ;;  %v4761_v50 = vpop.f32.mrf.mxu0 }
 0x254   :  { %v2316_v27 = vsel %vm5461_vm7, %v4502_v15, %v2315_v23  ;;  %2365 = vst [vmem:[#allocation3 + $0x140] sm:$0xf] %v2312_v52  ;;  %v2235_v42 = vld [vmem:[#allocation2 + $0x78] sm:$0xe]  ;;  %4985 = vmatprep.mubr.bf16.mxu1 %v5226_v5  ;;  %v2236_v58 = vld [vmem:[#allocation2 + $0x7c] sm:$0x1]  ;;  %v4697_v23 = vpop.f32.mrf.mxu1 }
 0x255   :  { %2366 = vst [vmem:[#allocation3 + $0x164] sm:$0xf] %v2316_v27  ;;  %v4503_v8 = vrot.slane %v2233_v38, 9  ;;  %v2319_v16 = vrot.slane %v2234_v37, 5  ;;  %v4504_v36 = vrot.slane %v2235_v42, 9  ;;  %v2323_v3 = vrot.slane %v2236_v58, 5  ;;  %v4762_v51 = vpop.f32.mrf.mxu0 }
 0x256   :  { %v2237_v0 = vld [vmem:[#allocation2 + $0x80] sm:$0xe]  ;;  %v2238_v12 = vld [vmem:[#allocation2 + $0x84] sm:$0x1]  ;;  %v2239_v41 = vld [vmem:[#allocation2 + $0x88] sm:$0xe]  ;;  %v4763_v56 = vadd.f32 %v4762_v51, %v4761_v50  ;;  %v4698_v5 = vpop.f32.mrf.mxu1 }
 0x257   :  { %v5227_v7 = vld [vmem:[#allocation3 + $0x68] ss:$36 sps:$4 sm:$0xff]   ;;  %v2320_v2 = vsel %vm5461_vm7, %v4503_v8, %v2319_v16  ;;  %v2324_v22 = vsel %vm5461_vm7, %v4504_v36, %v2323_v3  ;;  %v4505_v31 = vrot.slane %v2237_v0, 9  ;;  %v2327_v30 = vrot.slane %v2238_v12, 5  ;;  %v2241_v17 = vld [vmem:[#allocation2 + $0x90] sm:$0xe]  ;;  %v4764_v24 = vpop.f32.mrf.mxu0 }
 0x258   :  { %v2240_v19 = vld [vmem:[#allocation2 + $0x8c] sm:$0x1]  ;;  %2367 = vst [vmem:[#allocation3 + $0x188] sm:$0xf] %v2320_v2  ;;  %2368 = vst [vmem:[#allocation3 + $0x1ac] sm:$0xf] %v2324_v22  ;;  %v4699_v38 = vadd.f32 %v4698_v5, %v4697_v23  ;;  %v4700_v37 = vpop.f32.mrf.mxu1 }
 0x259   :  { %v4506_v29 = vrot.slane %v2239_v41, 9  ;;  %v2331_v47 = vrot.slane %v2240_v19, 5  ;;  %v2242_v33 = vld [vmem:[#allocation2 + $0x94] sm:$0x1]  ;;  %v2243_v34 = vld [vmem:[#allocation2 + $0x98] sm:$0xe]  ;;  %v2328_v32 = vsel %vm5461_vm7, %v4505_v31, %v2327_v30  ;;  %v4765_v39 = vpop.f32.mrf.mxu0 }
 0x25a   :  { %v5228_v59 = vld [vmem:[#allocation3 + $0xb0] ss:$36 sps:$4 sm:$0xff]   ;;  %v2244_v61 = vld [vmem:[#allocation2 + $0x9c] sm:$0x1]  ;;  %2369 = vst [vmem:[#allocation3 + $0x1d0] sm:$0xf] %v2328_v32  ;;  %v4766_v15 = vadd.f32 %v4765_v39, %v4764_v24  ;;  %v6096_v58 = vadd.f32 %v4763_v56, %v4699_v38  ;;  %v4701_v16 = vpop.f32.mrf.mxu1 }
 0x25b   :  { %v2332_v45 = vsel %vm5461_vm7, %v4506_v29, %v2331_v47  ;;  %4986 = vmatmul.mubr.bf16.vlgmr.msra.gmra.mxu1 %v5227_v7  ;;  %v4507_v63 = vrot.slane %v2241_v17, 9  ;;  %v2335_v21 = vrot.slane %v2242_v33, 5  ;;  %v4508_v43 = vrot.slane %v2243_v34, 9  ;;  %v5229_v53 = vld [vmem:[#allocation3 + $0xf8] ss:$36 sps:$4 sm:$0xff]   ;;  %v4767_v14 = vpop.f32.mrf.mxu0  ;;  %v5240_v26 = vld [vmem:[%s6621_s8 + $0x8] sm:$0xff]  }
 0x25c   :  { %2370 = vst [vmem:[#allocation3 + $0x1f4] sm:$0xf] %v2332_v45  ;;  %v2339_v48 = vrot.slane %v2244_v61, 5  ;;  %4989 = vmatprep.mubr.bf16.mxu1 %v5228_v59  ;;  %v5230_v13 = vld [vmem:[#allocation3 + $0x140] ss:$36 sps:$4 sm:$0xff]   ;;  %v4702_v3 = vadd.f32 %v4701_v16, %v4700_v37  ;;  %v4703_v0 = vpop.f32.mrf.mxu1 }
 0x25d   :  { %v2336_v35 = vsel %vm5461_vm7, %v4507_v63, %v2335_v21  ;;  %v4768_v54 = vpop.f32.mrf.mxu0 }
 0x25e   :  { %v2340_v20 = vsel %vm5461_vm7, %v4508_v43, %v2339_v48  ;;  %2371 = vst [vmem:[#allocation3 + $0x218] sm:$0xf] %v2336_v35  ;;  %v4769_v52 = vadd.f32 %v4768_v54, %v4767_v14  ;;  %v6098_v41 = vadd.f32 %v4766_v15, %v4702_v3  ;;  %v4704_v2 = vpop.f32.mrf.mxu1 }
 0x25f   :  { %2372 = vst [vmem:[#allocation3 + $0x23c] sm:$0xf] %v2340_v20  ;;  %v5231_v1 = vld [vmem:[#allocation3 + $0x188] ss:$36 sps:$4 sm:$0xff]   ;;  %v4770_v27 = vpop.f32.mrf.mxu0  ;;  %v4705_v19 = vadd.f32 %v4704_v2, %v4703_v0 }
 0x260   :  { %v4706_v31 = vpop.f32.mrf.mxu1 }
 0x261   :  { %v4771_v42 = vpop.f32.mrf.mxu0  ;;  %v6100_v29 = vadd.f32 %v4769_v52, %v4705_v19 }
 0x262   :  { %v4772_v8 = vadd.f32 %v4771_v42, %v4770_v27  ;;  %v4707_v17 = vpop.f32.mrf.mxu1 }
 0x263   :  { %4990 = vmatmul.mubr.bf16.gmra.mxu1 %v5229_v53  ;;  %v5232_v11 = vld [vmem:[#allocation3 + $0x1d0] ss:$36 sps:$4 sm:$0xff]   ;;  %v4773_v36 = vpop.f32.mrf.mxu0  ;;  %v4708_v33 = vadd.f32 %v4707_v17, %v4706_v31 }
 0x264   :  { %4993 = vmatprep.mubr.bf16.mxu1 %v5230_v13  ;;  %v4709_v59 = vpop.f32.mrf.mxu1 }
 0x265   :  { %v4774_v12 = vpop.f32.mrf.mxu0  ;;  %v6102_v32 = vadd.f32 %v4772_v8, %v4708_v33 }
 0x266   :  { %v5233_v6 = vld [vmem:[#allocation3 + $0x218] ss:$36 sps:$4 sm:$0xff]   ;;  %v4775_v7 = vadd.f32 %v4774_v12, %v4773_v36  ;;  %v4710_v61 = vpop.f32.mrf.mxu1 }
 0x267   :  { %v4776_v22 = vpop.f32.mrf.mxu0  ;;  %v4711_v21 = vadd.f32 %v4710_v61, %v4709_v59 }
 0x268   :  { %v4712_v48 = vpop.f32.mrf.mxu1 }
 0x269   :  { %v4777_v30 = vpop.f32.mrf.mxu0  ;;  %v6104_v35 = vadd.f32 %v4775_v7, %v4711_v21 }
 0x26a   :  { %v4778_v47 = vadd.f32 %v4777_v30, %v4776_v22  ;;  %v4713_v53 = vpop.f32.mrf.mxu1 }
 0x26b   :  { %4994 = vmatmul.mubr.bf16.gmra.mxu1 %v5231_v1  ;;  %v4779_v34 = vpop.f32.mrf.mxu0  ;;  %v4714_v1 = vadd.f32 %v4713_v53, %v4712_v48 }
 0x26c   :  { %4997 = vmatprep.mubr.bf16.mxu1 %v5232_v11  ;;  %v4715_v50 = vpop.f32.mrf.mxu1 }
 0x26d   :  { %v4780_v45 = vpop.f32.mrf.mxu0  ;;  %v6106_v11 = vadd.f32 %v4778_v47, %v4714_v1 }
 0x26e   :  { %v4781_v63 = vadd.f32 %v4780_v45, %v4779_v34  ;;  %v4716_v51 = vpop.f32.mrf.mxu1 }
 0x26f   :  { %v4782_v43 = vpop.f32.mrf.mxu0  ;;  %v4717_v56 = vadd.f32 %v4716_v51, %v4715_v50 }
 0x270   :  { %v4718_v24 = vpop.f32.mrf.mxu1 }
 0x271   :  { %v4783_v20 = vpop.f32.mrf.mxu0  ;;  %v6108_v39 = vadd.f32 %v4781_v63, %v4717_v56 }
 0x272   :  { %v4784_v13 = vadd.f32 %v4783_v20, %v4782_v43  ;;  %v4719_v15 = vpop.f32.mrf.mxu1 }
 0x273   :  { %4998 = vmatmul.mubr.bf16.gmra.mxu1 %v5233_v6  ;;  %v4720_v6 = vadd.f32 %v4719_v15, %v4718_v24 }
 0x275   :  { %v6110_v14 = vadd.f32 %v4784_v13, %v4720_v6 }
 0x27e   :  { %v4785_v23 = vpop.f32.mrf.mxu0 }
 0x280   :  { %v4786_v54 = vpop.f32.mrf.mxu0 }
 0x281   :  { %v4787_v52 = vadd.f32 %v4786_v54, %v4785_v23 }
 0x282   :  { %v4788_v5 = vpop.f32.mrf.mxu0 }
 0x284   :  { %v4789_v27 = vpop.f32.mrf.mxu0 }
 0x285   :  { %v4790_v38 = vadd.f32 %v4789_v27, %v4788_v5 }
 0x286   :  { %v4791_v42 = vpop.f32.mrf.mxu0 }
 0x288   :  { %v4721_v37 = vpop.f32.mrf.mxu1  ;;  %v4792_v16 = vpop.f32.mrf.mxu0 }
 0x289   :  { %v4793_v3 = vadd.f32 %v4792_v16, %v4791_v42 }
 0x28a   :  { %v4722_v8 = vpop.f32.mrf.mxu1  ;;  %v4794_v12 = vpop.f32.mrf.mxu0 }
 0x28b   :  { %v4723_v36 = vadd.f32 %v4722_v8, %v4721_v37 }
 0x28c   :  { %v4724_v0 = vpop.f32.mrf.mxu1  ;;  %v4795_v22 = vpop.f32.mrf.mxu0 }
 0x28d   :  { %v6112_v7 = vadd.f32 %v4787_v52, %v4723_v36  ;;  %v4796_v31 = vadd.f32 %v4795_v22, %v4794_v12 }
 0x28e   :  { %v4725_v2 = vpop.f32.mrf.mxu1 }
 0x28f   :  { %v4726_v19 = vadd.f32 %v4725_v2, %v4724_v0  ;;  %v4797_v47 = vpop.f32.mrf.mxu0 }
 0x291   :  { %v4727_v30 = vpop.f32.mrf.mxu1  ;;  %v6114_v17 = vadd.f32 %v4790_v38, %v4726_v19  ;;  %v4798_v34 = vpop.f32.mrf.mxu0 }
 0x292   :  { %v4799_v45 = vadd.f32 %v4798_v34, %v4797_v47 }
 0x293   :  { %v4728_v33 = vpop.f32.mrf.mxu1  ;;  %v4800_v63 = vpop.f32.mrf.mxu0 }
 0x294   :  { %v4729_v59 = vadd.f32 %v4728_v33, %v4727_v30 }
 0x295   :  { %v4730_v61 = vpop.f32.mrf.mxu1  ;;  %v4801_v48 = vpop.f32.mrf.mxu0 }
 0x296   :  { %v6116_v21 = vadd.f32 %v4793_v3, %v4729_v59  ;;  %v4802_v53 = vadd.f32 %v4801_v48, %v4800_v63 }
 0x297   :  { %v4731_v43 = vpop.f32.mrf.mxu1 }
 0x298   :  { %v4732_v20 = vadd.f32 %v4731_v43, %v4730_v61 }
 0x29a   :  { %v6118_v1 = vadd.f32 %v4796_v31, %v4732_v20 }
 0x29c   :  { %v4733_v13 = vpop.f32.mrf.mxu1  ;;  %6655 = vst [vmem:[#allocation26_spill] sm:$0xff] %v6118_v1 }
 0x29e   :  { %v4734_v50 = vpop.f32.mrf.mxu1 }
 0x29f   :  { %v4735_v51 = vadd.f32 %v4734_v50, %v4733_v13 }
 0x2a0   :  { %v4736_v56 = vpop.f32.mrf.mxu1 }
 0x2a1   :  { %v6120_v24 = vadd.f32 %v4799_v45, %v4735_v51  ;;  %v5234_v51 = vld [vmem:[%s6621_s8 + $0x38] sm:$0xff]  }
 0x2a2   :  { %v4737_v15 = vpop.f32.mrf.mxu1  ;;  %5001 = vmatprep.subr.bf16.mxu1 %v5234_v51 }
 0x2a3   :  { %6656 = vst [vmem:[#allocation27_spill] sm:$0xff] %v6120_v24  ;;  %v4738_v23 = vadd.f32 %v4737_v15, %v4736_v56  ;;  %v5235_v56 = vld [vmem:[%s6621_s8 + $0x30] sm:$0xff]   ;;  %5002 = vmatpush3.bf16.msra.mxu1 %v5234_v51 }
 0x2a4   :  { %5003 = vmatprep.subr.bf16.mxu1 %v5235_v56  ;;  %v5239_v51 = vld [vmem:[%s6621_s8 + $0x10] sm:$0xff]  }
 0x2a5   :  { %v4803_v6 = vpop.f32.mrf.mxu0  ;;  %v6122_v52 = vadd.f32 %v4802_v53, %v4738_v23 }
 0x2a7   :  { %v4804_v54 = vpop.f32.mrf.mxu0  ;;  %6657 = vst [vmem:[#allocation28_spill] sm:$0xff] %v6122_v52  ;;  %5004 = vmatpush3.bf16.msra.mxu1 %v5235_v56 }
 0x2a8   :  { %v4805_v8 = vadd.f32 %v4804_v54, %v4803_v6  ;;  %v5236_v54 = vld [vmem:[%s6621_s8 + $0x28] sm:$0xff]  }
 0x2a9   :  { %v6124_v5 = vpop.f32.mrf.mxu0  ;;  %5005 = vmatprep.subr.bf16.mxu1 %v5236_v54 }
 0x2ab   :  { %v4739_v27 = vpop.f32.mrf.mxu1  ;;  %v6126_v38 = vpop.f32.mrf.mxu0  ;;  %5006 = vmatpush3.bf16.msra.mxu1 %v5236_v54 }
 0x2ad   :  { %v4740_v37 = vpop.f32.mrf.mxu1 }
 0x2ae   :  { %v6128_v42 = vpop.f32.mrf.mxu0  ;;  %v4741_v16 = vadd.f32 %v4740_v37, %v4739_v27 }
 0x2af   :  { %v4742_v36 = vpop.f32.mrf.mxu1 }
 0x2b0   :  { %v6130_v3 = vpop.f32.mrf.mxu0  ;;  %v6132_v0 = vadd.f32 %v4805_v8, %v4741_v16  ;;  %v5237_v8 = vld [vmem:[%s6621_s8 + $0x20] sm:$0xff]  }
 0x2b1   :  { %v4743_v12 = vpop.f32.mrf.mxu1  ;;  %5007 = vmatprep.subr.bf16.mxu1 %v5237_v8 }
 0x2b2   :  { %6658 = vst [vmem:[#allocation29_spill] sm:$0xff] %v6132_v0  ;;  %v6134_v2 = vpop.f32.mrf.mxu0  ;;  %v6136_v22 = vadd.f32 %v4743_v12, %v4742_v36  ;;  %v5238_v12 = vld [vmem:[%s6621_s8 + $0x18] sm:$0xff]   ;;  %5008 = vmatpush3.bf16.msra.mxu1 %v5237_v8 }
 0x2b3   :  { %5009 = vmatprep.subr.bf16.mxu1 %v5238_v12 }
 0x2b4   :  { %6659 = vst [vmem:[#allocation30_spill] sm:$0xff] %v6136_v22  ;;  %v6138_v31 = vpop.f32.mrf.mxu0 }
 0x2b6   :  { %v4825_v19 = vpop.f32.mrf.mxu1  ;;  %5010 = vmatpush3.bf16.msra.mxu1 %v5238_v12 }
 0x2b7   :  { %5011 = vmatprep.subr.bf16.mxu1 %v5239_v51 }
 0x2b8   :  { %v4826_v30 = vpop.f32.mrf.mxu1 }
 0x2b9   :  { %v6140_v47 = vpop.f32.mrf.mxu0  ;;  %v4827_v33 = vadd.f32 %v4826_v30, %v4825_v19 }
 0x2ba   :  { %v6142_v34 = vpop.f32.mrf.mxu1  ;;  %5012 = vmatpush3.bf16.msra.mxu1 %v5239_v51 }
 0x2bb   :  { %v6145_v59 = vadd.f32 %v4827_v33, %v6096_v58  ;;  %v6147_v45 = vpop.f32.mrf.mxu0  ;;  %5013 = vmatprep.subr.bf16.mxu1 %v5240_v26 }
 0x2bc   :  { %v6149_v61 = vpop.f32.mrf.mxu1 }
 0x2bd   :  { %v6153_v43 = vpop.f32.mrf.mxu0 }
 0x2be   :  { %5014 = vmatpush3.bf16.msra.mxu1 %v5240_v26 }
 0x2bf   :  { %v6159_v53 = vpop.f32.mrf.mxu0  ;;  %5015 = vmatprep.subr.bf16.mxu1 %v5241_v49 }
 0x2c0   :  { %v6151_v63 = vpop.f32.mrf.mxu1 }
 0x2c2   :  { %v6155_v48 = vpop.f32.mrf.mxu1  ;;  %5016 = vmatpush3.bf16.msra.mxu1 %v5241_v49 }
 0x2c4   :  { %v6157_v20 = vpop.f32.mrf.mxu1 }
 0x2c6   :  { %v6161_v13 = vpop.f32.mrf.mxu1 }
 0x2c7   :  { %v6163_v50 = vpop.f32.mrf.mxu0 }
 0x2c9   :  { %v6175_v6 = vpop.f32.mrf.mxu0 }
 0x2cb   :  { %v6184_v37 = vpop.f32.mrf.mxu0 }
 0x2cc   :  { %v6165_v58 = vpop.f32.mrf.mxu1 }
 0x2cd   :  { %v6191_v36 = vpop.f32.mrf.mxu0 }
 0x2ce   :  { %v6173_v15 = vpop.f32.mrf.mxu1 }
 0x2d0   :  { %v6177_v23 = vpop.f32.mrf.mxu1 }
 0x2d2   :  { %v6182_v27 = vpop.f32.mrf.mxu1 }
 0x2d6   :  { %v6198_v33 = vpop.f32.mrf.mxu0 }
 0x2d8   :  { %v6203_v54 = vpop.f32.mrf.mxu0 }
 0x2da   :  { %v6189_v16 = vpop.f32.mrf.mxu1  ;;  %v6210_v8 = vpop.f32.mrf.mxu0 }
 0x2dc   :  { %v4844_v19 = vpop.f32.mrf.mxu1  ;;  %v6217_v12 = vpop.f32.mrf.mxu0 }
 0x2de   :  { %v6196_v30 = vpop.f32.mrf.mxu1 }
 0x2e0   :  { %v4847_v56 = vpop.f32.mrf.mxu1 }
 0x2e3   :  { %v6221_v28 = vpop.f32.mrf.mxu0 }
 0x2e5   :  { %v6225_v18 = vpop.f32.mrf.mxu0 }
 0x2e7   :  { %v6231_v60 = vpop.f32.mrf.mxu0 }
 0x2e8   :  { %v6208_v10 = vpop.f32.mrf.mxu1  ;;  %6660 = vst [vmem:[#allocation31_spill] sm:$0xff] %v6231_v60 }
 0x2e9   :  { %v6235_v26 = vpop.f32.mrf.mxu0 }
 0x2ea   :  { %v4850_v25 = vpop.f32.mrf.mxu1  ;;  %6661 = vst [vmem:[#allocation32_spill] sm:$0xff] %v6235_v26 }
 0x2ec   :  { %v6215_v4 = vpop.f32.mrf.mxu1 }
 0x2ee   :  { %v6219_v44 = vpop.f32.mrf.mxu1 }
 0x2f2   :  { %v6239_v46 = vpop.f32.mrf.mxu0 }
 0x2f3   :  { %6662 = vst [vmem:[#allocation33_spill] sm:$0xff] %v6239_v46  ;;  %v4830_v46 = vadd.f32 %v6149_v61, %v6142_v34 }
 0x2f4   :  { %v6245_v0 = vpop.f32.mrf.mxu0 }
 0x2f5   :  { %v6223_v51 = vpop.f32.mrf.mxu1  ;;  %6665 = vst [vmem:[#allocation36_spill] sm:$0xff] %v6245_v0 }
 0x2f6   :  { %v6249_v22 = vpop.f32.mrf.mxu0 }
 0x2f7   :  { %v6227_v9 = vpop.f32.mrf.mxu1 }
 0x2f8   :  { %v6253_v1 = vpop.f32.mrf.mxu0 }
 0x2f9   :  { %v6229_v62 = vpop.f32.mrf.mxu1  ;;  %6668 = vst [vmem:[#allocation39_spill] sm:$0xff] %v6253_v1 }
 0x2fb   :  { %v6233_v57 = vpop.f32.mrf.mxu1 }
 0x303   :  { %v6237_v55 = vpop.f32.mrf.mxu1 }
 0x305   :  { %v6241_v49 = vpop.f32.mrf.mxu1 }
 0x306   :  { %6663 = vst [vmem:[#allocation34_spill] sm:$0xff] %v6241_v49  ;;  %v6263_v49 = vpop.f32.mrf.mxu0 }
 0x307   :  { %v6243_v40 = vpop.f32.mrf.mxu1 }
 0x308   :  { %6664 = vst [vmem:[#allocation35_spill] sm:$0xff] %v6243_v40  ;;  %v4833_v40 = vadd.f32 %v6155_v48, %v6151_v63  ;;  %v6275_v61 = vpop.f32.mrf.mxu0  ;;  %v4894_v48 = vadd.f32 %v6138_v31, %v6134_v2 }
 0x309   :  { %v6247_v52 = vpop.f32.mrf.mxu1 }
 0x30a   :  { %6666 = vst [vmem:[#allocation37_spill] sm:$0xff] %v6247_v52  ;;  %v4836_v52 = vadd.f32 %v6161_v13, %v6157_v20  ;;  %v3634_v34 = vadd.f32 %v4833_v40, %v6100_v29  ;;  %v4897_v20 = vadd.f32 %v6147_v45, %v6140_v47  ;;  %v4845_v40 = vadd.f32 %v4844_v19, %v6189_v16 }
 0x30b   :  { %v4900_v29 = vadd.f32 %v6159_v53, %v6153_v43 }
 0x30c   :  { %v3637_v13 = vadd.f32 %v4836_v52, %v6102_v32  ;;  %v4903_v32 = vadd.f32 %v6175_v6, %v6163_v50  ;;  %v6298_v52 = vadd.f32 %v6126_v38, %v6124_v5  ;;  %v3650_v53 = vadd.f32 %v4845_v40, %v6108_v39 }
 0x313   :  { %v6251_v24 = vpop.f32.mrf.mxu1 }
 0x314   :  { %6667 = vst [vmem:[#allocation38_spill] sm:$0xff] %v6251_v24  ;;  %v4839_v24 = vadd.f32 %v6173_v15, %v6165_v58 }
 0x315   :  { %v6255_v60 = vpop.f32.mrf.mxu1 }
 0x316   :  { %6669 = vst [vmem:[#allocation40_spill] sm:$0xff] %v6255_v60  ;;  %v3629_v60 = vadd.f32 %v4830_v46, %v6098_v41  ;;  %v3642_v15 = vadd.f32 %v4839_v24, %v6104_v35  ;;  %v4842_v46 = vadd.f32 %v6182_v27, %v6177_v23  ;;  %v4848_v35 = vadd.f32 %v4847_v56, %v6196_v30 }
 0x317   :  { %v6257_v26 = vpop.f32.mrf.mxu1 }
 0x318   :  { %6670 = vst [vmem:[#allocation41_spill] sm:$0xff] %v6257_v26  ;;  %v4891_v26 = vadd.f32 %v6130_v3, %v6128_v42  ;;  %v6289_v42 = vpop.f32.mrf.mxu0  ;;  %v3731_v3 = vadd.f32 %v4897_v20, %v3634_v34  ;;  %v3726_v31 = vadd.f32 %v4894_v48, %v3629_v60  ;;  %v3645_v43 = vadd.f32 %v4842_v46, %v6106_v11 }
 0x319   :  { %v6265_v0 = vpop.f32.mrf.mxu1  ;;  %v4851_v60 = vadd.f32 %v4850_v25, %v6208_v10  ;;  %v3739_v50 = vadd.f32 %v4903_v32, %v3642_v15  ;;  %v4906_v11 = vadd.f32 %v6191_v36, %v6184_v37  ;;  %v4909_v25 = vadd.f32 %v6203_v54, %v6198_v33 }
 0x31a   :  { %v3723_v58 = vadd.f32 %v4891_v26, %v6145_v59  ;;  %v3734_v59 = vadd.f32 %v4900_v29, %v3637_v13  ;;  %v6307_v6 = vpop.f32.mrf.mxu0  ;;  %v4912_v10 = vadd.f32 %v6217_v12, %v6210_v8  ;;  %v3653_v39 = vadd.f32 %v4848_v35, %v6110_v14  ;;  %v6672_v35 = vld [vmem:[#allocation31_spill] sm:$0xff] }
 0x31b   :  { %v4987_v1 = vpop.f32.mrf.mxu1  ;;  %v3658_v34 = vadd.f32 %v4851_v60, %v6112_v7  ;;  %v4854_v37 = vadd.f32 %v6219_v44, %v6215_v4  ;;  %v4857_v36 = vadd.f32 %v6227_v9, %v6223_v51  ;;  %v3747_v33 = vadd.f32 %v4909_v25, %v3650_v53  ;;  %v6676_v53 = vld [vmem:[#allocation39_spill] sm:$0xff]  ;;  %v6677_v60 = vld [vmem:[#allocation26_spill] sm:$0xff] }
 0x31c   :  { %v6300_v47 = vadd.f32 %v4987_v1, %v3731_v3  ;;  %v6334_v14 = vpop.f32.mrf.mxu0  ;;  %v3742_v48 = vadd.f32 %v4906_v11, %v3645_v43  ;;  %v4915_v7 = vadd.f32 %v6225_v18, %v6221_v28  ;;  %v4860_v44 = vadd.f32 %v6233_v57, %v6229_v62  ;;  %v6671_v18 = vld [vmem:[#allocation34_spill] sm:$0xff]  ;;  %v6675_v43 = vld [vmem:[#allocation36_spill] sm:$0xff]  ;;  %v6678_v25 = vld [vmem:[#allocation27_spill] sm:$0xff] }
 0x31d   :  { %v3819_v63 = vpop.f32.mrf.mxu1  ;;  %v3750_v9 = vadd.f32 %v4912_v10, %v3653_v39  ;;  %v3661_v46 = vadd.f32 %v4854_v37, %v6114_v17  ;;  %v3666_v40 = vadd.f32 %v4857_v36, %v6116_v21  ;;  %v4863_v28 = vadd.f32 %v6671_v18, %v6237_v55  ;;  %v6674_v17 = vld [vmem:[#allocation33_spill] sm:$0xff]  ;;  %v6679_v39 = vld [vmem:[#allocation35_spill] sm:$0xff]  ;;  %v6684_v18 = vld [vmem:[#allocation30_spill] sm:$0xff] }
 0x31e   :  { %v6291_v2 = vadd.f32 %v3819_v63, %v3723_v58  ;;  %v3907_v19 = vmul.f32 %v6300_v47, %v6300_v47  ;;  %v3755_v62 = vadd.f32 %v4915_v7, %v3658_v34  ;;  %v4921_v21 = vadd.f32 %v6675_v43, %v6674_v17 }
 0x31f   :  { %v4988_v41 = vpop.f32.mrf.mxu1  ;;  %v4924_v55 = vadd.f32 %v6676_v53, %v6249_v22  ;;  %v3674_v10 = vadd.f32 %v4863_v28, %v6678_v25  ;;  %v6685_v28 = vld [vmem:[#allocation28_spill] sm:$0xff] }
 0x320   :  { %v3905_v27 = vmul.f32 %v6291_v2, %v6291_v2  ;;  %v6311_v5 = vadd.f32 %v4988_v41, %v3734_v59  ;;  %v4932_v41 = vpop.f32.mrf.mxu0  ;;  %v3763_v22 = vadd.f32 %v4921_v21, %v3666_v40 }
 0x321   :  { %v3822_v24 = vpop.f32.mrf.mxu1 }
 0x322   :  { %v6302_v45 = vadd.f32 %v3822_v24, %v3726_v31  ;;  %v3908_v8 = vmul.f32 %v6311_v5, %v6311_v5  ;;  %v6673_v24 = vld [vmem:[#allocation32_spill] sm:$0xff]  ;;  %v4934_v36 = vpop.f32.mrf.mxu0 }
 0x323   :  { %v4991_v23 = vpop.f32.mrf.mxu1  ;;  %v4918_v59 = vadd.f32 %v6673_v24, %v6672_v35 }
 0x324   :  { %v3884_v1 = vadd.f32 %v6302_v45, %v6291_v2  ;;  %v3906_v38 = vmul.f32 %v6302_v45, %v6302_v45  ;;  %v6343_v4 = vadd.f32 %v4991_v23, %v3747_v33  ;;  %v3669_v23 = vadd.f32 %v4860_v44, %v6677_v60 }
 0x325   :  { %v3835_v16 = vpop.f32.mrf.mxu1 }
 0x326   :  { %v3885_v30 = vadd.f32 %v3884_v1, %v6300_v47  ;;  %v3921_v56 = vadd.f32 %v3906_v38, %v3905_v27  ;;  %v6327_v26 = vadd.f32 %v3835_v16, %v3739_v50  ;;  %v3911_v27 = vmul.f32 %v6343_v4, %v6343_v4  ;;  %v6680_v16 = vld [vmem:[#allocation37_spill] sm:$0xff] }
 0x327   :  { %v4992_v54 = vpop.f32.mrf.mxu1 }
 0x328   :  { %v3922_v12 = vadd.f32 %v3921_v56, %v3907_v19  ;;  %v3886_v63 = vadd.f32 %v3885_v30, %v6311_v5  ;;  %v3909_v13 = vmul.f32 %v6327_v26, %v6327_v26  ;;  %v6354_v3 = vadd.f32 %v4992_v54, %v3750_v9  ;;  %v6681_v30 = vld [vmem:[#allocation38_spill] sm:$0xff]  ;;  %v6682_v56 = vld [vmem:[#allocation40_spill] sm:$0xff] }
 0x329   :  { %v3838_v51 = vpop.f32.mrf.mxu1  ;;  %v4866_v19 = vadd.f32 %v6680_v16, %v6679_v39  ;;  %v4869_v34 = vadd.f32 %v6682_v56, %v6681_v30  ;;  %v3766_v9 = vadd.f32 %v4924_v55, %v3669_v23 }
 0x32a   :  { %v3887_v20 = vadd.f32 %v3886_v63, %v6327_v26  ;;  %v3923_v58 = vadd.f32 %v3922_v12, %v3908_v8  ;;  %v6348_v15 = vadd.f32 %v3838_v51, %v3742_v48  ;;  %v3912_v33 = vmul.f32 %v6354_v3, %v6354_v3  ;;  %v6683_v48 = vld [vmem:[#allocation41_spill] sm:$0xff] }
 0x32b   :  { %v4995_v57 = vpop.f32.mrf.mxu1  ;;  %v3758_v12 = vadd.f32 %v4918_v59, %v3661_v46  ;;  %v4927_v63 = vadd.f32 %v6275_v61, %v6263_v49  ;;  %v4872_v7 = vadd.f32 %v6265_v0, %v6683_v48  ;;  %v3588_v46 = vadd.f32 %v6298_v52, %v6684_v18  ;;  %v6686_v61 = vld [vmem:[#allocation29_spill] sm:$0xff] }
 0x32c   :  { %v3924_v29 = vadd.f32 %v3923_v58, %v3909_v13  ;;  %v3888_v31 = vadd.f32 %v3887_v20, %v6348_v15  ;;  %v3910_v32 = vmul.f32 %v6348_v15, %v6348_v15  ;;  %v6383_v44 = vadd.f32 %v4995_v57, %v3763_v22 }
 0x32d   :  { %v3851_v50 = vpop.f32.mrf.mxu1  ;;  %v3677_v49 = vadd.f32 %v4866_v19, %v6685_v28  ;;  %v3771_v57 = vadd.f32 %v4927_v63, %v3674_v10  ;;  %v4930_v59 = vadd.f32 %v6307_v6, %v6289_v42  ;;  %v4933_v52 = vadd.f32 %v4932_v41, %v6334_v14 }
 0x32e   :  { %v3889_v1 = vadd.f32 %v3888_v31, %v6343_v4  ;;  %v3925_v38 = vadd.f32 %v3924_v29, %v3910_v32  ;;  %v6369_v11 = vadd.f32 %v3851_v50, %v3755_v62  ;;  %v3682_v62 = vadd.f32 %v4869_v34, %v6686_v61  ;;  %v4935_v29 = vpop.f32.mrf.mxu0 }
 0x32f   :  { %v4996_v37 = vpop.f32.mrf.mxu1  ;;  %v3685_v17 = vadd.f32 %v4872_v7, %v3588_v46  ;;  %v3915_v21 = vmul.f32 %v6383_v44, %v6383_v44  ;;  %v4936_v23 = vadd.f32 %v4935_v29, %v4934_v36  ;;  %v3774_v6 = vadd.f32 %v4930_v59, %v3677_v49 }
 0x330   :  { %v3926_v54 = vadd.f32 %v3925_v38, %v3911_v27  ;;  %v3890_v8 = vadd.f32 %v3889_v1, %v6354_v3  ;;  %v3913_v13 = vmul.f32 %v6369_v11, %v6369_v11  ;;  %v6394_v32 = vadd.f32 %v4996_v37, %v3766_v9 }
 0x331   :  { %v3854_v51 = vpop.f32.mrf.mxu1  ;;  %v3779_v50 = vadd.f32 %v4933_v52, %v3682_v62  ;;  %v3782_v41 = vadd.f32 %v4936_v23, %v3685_v17 }
 0x332   :  { %v3891_v20 = vadd.f32 %v3890_v8, %v6369_v11  ;;  %v3927_v58 = vadd.f32 %v3926_v54, %v3912_v33  ;;  %v6388_v40 = vadd.f32 %v3854_v51, %v3758_v12  ;;  %v3916_v1 = vmul.f32 %v6394_v32, %v6394_v32 }
 0x333   :  { %v4999_v0 = vpop.f32.mrf.mxu1 }
 0x334   :  { %v3928_v31 = vadd.f32 %v3927_v58, %v3913_v13  ;;  %v3892_v35 = vadd.f32 %v3891_v20, %v6388_v40  ;;  %v3914_v24 = vmul.f32 %v6388_v40, %v6388_v40  ;;  %v6410_v14 = vadd.f32 %v4999_v0, %v3779_v50 }
 0x335   :  { %v3867_v43 = vpop.f32.mrf.mxu1 }
 0x336   :  { %v3893_v53 = vadd.f32 %v3892_v35, %v6383_v44  ;;  %v3929_v55 = vadd.f32 %v3928_v31, %v3914_v24  ;;  %v6405_v60 = vadd.f32 %v3867_v43, %v3771_v57  ;;  %v3919_v37 = vmul.f32 %v6410_v14, %v6410_v14 }
 0x337   :  { %v5000_v27 = vpop.f32.mrf.mxu1 }
 0x338   :  { %v3930_v38 = vadd.f32 %v3929_v55, %v3915_v21  ;;  %v3894_v42 = vadd.f32 %v3893_v53, %v6394_v32  ;;  %v3917_v39 = vmul.f32 %v6405_v60, %v6405_v60  ;;  %v6415_v56 = vadd.f32 %v5000_v27, %v3782_v41 }
 0x339   :  { %v3870_v25 = vpop.f32.mrf.mxu1 }
 0x33a   :  { %v3895_v10 = vadd.f32 %v3894_v42, %v6405_v60  ;;  %v3931_v16 = vadd.f32 %v3930_v38, %v3916_v1  ;;  %v3871_v19 = vadd.f32 %v3870_v25, %v3774_v6  ;;  %v3920_v54 = vmul.f32 %v6415_v56, %v6415_v56 }
 0x33c   :  { %v3932_v30 = vadd.f32 %v3931_v16, %v3917_v39  ;;  %v3896_v34 = vadd.f32 %v3895_v10, %v3871_v19  ;;  %v3918_v22 = vmul.f32 %v3871_v19, %v3871_v19 }
 0x33e   :  { %v3897_v36 = vadd.f32 %v3896_v34, %v6410_v14  ;;  %v3933_v33 = vadd.f32 %v3932_v30, %v3918_v22 }
 0x340   :  { %v3898_v8 = vadd.f32 %v3897_v36, %v6415_v56  ;;  %v3934_v12 = vadd.f32 %v3933_v33, %v3919_v37 }
 0x342   :  { %v3899_v63 = vrot.slane %v3898_v8, 4  ;;  %v3935_v48 = vadd.f32 %v3934_v12, %v3920_v54 }
 0x344   :  { %v3900_v7 = vadd.f32 %v3899_v63, %v3898_v8  ;;  %v3936_v9 = vrot.slane %v3935_v48, 4 }
 0x346   :  { %v3901_v51 = vrot.slane %v3900_v7, 2  ;;  %v3937_v20 = vadd.f32 %v3936_v9, %v3935_v48 }
 0x348   :  { %v3902_v13 = vadd.f32 %v3901_v51, %v3900_v7  ;;  %v3938_v58 = vrot.slane %v3937_v20, 2 }
 0x34a   :  { %v3903_v18 = vrot.slane %v3902_v13, 1  ;;  %v3939_v46 = vadd.f32 %v3938_v58, %v3937_v20 }
 0x34c   :  { %v3904_v28 = vadd.f32 %v3903_v18, %v3902_v13  ;;  %v3940_v49 = vrot.slane %v3939_v46, 1 }
 0x34e   :  { %v3941_v61 = vadd.f32 %v3940_v49, %v3939_v46  ;;  %v3942_v62 = vmul.f32 0.0078125, %v3904_v28 }
 0x350   :  { %v3943_v0 = vmul.f32 0.0078125, %v3941_v61  ;;  %v3944_v57 = vmul.f32 %v3942_v62, %v3942_v62  ;;  %v3960_v29 = vsub.f32 %v3871_v19, %v3942_v62  ;;  %v3947_v31 = vsub.f32 %v6291_v2, %v3942_v62 }
 0x351   :  { %v3948_v35 = vsub.f32 %v6302_v45, %v3942_v62  ;;  %v3949_v24 = vsub.f32 %v6300_v47, %v3942_v62  ;;  %v3950_v59 = vsub.f32 %v6311_v5, %v3942_v62  ;;  %v3951_v52 = vsub.f32 %v6327_v26, %v3942_v62 }
 0x352   :  { %v3945_v17 = vsub.f32 %v3943_v0, %v3944_v57  ;;  %v3952_v43 = vsub.f32 %v6348_v15, %v3942_v62  ;;  %v3953_v53 = vsub.f32 %v6343_v4, %v3942_v62  ;;  %v3954_v55 = vsub.f32 %v6354_v3, %v3942_v62  ;;  %v4653_v4 = vld [vmem:[%s6619_s6] ss:$0 sm:$0xff] }
 0x353   :  { %v3955_v23 = vsub.f32 %v6369_v11, %v3942_v62  ;;  %v3956_v2 = vsub.f32 %v6388_v40, %v3942_v62  ;;  %v3957_v45 = vsub.f32 %v6383_v44, %v3942_v62  ;;  %v3958_v47 = vsub.f32 %v6394_v32, %v3942_v62 }
 0x354   :  { %v3946_v21 = vmax.f32 %v3945_v17, 0.0  ;;  %v3959_v5 = vsub.f32 %v6405_v60, %v3942_v62  ;;  %v3961_v26 = vsub.f32 %v6410_v14, %v3942_v62  ;;  %v3962_v15 = vsub.f32 %v6415_v56, %v3942_v62  ;;  %v4654_v14 = vld [vmem:[%s6620_s7] ss:$0 sm:$0xff] }
 0x355   :  { %v3982_v3 = vmul.f32 %v4653_v4, %v3960_v29  ;;  %v3969_v11 = vmul.f32 %v4653_v4, %v3947_v31  ;;  %v3970_v27 = vmul.f32 %v4653_v4, %v3948_v35  ;;  %v3971_v40 = vmul.f32 %v4653_v4, %v3949_v24 }
 0x356   :  { %v3985_v50 = vadd.f32 1e-05, %v3946_v21  ;;  %v3972_v1 = vmul.f32 %v4653_v4, %v3950_v59  ;;  %v3973_v44 = vmul.f32 %v4653_v4, %v3951_v52  ;;  %v3974_v38 = vmul.f32 %v4653_v4, %v3952_v43 }
 0x357   :  { %v3975_v32 = vmul.f32 %v4653_v4, %v3953_v53  ;;  %v3976_v42 = vmul.f32 %v4653_v4, %v3954_v55  ;;  %v3977_v6 = vmul.f32 %v4653_v4, %v3955_v23  ;;  %v3978_v60 = vmul.f32 %v4653_v4, %v3956_v2 }
 0x358   :  { %5244 = vrsqrt.f32 %v3985_v50  ;;  %v3979_v41 = vmul.f32 %v4653_v4, %v3957_v45  ;;  %v3980_v10 = vmul.f32 %v4653_v4, %v3958_v47  ;;  %v3981_v39 = vmul.f32 %v4653_v4, %v3959_v5 }
 0x359   :  { %v3983_v16 = vmul.f32 %v4653_v4, %v3961_v26  ;;  %v3984_v19 = vmul.f32 %v4653_v4, %v3962_v15 }
 0x365   :  { %v5245_v25 = vpop.eup %5244 }
 0x366   :  { %v3987_v30 = vmul.f32 %v5245_v25, %v3969_v11  ;;  %v3988_v56 = vmul.f32 %v5245_v25, %v3970_v27  ;;  %v3989_v34 = vmul.f32 %v5245_v25, %v3971_v40  ;;  %v3990_v22 = vmul.f32 %v5245_v25, %v3972_v1 }
 0x367   :  { %v3991_v37 = vmul.f32 %v5245_v25, %v3973_v44  ;;  %v3992_v36 = vmul.f32 %v5245_v25, %v3974_v38  ;;  %v3993_v33 = vmul.f32 %v5245_v25, %v3975_v32  ;;  %v3994_v54 = vmul.f32 %v5245_v25, %v3976_v42 }
 0x368   :  { %v4009_v8 = vadd.f32 %v4654_v14, %v3987_v30  ;;  %v4010_v12 = vadd.f32 %v4654_v14, %v3988_v56  ;;  %v4011_v63 = vadd.f32 %v4654_v14, %v3989_v34  ;;  %v4012_v48 = vadd.f32 %v4654_v14, %v3990_v22 }
 0x369   :  { %v4013_v7 = vadd.f32 %v4654_v14, %v3991_v37  ;;  %v4014_v9 = vadd.f32 %v4654_v14, %v3992_v36  ;;  %v4015_v51 = vadd.f32 %v4654_v14, %v3993_v33  ;;  %v4016_v20 = vadd.f32 %v4654_v14, %v3994_v54 }
 0x36a   :  { %v4025_v13 = vmax.f32 %v4009_v8, 0.0  ;;  %v4026_v58 = vmax.f32 %v4010_v12, 0.0  ;;  %v4027_v18 = vmax.f32 %v4011_v63, 0.0  ;;  %v4028_v46 = vmax.f32 %v4012_v48, 0.0 }
 0x36b   :  { %v4029_v28 = vmax.f32 %v4013_v7, 0.0  ;;  %v4030_v49 = vmax.f32 %v4014_v9, 0.0  ;;  %v4031_v61 = vmax.f32 %v4015_v51, 0.0  ;;  %v4032_v62 = vmax.f32 %v4016_v20, 0.0 }
 0x36c   :  { %v4041_v0 = vpack.c.bf16 %v4026_v58, %v4025_v13  ;;  %v4042_v57 = vpack.c.bf16 %v4028_v46, %v4027_v18  ;;  %v3995_v29 = vmul.f32 %v5245_v25, %v3977_v6  ;;  %v3996_v31 = vmul.f32 %v5245_v25, %v3978_v60 }
 0x36d   :  { %v4043_v35 = vpack.c.bf16 %v4030_v49, %v4029_v28  ;;  %v4044_v24 = vpack.c.bf16 %v4032_v62, %v4031_v61  ;;  %v3997_v59 = vmul.f32 %v5245_v25, %v3979_v41  ;;  %v3998_v52 = vmul.f32 %v5245_v25, %v3980_v10 }
 0x36e   :  { %5017 = vmatprep.mubr.bf16.mxu1 %v4041_v0  ;;  %v4017_v17 = vadd.f32 %v4654_v14, %v3995_v29  ;;  %v4018_v43 = vadd.f32 %v4654_v14, %v3996_v31  ;;  %v3999_v21 = vmul.f32 %v5245_v25, %v3981_v39  ;;  %v4000_v53 = vmul.f32 %v5245_v25, %v3982_v3 }
 0x36f   :  { %5018 = vmatmul.mubr.bf16.vlgmr.msra.gmra.mxu1 %v4042_v57  ;;  %v4019_v55 = vadd.f32 %v4654_v14, %v3997_v59  ;;  %v4020_v23 = vadd.f32 %v4654_v14, %v3998_v52  ;;  %v4001_v2 = vmul.f32 %v5245_v25, %v3983_v16  ;;  %v4002_v45 = vmul.f32 %v5245_v25, %v3984_v19 }
 0x370   :  { %5021 = vmatprep.mubr.bf16.mxu1 %v4043_v35  ;;  %v4033_v47 = vmax.f32 %v4017_v17, 0.0  ;;  %v4034_v50 = vmax.f32 %v4018_v43, 0.0  ;;  %v4021_v5 = vadd.f32 %v4654_v14, %v3999_v21  ;;  %v4022_v26 = vadd.f32 %v4654_v14, %v4000_v53 }
 0x371   :  { %v4035_v15 = vmax.f32 %v4019_v55, 0.0  ;;  %v4036_v4 = vmax.f32 %v4020_v23, 0.0  ;;  %v4023_v11 = vadd.f32 %v4654_v14, %v4001_v2  ;;  %v4024_v27 = vadd.f32 %v4654_v14, %v4002_v45 }
 0x372   :  { %v4045_v40 = vpack.c.bf16 %v4034_v50, %v4033_v47  ;;  %v4037_v1 = vmax.f32 %v4021_v5, 0.0  ;;  %v4038_v44 = vmax.f32 %v4022_v26, 0.0 }
 0x373   :  { %v4046_v38 = vpack.c.bf16 %v4036_v4, %v4035_v15  ;;  %v4039_v32 = vmax.f32 %v4023_v11, 0.0  ;;  %v4040_v3 = vmax.f32 %v4024_v27, 0.0 }
 0x374   :  { %v4047_v42 = vpack.c.bf16 %v4038_v44, %v4037_v1 }
 0x375   :  { %v4048_v6 = vpack.c.bf16 %v4040_v3, %v4039_v32 }
 0x377   :  { %5022 = vmatmul.mubr.bf16.gmra.mxu1 %v4044_v24 }
 0x378   :  { %5025 = vmatprep.mubr.bf16.mxu1 %v4045_v40 }
 0x37f   :  { %5026 = vmatmul.mubr.bf16.gmra.mxu1 %v4046_v38 }
 0x380   :  { %5029 = vmatprep.mubr.bf16.mxu1 %v4047_v42 }
 0x387   :  { %5030 = vmatmul.mubr.bf16.gmra.mxu1 %v4048_v6 }
 0x42f   :  { %v6444_v60 = vpop.f32.mrf.mxu1 }
 0x430   :  { %v4235_v30 = vmul.f32 %v6444_v60, %v6444_v60 }
 0x431   :  { %v6446_v41 = vpop.f32.mrf.mxu1 }
 0x432   :  { %v4233_v10 = vmul.f32 %v6446_v41, %v6446_v41 }
 0x433   :  { %v6448_v25 = vpop.f32.mrf.mxu1 }
 0x434   :  { %v4236_v37 = vmul.f32 %v6448_v25, %v6448_v25 }
 0x435   :  { %v6450_v14 = vpop.f32.mrf.mxu1 }
 0x436   :  { %v4212_v39 = vadd.f32 %v6450_v14, %v6446_v41  ;;  %v4234_v16 = vmul.f32 %v6450_v14, %v6450_v14 }
 0x437   :  { %v6458_v19 = vpop.f32.mrf.mxu1 }
 0x438   :  { %v4213_v56 = vadd.f32 %v6444_v60, %v4212_v39  ;;  %v4249_v34 = vadd.f32 %v4234_v16, %v4233_v10  ;;  %v4239_v13 = vmul.f32 %v6458_v19, %v6458_v19 }
 0x439   :  { %v6463_v22 = vpop.f32.mrf.mxu1 }
 0x43a   :  { %v4250_v36 = vadd.f32 %v4249_v34, %v4235_v30  ;;  %v4214_v33 = vadd.f32 %v6448_v25, %v4213_v56  ;;  %v4237_v12 = vmul.f32 %v6463_v22, %v6463_v22 }
 0x43b   :  { %v6468_v54 = vpop.f32.mrf.mxu1 }
 0x43c   :  { %v4215_v8 = vadd.f32 %v4214_v33, %v6463_v22  ;;  %v4251_v63 = vadd.f32 %v4250_v36, %v4236_v37  ;;  %v4240_v28 = vmul.f32 %v6468_v54, %v6468_v54 }
 0x43d   :  { %v6473_v48 = vpop.f32.mrf.mxu1 }
 0x43e   :  { %v4252_v7 = vadd.f32 %v4251_v63, %v4237_v12  ;;  %v4216_v9 = vadd.f32 %v4215_v8, %v6473_v48  ;;  %v4238_v51 = vmul.f32 %v6473_v48, %v6473_v48 }
 0x43f   :  { %v6478_v20 = vpop.f32.mrf.mxu1 }
 0x440   :  { %v4217_v58 = vadd.f32 %v6458_v19, %v4216_v9  ;;  %v4253_v18 = vadd.f32 %v4252_v7, %v4238_v51  ;;  %v4243_v17 = vmul.f32 %v6478_v20, %v6478_v20 }
 0x441   :  { %v6483_v46 = vpop.f32.mrf.mxu1 }
 0x442   :  { %v4254_v49 = vadd.f32 %v4253_v18, %v4239_v13  ;;  %v4218_v61 = vadd.f32 %v6468_v54, %v4217_v58  ;;  %v4241_v57 = vmul.f32 %v6483_v46, %v6483_v46  ;;  %v4442_v58 = vld [vmem:[%s6615_s2] ss:$0 sm:$0xff] }
 0x443   :  { %v6488_v62 = vpop.f32.mrf.mxu1  ;;  %v6687_v18 = vld [vmem:[#allocation10_spill] sm:$0xff] }
 0x444   :  { %v4219_v0 = vadd.f32 %v4218_v61, %v6483_v46  ;;  %v4255_v29 = vadd.f32 %v4254_v49, %v4240_v28  ;;  %v4244_v55 = vmul.f32 %v6488_v62, %v6488_v62  ;;  %v6528_v28 = vadd.f32 %v4442_v58, %v6687_v18  ;;  %v6688_v49 = vld [vmem:[#allocation11_spill] sm:$0xff] }
 0x445   :  { %v6493_v31 = vpop.f32.mrf.mxu1  ;;  %v6531_v61 = vadd.f32 %v4442_v58, %v6688_v49 }
 0x446   :  { %v4256_v35 = vadd.f32 %v4255_v29, %v4241_v57  ;;  %v4220_v24 = vadd.f32 %v4219_v0, %v6493_v31  ;;  %v4242_v59 = vmul.f32 %v6493_v31, %v6493_v31  ;;  %v6689_v0 = vld [vmem:[#allocation12_spill] sm:$0xff]  ;;  %v6690_v29 = vld [vmem:[#allocation13_spill] sm:$0xff] }
 0x447   :  { %v6498_v52 = vpop.f32.mrf.mxu1  ;;  %v6534_v57 = vadd.f32 %v4442_v58, %v6689_v0 }
 0x448   :  { %v4221_v43 = vadd.f32 %v6478_v20, %v4220_v24  ;;  %v4257_v21 = vadd.f32 %v4256_v35, %v4242_v59  ;;  %v4247_v27 = vmul.f32 %v6498_v52, %v6498_v52  ;;  %v6537_v35 = vadd.f32 %v4442_v58, %v6690_v29  ;;  %v6691_v24 = vld [vmem:[#allocation14_spill] sm:$0xff] }
 0x449   :  { %v6503_v53 = vpop.f32.mrf.mxu1  ;;  %v6540_v59 = vadd.f32 %v4442_v58, %v6691_v24 }
 0x44a   :  { %v4258_v23 = vadd.f32 %v4257_v21, %v4243_v17  ;;  %v4222_v2 = vadd.f32 %v6488_v62, %v4221_v43  ;;  %v4245_v50 = vmul.f32 %v6503_v53, %v6503_v53  ;;  %v6692_v17 = vld [vmem:[#allocation15_spill] sm:$0xff]  ;;  %v6693_v21 = vld [vmem:[#allocation16_spill] sm:$0xff] }
 0x44b   :  { %v6508_v45 = vpop.f32.mrf.mxu1  ;;  %v6543_v43 = vadd.f32 %v4442_v58, %v6692_v17 }
 0x44c   :  { %v4223_v47 = vadd.f32 %v4222_v2, %v6503_v53  ;;  %v4259_v5 = vadd.f32 %v4258_v23, %v4244_v55  ;;  %v4248_v44 = vmul.f32 %v6508_v45, %v6508_v45  ;;  %v6546_v55 = vadd.f32 %v4442_v58, %v6693_v21  ;;  %v6694_v23 = vld [vmem:[#allocation17_spill] sm:$0xff] }
 0x44d   :  { %v6513_v26 = vpop.f32.mrf.mxu1  ;;  %v6549_v2 = vadd.f32 %v4442_v58, %v6694_v23 }
 0x44e   :  { %v4260_v15 = vadd.f32 %v4259_v5, %v4245_v50  ;;  %v4224_v4 = vadd.f32 %v4223_v47, %v6513_v26  ;;  %v4246_v11 = vmul.f32 %v6513_v26, %v6513_v26  ;;  %v6695_v47 = vld [vmem:[#allocation18_spill] sm:$0xff]  ;;  %v6696_v5 = vld [vmem:[#allocation19_spill] sm:$0xff] }
 0x44f   :  { %v6552_v50 = vadd.f32 %v4442_v58, %v6695_v47 }
 0x450   :  { %v4225_v40 = vadd.f32 %v6498_v52, %v4224_v4  ;;  %v4261_v1 = vadd.f32 %v4260_v15, %v4246_v11  ;;  %v6555_v15 = vadd.f32 %v4442_v58, %v6696_v5  ;;  %v6697_v4 = vld [vmem:[#allocation20_spill] sm:$0xff] }
 0x451   :  { %v6558_v11 = vadd.f32 %v4442_v58, %v6697_v4 }
 0x452   :  { %v4226_v38 = vadd.f32 %v6508_v45, %v4225_v40  ;;  %v4262_v32 = vadd.f32 %v4261_v1, %v4247_v27  ;;  %v6698_v27 = vld [vmem:[#allocation21_spill] sm:$0xff]  ;;  %v6699_v1 = vld [vmem:[#allocation22_spill] sm:$0xff] }
 0x453   :  { %v6561_v40 = vadd.f32 %v4442_v58, %v6698_v27 }
 0x454   :  { %v4227_v3 = vrot.slane %v4226_v38, 4  ;;  %v4263_v42 = vadd.f32 %v4262_v32, %v4248_v44  ;;  %v6564_v44 = vadd.f32 %v4442_v58, %v6699_v1 }
 0x456   :  { %v4228_v6 = vadd.f32 %v4227_v3, %v4226_v38  ;;  %v4264_v10 = vrot.slane %v4263_v42, 4  ;;  %v6700_v38 = vld [vmem:[#allocation23_spill] sm:$0xff]  ;;  %v6701_v3 = vld [vmem:[#allocation24_spill] sm:$0xff] }
 0x457   :  { %v347_v32 = vadd.f32 %v4442_v58, %v6700_v38 }
 0x458   :  { %v4229_v39 = vrot.slane %v4228_v6, 2  ;;  %v4265_v16 = vadd.f32 %v4264_v10, %v4263_v42  ;;  %v6568_v42 = vadd.f32 %v4442_v58, %v6701_v3 }
 0x45a   :  { %v4230_v30 = vadd.f32 %v4229_v39, %v4228_v6  ;;  %v4266_v56 = vrot.slane %v4265_v16, 2  ;;  %v6702_v6 = vld [vmem:[#allocation25_spill] sm:$0xff] }
 0x45b   :  { %v6571_v10 = vadd.f32 %v4442_v58, %v6702_v6 }
 0x45c   :  { %v4231_v34 = vrot.slane %v4230_v30, 1  ;;  %v4267_v37 = vadd.f32 %v4266_v56, %v4265_v16 }
 0x45e   :  { %v4232_v36 = vadd.f32 %v4231_v34, %v4230_v30  ;;  %v4268_v33 = vrot.slane %v4267_v37, 1  ;;  %v4663_v34 = vld [vmem:[%s6622_s9] ss:$0 sm:$0xff] }
 0x460   :  { %v4269_v8 = vadd.f32 %v4268_v33, %v4267_v37  ;;  %v4270_v12 = vmul.f32 0.0078125, %v4232_v36 }
 0x462   :  { %v4271_v63 = vmul.f32 0.0078125, %v4269_v8  ;;  %v4272_v7 = vmul.f32 %v4270_v12, %v4270_v12  ;;  %v4288_v39 = vsub.f32 %v6513_v26, %v4270_v12  ;;  %v4275_v16 = vsub.f32 %v6446_v41, %v4270_v12 }
 0x463   :  { %v4276_v30 = vsub.f32 %v6450_v14, %v4270_v12  ;;  %v4277_v56 = vsub.f32 %v6444_v60, %v4270_v12  ;;  %v4278_v37 = vsub.f32 %v6448_v25, %v4270_v12  ;;  %v4279_v36 = vsub.f32 %v6463_v22, %v4270_v12 }
 0x464   :  { %v4273_v9 = vsub.f32 %v4271_v63, %v4272_v7  ;;  %v4280_v33 = vsub.f32 %v6473_v48, %v4270_v12  ;;  %v4281_v8 = vsub.f32 %v6458_v19, %v4270_v12  ;;  %v4282_v26 = vsub.f32 %v6468_v54, %v4270_v12 }
 0x465   :  { %v4283_v41 = vsub.f32 %v6483_v46, %v4270_v12  ;;  %v4284_v14 = vsub.f32 %v6493_v31, %v4270_v12  ;;  %v4285_v60 = vsub.f32 %v6478_v20, %v4270_v12  ;;  %v4286_v63 = vsub.f32 %v6488_v62, %v4270_v12  ;;  %v4664_v62 = vld [vmem:[%s6623_s10] ss:$0 sm:$0xff]  ;;  %s5296_s10 = smov [#allocation7]  }
 0x466   :  { %v4274_v51 = vmax.f32 %v4273_v9, 0.0  ;;  %v4287_v7 = vsub.f32 %v6503_v53, %v4270_v12  ;;  %v4289_v25 = vsub.f32 %v6498_v52, %v4270_v12  ;;  %v4290_v22 = vsub.f32 %v6508_v45, %v4270_v12  ;;  %s4406_s30 = sshll.u32 %s5296_s10, 4  ;;  %s4407_s30 = int_to_ptr.vmem [resolvable:$true] %s4406_s30 }
 0x467   :  { %v4310_v9 = vmul.f32 %v4663_v34, %v4288_v39  ;;  %v4297_v48 = vmul.f32 %v4663_v34, %v4275_v16  ;;  %v4299_v19 = vmul.f32 %v4663_v34, %v4277_v56  ;;  %v4301_v54 = vmul.f32 %v4663_v34, %v4279_v36  ;;  %s5268_s3 = scalar_lea.vmem %s4407_s30, 2048  ;;  %p5273_p6 = scmp.lt.s32.totalorder %s4407_s30, %s4407_s30 }
 0x468   :  { %v4313_v13 = vadd.f32 1e-05, %v4274_v51  ;;  %v4298_v51 = vmul.f32 %v4663_v34, %v4276_v30  ;;  %v4302_v58 = vmul.f32 %v4663_v34, %v4280_v33  ;;  %v4303_v46 = vmul.f32 %v4663_v34, %v4281_v8  ;;  %p5269_p5 = scmp.ne.s32.totalorder %s4407_s30, %s5268_s3  ;;  %p5274_p7 = scmp.lt.s32.totalorder %s5268_s3, %s5268_s3 }
 0x469   :  { %v4304_v18 = vmul.f32 %v4663_v34, %v4282_v26  ;;  %v4305_v31 = vmul.f32 %v4663_v34, %v4283_v41  ;;  %v4306_v49 = vmul.f32 %v4663_v34, %v4284_v14  ;;  %v4307_v20 = vmul.f32 %v4663_v34, %v4285_v60 }
 0x46a   :  { %5246 = vrsqrt.f32 %v4313_v13  ;;  %v4300_v13 = vmul.f32 %v4663_v34, %v4278_v37  ;;  %v4308_v52 = vmul.f32 %v4663_v34, %v4286_v63  ;;  %v4309_v53 = vmul.f32 %v4663_v34, %v4287_v7  ;;  %p5275_p8 = por %p5274_p7, %p5273_p6 }
 0x46b   :  { %v4311_v45 = vmul.f32 %v4663_v34, %v4289_v25  ;;  %v4312_v12 = vmul.f32 %v4663_v34, %v4290_v22 }
 0x46c   :  { %p5276_p9 = pnand %p5275_p8, %p5269_p5 }
 0x477   :  { %v5247_v0 = vpop.eup %5246 }
 0x478   :  { %v4328_v29 = vmul.f32 %v5247_v0, %v4310_v9  ;;  %v4315_v24 = vmul.f32 %v5247_v0, %v4297_v48  ;;  %v4316_v17 = vmul.f32 %v5247_v0, %v4298_v51  ;;  %v4317_v21 = vmul.f32 %v5247_v0, %v4299_v19 }
 0x479   :  { %v4318_v23 = vmul.f32 %v5247_v0, %v4300_v13  ;;  %v4319_v47 = vmul.f32 %v5247_v0, %v4301_v54  ;;  %v4320_v5 = vmul.f32 %v5247_v0, %v4302_v58  ;;  %v4321_v4 = vmul.f32 %v5247_v0, %v4303_v46 }
 0x47a   :  { %v4350_v27 = vadd.f32 %v4664_v62, %v4328_v29  ;;  %v4322_v1 = vmul.f32 %v5247_v0, %v4304_v18  ;;  %v4323_v38 = vmul.f32 %v5247_v0, %v4305_v31  ;;  %v4324_v3 = vmul.f32 %v5247_v0, %v4306_v49 }
 0x47b   :  { %v4325_v6 = vmul.f32 %v5247_v0, %v4307_v20  ;;  %v4326_v39 = vmul.f32 %v5247_v0, %v4308_v52  ;;  %v4327_v16 = vmul.f32 %v5247_v0, %v4309_v53  ;;  %v4329_v30 = vmul.f32 %v5247_v0, %v4311_v45 }
 0x47c   :  { %v4366_v56 = vadd.f32 %v4350_v27, %v347_v32  ;;  %v4330_v37 = vmul.f32 %v5247_v0, %v4312_v12  ;;  %v4337_v36 = vadd.f32 %v4664_v62, %v4315_v24  ;;  %v4338_v34 = vadd.f32 %v4664_v62, %v4316_v17 }
 0x47d   :  { %v4339_v33 = vadd.f32 %v4664_v62, %v4317_v21  ;;  %v4340_v8 = vadd.f32 %v4664_v62, %v4318_v23  ;;  %v4341_v26 = vadd.f32 %v4664_v62, %v4319_v47  ;;  %v4342_v41 = vadd.f32 %v4664_v62, %v4320_v5 }
 0x47e   :  { %v4382_v14 = vmax.f32 %v4366_v56, 0.0  ;;  %v4343_v60 = vadd.f32 %v4664_v62, %v4321_v4  ;;  %v4344_v63 = vadd.f32 %v4664_v62, %v4322_v1  ;;  %v4345_v7 = vadd.f32 %v4664_v62, %v4323_v38 }
 0x47f   :  { %v4346_v25 = vadd.f32 %v4664_v62, %v4324_v3  ;;  %v4347_v22 = vadd.f32 %v4664_v62, %v4325_v6  ;;  %v4348_v9 = vadd.f32 %v4664_v62, %v4326_v39  ;;  %v4349_v48 = vadd.f32 %v4664_v62, %v4327_v16 }
 0x480   :  { %4398 = vst [vmem:[#allocation7 + $0x68] sm:$0xff] %v4382_v14  ;;  %v4351_v51 = vadd.f32 %v4664_v62, %v4329_v30  ;;  %v4352_v19 = vadd.f32 %v4664_v62, %v4330_v37  ;;  %v4353_v32 = vadd.f32 %v4337_v36, %v6528_v28  ;;  %v4354_v13 = vadd.f32 %v4338_v34, %v6531_v61 }
 0x481   :  { %v4355_v54 = vadd.f32 %v4339_v33, %v6534_v57  ;;  %v4356_v58 = vadd.f32 %v4340_v8, %v6537_v35  ;;  %v4357_v46 = vadd.f32 %v4341_v26, %v6540_v59  ;;  %v4358_v18 = vadd.f32 %v4342_v41, %v6543_v43 }
 0x482   :  { %v4359_v31 = vadd.f32 %v4343_v60, %v6546_v55  ;;  %v4360_v49 = vadd.f32 %v4344_v63, %v6549_v2  ;;  %v4361_v20 = vadd.f32 %v4345_v7, %v6552_v50  ;;  %v4362_v0 = vadd.f32 %v4346_v25, %v6555_v15 }
 0x483   :  { %v4363_v28 = vadd.f32 %v4347_v22, %v6558_v11  ;;  %v4364_v61 = vadd.f32 %v4348_v9, %v6561_v40  ;;  %v4365_v57 = vadd.f32 %v4349_v48, %v6564_v44  ;;  %v4367_v35 = vadd.f32 %v4351_v51, %v6568_v42 }
 0x484   :  { %v4368_v59 = vadd.f32 %v4352_v19, %v6571_v10  ;;  %v4369_v62 = vmax.f32 %v4353_v32, 0.0  ;;  %v4370_v43 = vmax.f32 %v4354_v13, 0.0  ;;  %v4371_v52 = vmax.f32 %v4355_v54, 0.0 }
 0x485   :  { %v4372_v55 = vmax.f32 %v4356_v58, 0.0  ;;  %v4373_v2 = vmax.f32 %v4357_v46, 0.0  ;;  %v4374_v50 = vmax.f32 %v4358_v18, 0.0  ;;  %v4375_v53 = vmax.f32 %v4359_v31, 0.0 }
 0x486   :  { %v4376_v15 = vmax.f32 %v4360_v49, 0.0  ;;  %v4377_v45 = vmax.f32 %v4361_v20, 0.0  ;;  %v4378_v11 = vmax.f32 %v4362_v0, 0.0  ;;  %v4379_v12 = vmax.f32 %v4363_v28, 0.0  ;;  %4385 = vst [vmem:[#allocation7] sm:$0xff] %v4369_v62  ;;  %4386 = vst [vmem:[#allocation7 + $0x8] sm:$0xff] %v4370_v43 }
 0x487   :  { %4387 = vst [vmem:[#allocation7 + $0x10] sm:$0xff] %v4371_v52  ;;  %v4380_v40 = vmax.f32 %v4364_v61, 0.0  ;;  %v4381_v44 = vmax.f32 %v4365_v57, 0.0  ;;  %v4383_v42 = vmax.f32 %v4367_v35, 0.0  ;;  %v4384_v10 = vmax.f32 %v4368_v59, 0.0  ;;  %4388 = vst [vmem:[#allocation7 + $0x18] sm:$0xff] %v4372_v55 }
 0x488   :  { %4389 = vst [vmem:[#allocation7 + $0x20] sm:$0xff] %v4373_v2  ;;  %4390 = vst [vmem:[#allocation7 + $0x28] sm:$0xff] %v4374_v50 }
 0x489   :  { %4391 = vst [vmem:[#allocation7 + $0x30] sm:$0xff] %v4375_v53  ;;  %4392 = vst [vmem:[#allocation7 + $0x38] sm:$0xff] %v4376_v15 }
 0x48a   :  { %4393 = vst [vmem:[#allocation7 + $0x40] sm:$0xff] %v4377_v45  ;;  %4394 = vst [vmem:[#allocation7 + $0x48] sm:$0xff] %v4378_v11 }
 0x48b   :  { %4395 = vst [vmem:[#allocation7 + $0x50] sm:$0xff] %v4379_v12  ;;  %4396 = vst [vmem:[#allocation7 + $0x58] sm:$0xff] %v4380_v40 }
 0x48c   :  { %4397 = vst [vmem:[#allocation7 + $0x60] sm:$0xff] %v4381_v44  ;;  %4399 = vst [vmem:[#allocation7 + $0x70] sm:$0xff] %v4383_v42 }
 0x48d   :  { %4400 = vst [vmem:[#allocation7 + $0x78] sm:$0xff] %v4384_v10 }
 0x48e   :  { %5279 = shalt.err (!%p5276_p9)
}
 0x48f   :  { %s5297_s12 = smov 128   ;;  %s5298_s4 = smov 8  }
 0x490   :  { %4412 = dma.vmem_to_hbm [thread:$0]  %s4407_s30, 2048, %s6624_s11, [#allocation6], %s5297_s12, %s5297_s12, %s5298_s4  }
 0x491   :  { %5290 = dma.done.wait [#allocation6], 2048  }
 0x492   :  { %5291 = vsyncadd [#allocation6], 4294965248 }
 0x493   :  { %4416 = vsyncpa [#allocation5], 1 }
 0x494   :  { %4417 = vsyncpa [#allocation6], 1 }

</bundles_post_ra>
